<compile_context>
chip_gen: v7x
topology: tpu7x:2x2x1
jax: 0.10.0
libtpu: 0.0.40
codegen_flags: <defaults>
</compile_context>

<pallas_src>
import jax
import jax.numpy as jnp
from jax.experimental import pallas as pl
from jax.experimental.pallas import tpu as pltpu

L_EMBED = 6
IN_DIM = 3 + 3 * 2 * L_EMBED        # 39
IN_PAD = 128                        # lane-dense padded input width
HID = 256
OUT_DIM = 4
OUT_PAD = 128                       # lane-dense padded fc9 output width
TM_MAX = 2048                       # max rows per grid step
TM_MIN = 128
MIN_STEPS = 4                       # >= 2 grid steps per v7x TensorCore
VMEM_LIMIT_BYTES = 48 * 1024 * 1024  # > v5e's 16 MiB default, < v7x 64 MiB physical


def _device_kind() -> str:
    try:
        return jax.devices()[0].device_kind.lower()
    except Exception:
        return ""


# v5e/v5p (and older) have no bf16 VALU: keep the bias+ReLU epilogue in f32
# there. On v6e/v7x a bf16 epilogue halves the VALU vreg-ops per layer.
_KIND = _device_kind()
EPILOGUE_BF16 = not any(v in _KIND for v in ("v2", "v3", "v4", "v5"))


def mlp_kernel(x_ref,
               w1, b1, w2, b2, w3, b3, w4, b4,
               w5a, w5b, b5,
               w6, b6, w7, b7, w8, b8, w9, b9,
               o_ref):
    # Activations enter the MXU in bf16; accumulation is f32.
    x_bf = x_ref[...].astype(jnp.bfloat16)                    # (TM, 128)

    def relu_to_bf16(acc_f32):
        if EPILOGUE_BF16:
            # Cast first, ReLU in bf16: half the VALU passes on v6e/v7x.
            acc_f32 = acc_f32.astype(jnp.bfloat16)
        return jnp.maximum(acc_f32, 0).astype(jnp.bfloat16)

    def lin_relu(h_bf, w, b):
        acc = jnp.dot(h_bf, w[...], preferred_element_type=jnp.float32) + b[...]
        return relu_to_bf16(acc)

    h = lin_relu(x_bf, w1, b1)
    h = lin_relu(h, w2, b2)
    h = lin_relu(h, w3, b3)
    h = lin_relu(h, w4, b4)
    # fc5 on concat([h, x]) == h @ W5a + x @ W5b + b5
    acc5 = (jnp.dot(h, w5a[...], preferred_element_type=jnp.float32)
            + jnp.dot(x_bf, w5b[...], preferred_element_type=jnp.float32)
            + b5[...])
    h = relu_to_bf16(acc5)
    h = lin_relu(h, w6, b6)
    h = lin_relu(h, w7, b7)
    h = lin_relu(h, w8, b8)
    # fc9 padded to 128 lanes -> unmasked lane-dense store (bf16 writeback).
    out = jnp.dot(h, w9[...], preferred_element_type=jnp.float32) + b9[...]
    o_ref[...] = out.astype(o_ref.dtype)


def _resident_spec(shape):
    """Whole array resident in VMEM; constant block index for every step."""
    index_map = lambda i: (0,) * len(shape)
    try:
        # Never re-DMA'd -> a single pipeline buffer avoids the dead second
        # copy of each resident weight in VMEM.
        return pl.BlockSpec(shape, index_map, pipeline_mode=pl.Buffered(1))
    except TypeError:
        # Older BlockSpec without pipeline_mode: fall back to the default.
        return pl.BlockSpec(shape, index_map)


def _choose_tm(n):
    """Largest power-of-two tile <= TM_MAX giving >= MIN_STEPS grid steps."""
    tm = TM_MAX
    while tm > TM_MIN and -(-n // tm) < MIN_STEPS:
        tm //= 2
    return tm


@jax.jit
def mlp_forward(x, params):
    N = x.shape[0]
    tm = _choose_tm(N)
    n_steps = -(-N // tm)
    if n_steps > 1 and n_steps % 2 == 1:
        n_steps += 1                      # even grid: balanced across v7x TCs
    n_pad = n_steps * tm

    # Pad rows to the tile grid and features to 128 lanes (lane-dense loads).
    x = jnp.pad(x, ((0, n_pad - N), (0, IN_PAD - x.shape[1])))

    weight_args = params

    # Advisory cost estimate for XLA's scheduler.
    flops = 2 * n_pad * (IN_PAD * HID + 6 * HID * HID
                         + (HID + IN_PAD) * HID + HID * OUT_PAD)
    bytes_accessed = (n_pad * IN_PAD * 4 + n_pad * OUT_PAD * 2
                      + sum(int(a.size) * a.dtype.itemsize for a in weight_args))

    in_specs = [pl.BlockSpec((tm, IN_PAD), lambda i: (i, 0))]
    in_specs += [_resident_spec(a.shape) for a in weight_args]

    out = pl.pallas_call(
        mlp_kernel,
        out_shape=jax.ShapeDtypeStruct((n_pad, OUT_PAD), jnp.bfloat16),
        grid_spec=pltpu.PrefetchScalarGridSpec(
            num_scalar_prefetch=0,
            grid=(n_steps,),
            in_specs=in_specs,
            out_specs=pl.BlockSpec((tm, OUT_PAD), lambda i: (i, 0)),
        ),
        compiler_params=pltpu.CompilerParams(
            dimension_semantics=("parallel",),
            vmem_limit_bytes=VMEM_LIMIT_BYTES),
        cost_estimate=pl.CostEstimate(flops=flops, transcendentals=0,
                                      bytes_accessed=bytes_accessed),
    )(x, *weight_args)

    return out[:N, :OUT_DIM].astype(jnp.float32)


def init_params(key):
    """Deterministic init mimicking nn.Linear (uniform +/- 1/sqrt(fan_in))."""
    dims = [
        (IN_DIM, HID),          # fc1
        (HID, HID),             # fc2
        (HID, HID),             # fc3
        (HID, HID),             # fc4
        (HID + IN_DIM, HID),    # fc5 (acts on concat)
        (HID, HID),             # fc6
        (HID, HID),             # fc7
        (HID, HID),             # fc8
        (HID, OUT_DIM),         # fc9
    ]
    keys = jax.random.split(key, 2 * len(dims))
    ws, bs = [], []
    for idx, (fan_in, fan_out) in enumerate(dims):
        bound = 1.0 / jnp.sqrt(fan_in)
        # stored as [in, out] (already transposed vs torch's [out, in])
        w = jax.random.uniform(keys[2 * idx], (fan_in, fan_out),
                               jnp.float32, -bound, bound)
        b = jax.random.uniform(keys[2 * idx + 1], (1, fan_out),
                               jnp.float32, -bound, bound)
        ws.append(w)
        bs.append(b)

    # fc1: zero-pad input rows 39 -> 128 (matches the lane-padded x).
    w1p = jnp.zeros((IN_PAD, HID), jnp.float32).at[:IN_DIM, :].set(ws[0])

    # fc5 weight split: rows hitting h (first HID) vs rows hitting orig x
    # (zero-padded to 128 input rows to match lane-padded x).
    w5 = ws[4]
    w5a = w5[:HID, :]
    w5b = jnp.zeros((IN_PAD, HID), jnp.float32).at[:IN_DIM, :].set(w5[HID:, :])

    # fc9 padded to 128 output lanes (extra columns are zero, sliced off).
    w9p = jnp.zeros((HID, OUT_PAD), jnp.float32).at[:, :OUT_DIM].set(ws[8])
    b9p = jnp.zeros((1, OUT_PAD), jnp.float32).at[:, :OUT_DIM].set(bs[8])

    bf = lambda a: a.astype(jnp.bfloat16)   # weights go to the MXU in bf16
    params = (bf(w1p), bs[0], bf(ws[1]), bs[1], bf(ws[2]), bs[2],
              bf(ws[3]), bs[3],
              bf(w5a), bf(w5b), bs[4],
              bf(ws[5]), bs[5], bf(ws[6]), bs[6], bf(ws[7]), bs[7],
              bf(w9p), b9p)
    return params, ws, bs


def reference_forward(x, ws, bs):
    """Pure f32 reference (matches the PyTorch module)."""
    h = jax.nn.relu(x @ ws[0] + bs[0])
    h = jax.nn.relu(h @ ws[1] + bs[1])
    h = jax.nn.relu(h @ ws[2] + bs[2])
    h = jax.nn.relu(h @ ws[3] + bs[3])
    h = jax.nn.relu(jnp.concatenate([h, x], axis=-1) @ ws[4] + bs[4])
    h = jax.nn.relu(h @ ws[5] + bs[5])
    h = jax.nn.relu(h @ ws[6] + bs[6])
    h = jax.nn.relu(h @ ws[7] + bs[7])
    return h @ ws[8] + bs[8]


def reference_forward_kernel_numerics(x, ws, bs):
    """Mimics the kernel exactly: bf16 operands, f32 MXU accumulation,
    bf16 epilogue where enabled, fc5 split, bf16 output store."""
    bf = jnp.bfloat16

    def mm(h, w):
        return jnp.dot(h.astype(bf), w.astype(bf),
                       preferred_element_type=jnp.float32)

    def relu_epi(acc):
        if EPILOGUE_BF16:
            acc = acc.astype(bf)
        return jnp.maximum(acc, 0).astype(jnp.float32)

    h = relu_epi(mm(x, ws[0]) + bs[0])
    h = relu_epi(mm(h, ws[1]) + bs[1])
    h = relu_epi(mm(h, ws[2]) + bs[2])
    h = relu_epi(mm(h, ws[3]) + bs[3])
    w5a, w5b = ws[4][:HID, :], ws[4][HID:, :]
    h = relu_epi(mm(h, w5a) + mm(x, w5b) + bs[4])
    h = relu_epi(mm(h, ws[5]) + bs[5])
    h = relu_epi(mm(h, ws[6]) + bs[6])
    h = relu_epi(mm(h, ws[7]) + bs[7])
    out = mm(h, ws[8]) + bs[8]
    return out.astype(bf).astype(jnp.float32)


if __name__ == "__main__":
    key = jax.random.PRNGKey(0)
    pkey, xkey = jax.random.split(key)

    params, ws, bs = init_params(pkey)

    # Deliberately NOT a multiple of the row tile: exercises the pad+slice
    # path. With MIN_STEPS=4 the auto-chosen tile is 256 -> a 4-step grid
    # (2 steps per v7x TensorCore).
    N = 1000
    x = jax.random.normal(xkey, (N, IN_DIM), jnp.float32)

    out = jax.block_until_ready(mlp_forward(x, params))
    assert out.shape == (N, OUT_DIM)

    # Tight check vs a reference that mimics the kernel's exact numerics.
    ref_kernel = reference_forward_kernel_numerics(x, ws, bs)
    assert jnp.allclose(out, ref_kernel, atol=2e-3, rtol=2e-3), \
        "mismatch vs kernel-numerics reference"

    # Looser check vs the pure-f32 (PyTorch-equivalent) reference: only bf16
    # quantization error should remain.
    ref_f32 = reference_forward(x, ws, bs)
    assert jnp.allclose(out, ref_f32, atol=5e-2, rtol=5e-2), \
        "mismatch vs f32 reference"

    print("KERNEL_OK")
</pallas_src>

<mosaic_0001>
module attributes {stable_mosaic.version = 11 : i64} {
  func.func @mlp_kernel(%arg0: i32, %arg1: memref<256x128xf32, #tpu.memory_space<vmem>>, %arg2: memref<128x256xbf16, #tpu.memory_space<vmem>>, %arg3: memref<1x256xf32, #tpu.memory_space<vmem>>, %arg4: memref<256x256xbf16, #tpu.memory_space<vmem>>, %arg5: memref<1x256xf32, #tpu.memory_space<vmem>>, %arg6: memref<256x256xbf16, #tpu.memory_space<vmem>>, %arg7: memref<1x256xf32, #tpu.memory_space<vmem>>, %arg8: memref<256x256xbf16, #tpu.memory_space<vmem>>, %arg9: memref<1x256xf32, #tpu.memory_space<vmem>>, %arg10: memref<256x256xbf16, #tpu.memory_space<vmem>>, %arg11: memref<128x256xbf16, #tpu.memory_space<vmem>>, %arg12: memref<1x256xf32, #tpu.memory_space<vmem>>, %arg13: memref<256x256xbf16, #tpu.memory_space<vmem>>, %arg14: memref<1x256xf32, #tpu.memory_space<vmem>>, %arg15: memref<256x256xbf16, #tpu.memory_space<vmem>>, %arg16: memref<1x256xf32, #tpu.memory_space<vmem>>, %arg17: memref<256x256xbf16, #tpu.memory_space<vmem>>, %arg18: memref<1x256xf32, #tpu.memory_space<vmem>>, %arg19: memref<256x128xbf16, #tpu.memory_space<vmem>>, %arg20: memref<1x128xf32, #tpu.memory_space<vmem>>, %arg21: memref<256x128xbf16, #tpu.memory_space<vmem>>) attributes {dimension_semantics = [#tpu.dimension_semantics<parallel>], iteration_bounds = array<i64: 4>, scalar_prefetch = 0 : i64, scratch_operands = 0 : i64, tpu.core_type = #tpu.core_type<tc>, window_params = [{transform_indices = @transform_0, window_bounds = array<i64: 256, 128>}, {pipeline_mode = #tpu.pipeline_mode<synchronous>, transform_indices = @transform_1, window_bounds = array<i64: 128, 256>}, {pipeline_mode = #tpu.pipeline_mode<synchronous>, transform_indices = @transform_2, window_bounds = array<i64: 1, 256>}, {pipeline_mode = #tpu.pipeline_mode<synchronous>, transform_indices = @transform_3, window_bounds = array<i64: 256, 256>}, {pipeline_mode = #tpu.pipeline_mode<synchronous>, transform_indices = @transform_4, window_bounds = array<i64: 1, 256>}, {pipeline_mode = #tpu.pipeline_mode<synchronous>, transform_indices = @transform_5, window_bounds = array<i64: 256, 256>}, {pipeline_mode = #tpu.pipeline_mode<synchronous>, transform_indices = @transform_6, window_bounds = array<i64: 1, 256>}, {pipeline_mode = #tpu.pipeline_mode<synchronous>, transform_indices = @transform_7, window_bounds = array<i64: 256, 256>}, {pipeline_mode = #tpu.pipeline_mode<synchronous>, transform_indices = @transform_8, window_bounds = array<i64: 1, 256>}, {pipeline_mode = #tpu.pipeline_mode<synchronous>, transform_indices = @transform_9, window_bounds = array<i64: 256, 256>}, {pipeline_mode = #tpu.pipeline_mode<synchronous>, transform_indices = @transform_10, window_bounds = array<i64: 128, 256>}, {pipeline_mode = #tpu.pipeline_mode<synchronous>, transform_indices = @transform_11, window_bounds = array<i64: 1, 256>}, {pipeline_mode = #tpu.pipeline_mode<synchronous>, transform_indices = @transform_12, window_bounds = array<i64: 256, 256>}, {pipeline_mode = #tpu.pipeline_mode<synchronous>, transform_indices = @transform_13, window_bounds = array<i64: 1, 256>}, {pipeline_mode = #tpu.pipeline_mode<synchronous>, transform_indices = @transform_14, window_bounds = array<i64: 256, 256>}, {pipeline_mode = #tpu.pipeline_mode<synchronous>, transform_indices = @transform_15, window_bounds = array<i64: 1, 256>}, {pipeline_mode = #tpu.pipeline_mode<synchronous>, transform_indices = @transform_16, window_bounds = array<i64: 256, 256>}, {pipeline_mode = #tpu.pipeline_mode<synchronous>, transform_indices = @transform_17, window_bounds = array<i64: 1, 256>}, {pipeline_mode = #tpu.pipeline_mode<synchronous>, transform_indices = @transform_18, window_bounds = array<i64: 256, 128>}, {pipeline_mode = #tpu.pipeline_mode<synchronous>, transform_indices = @transform_19, window_bounds = array<i64: 1, 128>}, {transform_indices = @transform_20, window_bounds = array<i64: 256, 128>}]} {
    %c0 = arith.constant 0 : index
    %c0_0 = arith.constant 0 : index
    %0 = vector.load %arg1[%c0, %c0_0] : memref<256x128xf32, #tpu.memory_space<vmem>>, vector<256x128xf32>
    %1 = arith.truncf %0 : vector<256x128xf32> to vector<256x128xbf16>
    %c0_1 = arith.constant 0 : index
    %c0_2 = arith.constant 0 : index
    %2 = vector.load %arg2[%c0_1, %c0_2] : memref<128x256xbf16, #tpu.memory_space<vmem>>, vector<128x256xbf16>
    %cst = arith.constant dense<0.000000e+00> : vector<256x256xf32>
    %3 = tpu.matmul %1, %2, %cst {dimension_numbers = #tpu.dot_dimension_numbers<[1], [0], [0], [1], [0, 0, 1, 1], [], []>} : vector<256x128xbf16>, vector<128x256xbf16>, vector<256x256xf32> -> vector<256x256xf32>
    %c0_3 = arith.constant 0 : index
    %c0_4 = arith.constant 0 : index
    %4 = vector.load %arg3[%c0_3, %c0_4] : memref<1x256xf32, #tpu.memory_space<vmem>>, vector<1x256xf32>
    %5 = vector.broadcast %4 : vector<1x256xf32> to vector<256x256xf32>
    %6 = arith.addf %3, %5 : vector<256x256xf32>
    %7 = arith.truncf %6 : vector<256x256xf32> to vector<256x256xbf16>
    %cst_5 = arith.constant 0.000000e+00 : bf16
    %8 = vector.broadcast %cst_5 : bf16 to vector<256x256xbf16>
    %9 = arith.maximumf %7, %8 : vector<256x256xbf16>
    %c0_6 = arith.constant 0 : index
    %c0_7 = arith.constant 0 : index
    %10 = vector.load %arg4[%c0_6, %c0_7] : memref<256x256xbf16, #tpu.memory_space<vmem>>, vector<256x256xbf16>
    %cst_8 = arith.constant dense<0.000000e+00> : vector<256x256xf32>
    %11 = tpu.matmul %9, %10, %cst_8 {dimension_numbers = #tpu.dot_dimension_numbers<[1], [0], [0], [1], [0, 0, 1, 1], [], []>} : vector<256x256xbf16>, vector<256x256xbf16>, vector<256x256xf32> -> vector<256x256xf32>
    %c0_9 = arith.constant 0 : index
    %c0_10 = arith.constant 0 : index
    %12 = vector.load %arg5[%c0_9, %c0_10] : memref<1x256xf32, #tpu.memory_space<vmem>>, vector<1x256xf32>
    %13 = vector.broadcast %12 : vector<1x256xf32> to vector<256x256xf32>
    %14 = arith.addf %11, %13 : vector<256x256xf32>
    %15 = arith.truncf %14 : vector<256x256xf32> to vector<256x256xbf16>
    %cst_11 = arith.constant 0.000000e+00 : bf16
    %16 = vector.broadcast %cst_11 : bf16 to vector<256x256xbf16>
    %17 = arith.maximumf %15, %16 : vector<256x256xbf16>
    %c0_12 = arith.constant 0 : index
    %c0_13 = arith.constant 0 : index
    %18 = vector.load %arg6[%c0_12, %c0_13] : memref<256x256xbf16, #tpu.memory_space<vmem>>, vector<256x256xbf16>
    %cst_14 = arith.constant dense<0.000000e+00> : vector<256x256xf32>
    %19 = tpu.matmul %17, %18, %cst_14 {dimension_numbers = #tpu.dot_dimension_numbers<[1], [0], [0], [1], [0, 0, 1, 1], [], []>} : vector<256x256xbf16>, vector<256x256xbf16>, vector<256x256xf32> -> vector<256x256xf32>
    %c0_15 = arith.constant 0 : index
    %c0_16 = arith.constant 0 : index
    %20 = vector.load %arg7[%c0_15, %c0_16] : memref<1x256xf32, #tpu.memory_space<vmem>>, vector<1x256xf32>
    %21 = vector.broadcast %20 : vector<1x256xf32> to vector<256x256xf32>
    %22 = arith.addf %19, %21 : vector<256x256xf32>
    %23 = arith.truncf %22 : vector<256x256xf32> to vector<256x256xbf16>
    %cst_17 = arith.constant 0.000000e+00 : bf16
    %24 = vector.broadcast %cst_17 : bf16 to vector<256x256xbf16>
    %25 = arith.maximumf %23, %24 : vector<256x256xbf16>
    %c0_18 = arith.constant 0 : index
    %c0_19 = arith.constant 0 : index
    %26 = vector.load %arg8[%c0_18, %c0_19] : memref<256x256xbf16, #tpu.memory_space<vmem>>, vector<256x256xbf16>
    %cst_20 = arith.constant dense<0.000000e+00> : vector<256x256xf32>
    %27 = tpu.matmul %25, %26, %cst_20 {dimension_numbers = #tpu.dot_dimension_numbers<[1], [0], [0], [1], [0, 0, 1, 1], [], []>} : vector<256x256xbf16>, vector<256x256xbf16>, vector<256x256xf32> -> vector<256x256xf32>
    %c0_21 = arith.constant 0 : index
    %c0_22 = arith.constant 0 : index
    %28 = vector.load %arg9[%c0_21, %c0_22] : memref<1x256xf32, #tpu.memory_space<vmem>>, vector<1x256xf32>
    %29 = vector.broadcast %28 : vector<1x256xf32> to vector<256x256xf32>
    %30 = arith.addf %27, %29 : vector<256x256xf32>
    %31 = arith.truncf %30 : vector<256x256xf32> to vector<256x256xbf16>
    %cst_23 = arith.constant 0.000000e+00 : bf16
    %32 = vector.broadcast %cst_23 : bf16 to vector<256x256xbf16>
    %33 = arith.maximumf %31, %32 : vector<256x256xbf16>
    %c0_24 = arith.constant 0 : index
    %c0_25 = arith.constant 0 : index
    %34 = vector.load %arg10[%c0_24, %c0_25] : memref<256x256xbf16, #tpu.memory_space<vmem>>, vector<256x256xbf16>
    %cst_26 = arith.constant dense<0.000000e+00> : vector<256x256xf32>
    %35 = tpu.matmul %33, %34, %cst_26 {dimension_numbers = #tpu.dot_dimension_numbers<[1], [0], [0], [1], [0, 0, 1, 1], [], []>} : vector<256x256xbf16>, vector<256x256xbf16>, vector<256x256xf32> -> vector<256x256xf32>
    %c0_27 = arith.constant 0 : index
    %c0_28 = arith.constant 0 : index
    %36 = vector.load %arg11[%c0_27, %c0_28] : memref<128x256xbf16, #tpu.memory_space<vmem>>, vector<128x256xbf16>
    %cst_29 = arith.constant dense<0.000000e+00> : vector<256x256xf32>
    %37 = tpu.matmul %1, %36, %cst_29 {dimension_numbers = #tpu.dot_dimension_numbers<[1], [0], [0], [1], [0, 0, 1, 1], [], []>} : vector<256x128xbf16>, vector<128x256xbf16>, vector<256x256xf32> -> vector<256x256xf32>
    %38 = arith.addf %35, %37 : vector<256x256xf32>
    %c0_30 = arith.constant 0 : index
    %c0_31 = arith.constant 0 : index
    %39 = vector.load %arg12[%c0_30, %c0_31] : memref<1x256xf32, #tpu.memory_space<vmem>>, vector<1x256xf32>
    %40 = vector.broadcast %39 : vector<1x256xf32> to vector<256x256xf32>
    %41 = arith.addf %38, %40 : vector<256x256xf32>
    %42 = arith.truncf %41 : vector<256x256xf32> to vector<256x256xbf16>
    %cst_32 = arith.constant 0.000000e+00 : bf16
    %43 = vector.broadcast %cst_32 : bf16 to vector<256x256xbf16>
    %44 = arith.maximumf %42, %43 : vector<256x256xbf16>
    %c0_33 = arith.constant 0 : index
    %c0_34 = arith.constant 0 : index
    %45 = vector.load %arg13[%c0_33, %c0_34] : memref<256x256xbf16, #tpu.memory_space<vmem>>, vector<256x256xbf16>
    %cst_35 = arith.constant dense<0.000000e+00> : vector<256x256xf32>
    %46 = tpu.matmul %44, %45, %cst_35 {dimension_numbers = #tpu.dot_dimension_numbers<[1], [0], [0], [1], [0, 0, 1, 1], [], []>} : vector<256x256xbf16>, vector<256x256xbf16>, vector<256x256xf32> -> vector<256x256xf32>
    %c0_36 = arith.constant 0 : index
    %c0_37 = arith.constant 0 : index
    %47 = vector.load %arg14[%c0_36, %c0_37] : memref<1x256xf32, #tpu.memory_space<vmem>>, vector<1x256xf32>
    %48 = vector.broadcast %47 : vector<1x256xf32> to vector<256x256xf32>
    %49 = arith.addf %46, %48 : vector<256x256xf32>
    %50 = arith.truncf %49 : vector<256x256xf32> to vector<256x256xbf16>
    %cst_38 = arith.constant 0.000000e+00 : bf16
    %51 = vector.broadcast %cst_38 : bf16 to vector<256x256xbf16>
    %52 = arith.maximumf %50, %51 : vector<256x256xbf16>
    %c0_39 = arith.constant 0 : index
    %c0_40 = arith.constant 0 : index
    %53 = vector.load %arg15[%c0_39, %c0_40] : memref<256x256xbf16, #tpu.memory_space<vmem>>, vector<256x256xbf16>
    %cst_41 = arith.constant dense<0.000000e+00> : vector<256x256xf32>
    %54 = tpu.matmul %52, %53, %cst_41 {dimension_numbers = #tpu.dot_dimension_numbers<[1], [0], [0], [1], [0, 0, 1, 1], [], []>} : vector<256x256xbf16>, vector<256x256xbf16>, vector<256x256xf32> -> vector<256x256xf32>
    %c0_42 = arith.constant 0 : index
    %c0_43 = arith.constant 0 : index
    %55 = vector.load %arg16[%c0_42, %c0_43] : memref<1x256xf32, #tpu.memory_space<vmem>>, vector<1x256xf32>
    %56 = vector.broadcast %55 : vector<1x256xf32> to vector<256x256xf32>
    %57 = arith.addf %54, %56 : vector<256x256xf32>
    %58 = arith.truncf %57 : vector<256x256xf32> to vector<256x256xbf16>
    %cst_44 = arith.constant 0.000000e+00 : bf16
    %59 = vector.broadcast %cst_44 : bf16 to vector<256x256xbf16>
    %60 = arith.maximumf %58, %59 : vector<256x256xbf16>
    %c0_45 = arith.constant 0 : index
    %c0_46 = arith.constant 0 : index
    %61 = vector.load %arg17[%c0_45, %c0_46] : memref<256x256xbf16, #tpu.memory_space<vmem>>, vector<256x256xbf16>
    %cst_47 = arith.constant dense<0.000000e+00> : vector<256x256xf32>
    %62 = tpu.matmul %60, %61, %cst_47 {dimension_numbers = #tpu.dot_dimension_numbers<[1], [0], [0], [1], [0, 0, 1, 1], [], []>} : vector<256x256xbf16>, vector<256x256xbf16>, vector<256x256xf32> -> vector<256x256xf32>
    %c0_48 = arith.constant 0 : index
    %c0_49 = arith.constant 0 : index
    %63 = vector.load %arg18[%c0_48, %c0_49] : memref<1x256xf32, #tpu.memory_space<vmem>>, vector<1x256xf32>
    %64 = vector.broadcast %63 : vector<1x256xf32> to vector<256x256xf32>
    %65 = arith.addf %62, %64 : vector<256x256xf32>
    %66 = arith.truncf %65 : vector<256x256xf32> to vector<256x256xbf16>
    %cst_50 = arith.constant 0.000000e+00 : bf16
    %67 = vector.broadcast %cst_50 : bf16 to vector<256x256xbf16>
    %68 = arith.maximumf %66, %67 : vector<256x256xbf16>
    %c0_51 = arith.constant 0 : index
    %c0_52 = arith.constant 0 : index
    %69 = vector.load %arg19[%c0_51, %c0_52] : memref<256x128xbf16, #tpu.memory_space<vmem>>, vector<256x128xbf16>
    %cst_53 = arith.constant dense<0.000000e+00> : vector<256x128xf32>
    %70 = tpu.matmul %68, %69, %cst_53 {dimension_numbers = #tpu.dot_dimension_numbers<[1], [0], [0], [1], [0, 0, 1, 1], [], []>} : vector<256x256xbf16>, vector<256x128xbf16>, vector<256x128xf32> -> vector<256x128xf32>
    %c0_54 = arith.constant 0 : index
    %c0_55 = arith.constant 0 : index
    %71 = vector.load %arg20[%c0_54, %c0_55] : memref<1x128xf32, #tpu.memory_space<vmem>>, vector<1x128xf32>
    %72 = vector.broadcast %71 : vector<1x128xf32> to vector<256x128xf32>
    %73 = arith.addf %70, %72 : vector<256x128xf32>
    %74 = arith.truncf %73 : vector<256x128xf32> to vector<256x128xbf16>
    %c0_56 = arith.constant 0 : index
    %c0_57 = arith.constant 0 : index
    %75 = vector.load %arg21[%c0_56, %c0_57] : memref<256x128xbf16, #tpu.memory_space<vmem>>, vector<256x128xbf16>
    tpu.vector_store %arg21[%c0_56, %c0_57], %74 {strides = array<i32>} : memref<256x128xbf16, #tpu.memory_space<vmem>>, vector<256x128xbf16>,
    return
  }
  func.func @transform_0(%arg0: i32) -> (i32, i32) {
    %c0_i32 = arith.constant 0 : i32
    %c0_i32_0 = arith.constant 0 : i32
    return %arg0, %c0_i32 : i32, i32
  }
  func.func @transform_1(%arg0: i32) -> (i32, i32) {
    %c0_i32 = arith.constant 0 : i32
    %c0_i32_0 = arith.constant 0 : i32
    %c0_i32_1 = arith.constant 0 : i32
    return %c0_i32, %c0_i32_0 : i32, i32
  }
  func.func @transform_2(%arg0: i32) -> (i32, i32) {
    %c0_i32 = arith.constant 0 : i32
    %c0_i32_0 = arith.constant 0 : i32
    %c0_i32_1 = arith.constant 0 : i32
    return %c0_i32, %c0_i32_0 : i32, i32
  }
  func.func @transform_3(%arg0: i32) -> (i32, i32) {
    %c0_i32 = arith.constant 0 : i32
    %c0_i32_0 = arith.constant 0 : i32
    %c0_i32_1 = arith.constant 0 : i32
    return %c0_i32, %c0_i32_0 : i32, i32
  }
  func.func @transform_4(%arg0: i32) -> (i32, i32) {
    %c0_i32 = arith.constant 0 : i32
    %c0_i32_0 = arith.constant 0 : i32
    %c0_i32_1 = arith.constant 0 : i32
    return %c0_i32, %c0_i32_0 : i32, i32
  }
  func.func @transform_5(%arg0: i32) -> (i32, i32) {
    %c0_i32 = arith.constant 0 : i32
    %c0_i32_0 = arith.constant 0 : i32
    %c0_i32_1 = arith.constant 0 : i32
    return %c0_i32, %c0_i32_0 : i32, i32
  }
  func.func @transform_6(%arg0: i32) -> (i32, i32) {
    %c0_i32 = arith.constant 0 : i32
    %c0_i32_0 = arith.constant 0 : i32
    %c0_i32_1 = arith.constant 0 : i32
    return %c0_i32, %c0_i32_0 : i32, i32
  }
  func.func @transform_7(%arg0: i32) -> (i32, i32) {
    %c0_i32 = arith.constant 0 : i32
    %c0_i32_0 = arith.constant 0 : i32
    %c0_i32_1 = arith.constant 0 : i32
    return %c0_i32, %c0_i32_0 : i32, i32
  }
  func.func @transform_8(%arg0: i32) -> (i32, i32) {
    %c0_i32 = arith.constant 0 : i32
    %c0_i32_0 = arith.constant 0 : i32
    %c0_i32_1 = arith.constant 0 : i32
    return %c0_i32, %c0_i32_0 : i32, i32
  }
  func.func @transform_9(%arg0: i32) -> (i32, i32) {
    %c0_i32 = arith.constant 0 : i32
    %c0_i32_0 = arith.constant 0 : i32
    %c0_i32_1 = arith.constant 0 : i32
    return %c0_i32, %c0_i32_0 : i32, i32
  }
  func.func @transform_10(%arg0: i32) -> (i32, i32) {
    %c0_i32 = arith.constant 0 : i32
    %c0_i32_0 = arith.constant 0 : i32
    %c0_i32_1 = arith.constant 0 : i32
    return %c0_i32, %c0_i32_0 : i32, i32
  }
  func.func @transform_11(%arg0: i32) -> (i32, i32) {
    %c0_i32 = arith.constant 0 : i32
    %c0_i32_0 = arith.constant 0 : i32
    %c0_i32_1 = arith.constant 0 : i32
    return %c0_i32, %c0_i32_0 : i32, i32
  }
  func.func @transform_12(%arg0: i32) -> (i32, i32) {
    %c0_i32 = arith.constant 0 : i32
    %c0_i32_0 = arith.constant 0 : i32
    %c0_i32_1 = arith.constant 0 : i32
    return %c0_i32, %c0_i32_0 : i32, i32
  }
  func.func @transform_13(%arg0: i32) -> (i32, i32) {
    %c0_i32 = arith.constant 0 : i32
    %c0_i32_0 = arith.constant 0 : i32
    %c0_i32_1 = arith.constant 0 : i32
    return %c0_i32, %c0_i32_0 : i32, i32
  }
  func.func @transform_14(%arg0: i32) -> (i32, i32) {
    %c0_i32 = arith.constant 0 : i32
    %c0_i32_0 = arith.constant 0 : i32
    %c0_i32_1 = arith.constant 0 : i32
    return %c0_i32, %c0_i32_0 : i32, i32
  }
  func.func @transform_15(%arg0: i32) -> (i32, i32) {
    %c0_i32 = arith.constant 0 : i32
    %c0_i32_0 = arith.constant 0 : i32
    %c0_i32_1 = arith.constant 0 : i32
    return %c0_i32, %c0_i32_0 : i32, i32
  }
  func.func @transform_16(%arg0: i32) -> (i32, i32) {
    %c0_i32 = arith.constant 0 : i32
    %c0_i32_0 = arith.constant 0 : i32
    %c0_i32_1 = arith.constant 0 : i32
    return %c0_i32, %c0_i32_0 : i32, i32
  }
  func.func @transform_17(%arg0: i32) -> (i32, i32) {
    %c0_i32 = arith.constant 0 : i32
    %c0_i32_0 = arith.constant 0 : i32
    %c0_i32_1 = arith.constant 0 : i32
    return %c0_i32, %c0_i32_0 : i32, i32
  }
  func.func @transform_18(%arg0: i32) -> (i32, i32) {
    %c0_i32 = arith.constant 0 : i32
    %c0_i32_0 = arith.constant 0 : i32
    %c0_i32_1 = arith.constant 0 : i32
    return %c0_i32, %c0_i32_0 : i32, i32
  }
  func.func @transform_19(%arg0: i32) -> (i32, i32) {
    %c0_i32 = arith.constant 0 : i32
    %c0_i32_0 = arith.constant 0 : i32
    %c0_i32_1 = arith.constant 0 : i32
    return %c0_i32, %c0_i32_0 : i32, i32
  }
  func.func @transform_20(%arg0: i32) -> (i32, i32) {
    %c0_i32 = arith.constant 0 : i32
    %c0_i32_0 = arith.constant 0 : i32
    return %arg0, %c0_i32 : i32, i32
  }
}

</mosaic_0001>

<bundles_post_ra>
// kernel: mlp_forward.1
= control target key start
LH: loop header
LB: loop body
LE: loop exit
PB: predicated region body
PF: predicated region fallthrough
CT: control target
= control target key end

     0   :  { %s8163_s0 = inlined_call_operand.vmem [shape: f32[1024,128], index: 0, kind: input, shape index: {}]   ;;  %s8164_s1 = inlined_call_operand.vmem [shape: bf16[128,256], index: 1, kind: input, shape index: {}]   ;;  %s8165_s2 = inlined_call_operand.vmem [shape: f32[1,256], index: 2, kind: input, shape index: {}]   ;;  %s8166_s3 = inlined_call_operand.vmem [shape: bf16[256,256], index: 3, kind: input, shape index: {}]   ;;  %s8167_s4 = inlined_call_operand.vmem [shape: f32[1,256], index: 4, kind: input, shape index: {}]   ;;  %s8168_s5 = inlined_call_operand.vmem [shape: bf16[256,256], index: 5, kind: input, shape index: {}]   ;;  %s8169_s6 = inlined_call_operand.vmem [shape: f32[1,256], index: 6, kind: input, shape index: {}]   ;;  %s8170_s7 = inlined_call_operand.vmem [shape: bf16[256,256], index: 7, kind: input, shape index: {}]   ;;  %s8171_s8 = inlined_call_operand.vmem [shape: f32[1,256], index: 8, kind: input, shape index: {}]   ;;  %s8172_s9 = inlined_call_operand.vmem [shape: bf16[256,256], index: 9, kind: input, shape index: {}]   ;;  %s8173_s10 = inlined_call_operand.vmem [shape: bf16[128,256], index: 10, kind: input, shape index: {}]   ;;  %s8174_s11 = inlined_call_operand.vmem [shape: f32[1,256], index: 11, kind: input, shape index: {}]   ;;  %s8175_s12 = inlined_call_operand.vmem [shape: bf16[256,256], index: 12, kind: input, shape index: {}]   ;;  %s8176_s13 = inlined_call_operand.vmem [shape: f32[1,256], index: 13, kind: input, shape index: {}]   ;;  %s8177_s14 = inlined_call_operand.vmem [shape: bf16[256,256], index: 14, kind: input, shape index: {}]   ;;  %s8178_s15 = inlined_call_operand.vmem [shape: f32[1,256], index: 15, kind: input, shape index: {}]   ;;  %s8179_s16 = inlined_call_operand.vmem [shape: bf16[256,256], index: 16, kind: input, shape index: {}]   ;;  %s8180_s17 = inlined_call_operand.vmem [shape: f32[1,256], index: 17, kind: input, shape index: {}]   ;;  %s8181_s18 = inlined_call_operand.vmem [shape: bf16[256,128], index: 18, kind: input, shape index: {}]   ;;  %s8182_s19 = inlined_call_operand.vmem [shape: f32[1,128], index: 19, kind: input, shape index: {}]   ;;  %s8183_s20 = inlined_call_operand.vmem [shape: bf16[1024,128], index: 20, kind: output, shape index: {}]  }
   0x1   :  { %8187 = sst [smem:[#allocation3_spill]] %s8163_s0 }
   0x2   :  { %8188 = sst [smem:[#allocation4_spill]] %s8164_s1  ;;  %s6297_s1 = smov 0  }
   0x3   :  { %8189 = sst [smem:[#allocation5_spill]] %s8165_s2 }
   0x4   :  { %8190 = sst [smem:[#allocation6_spill]] %s8166_s3 }
   0x5   :  { %8191 = sst [smem:[#allocation7_spill]] %s8167_s4 }
   0x6   :  { %8192 = sst [smem:[#allocation8_spill]] %s8183_s20 }
   0x7 LB: > { %8193 = sst [smem:[#allocation2_spill]] %s6189_s1  ;;  %s5139_s22 = sadd.s32 4294967295, %s6189_s1   ;;  %s6189_s1 = sphi %s6297_s1, %s30_s1  }
   0x8   : > { %p5143_p0 = scmp.ge.s32.totalorder %s6189_s1, 1  ;;  %p563_p1 = scmp.lt.s32.totalorder %s6189_s1, 5 }
   0xa   : > { %p564_p2 = pnand %p5143_p0, %p563_p1 }
   0xb   : > { %s8194_s2 = sld [smem:[#allocation4_spill]] (!%p564_p2)  ;;  %v6191_v2 = vmov (!%p564_p2), 0   ;;  %s5144_s25 = sshll.u32 (!%p564_p2), %s5139_s22, 5 }
   0xc   : > { %567 = sbr.rel (%p564_p2) target bundleno = 2168 (0x878), region = 100  ;;  %822 = vmatprep.mubr.bf16.mxu0 (!%p564_p2), %v6191_v2  ;;  %p622_p3 = scmp.lt.s32.totalorder (!%p564_p2), %s5144_s25, 127 }
   0xd   : > { %s8195_s0 = sld [smem:[#allocation3_spill]] (!%p564_p2)  ;;  %s8196_s23 = sld [smem:[#allocation6_spill]] (!%p564_p2) }
   0xe   : > { %s8197_s4 = sld [smem:[#allocation5_spill]] (!%p564_p2) }
  0x11   : > { %v5783_v0 = vld [vmem:[%s8194_s2 + $0x4] ss:$8 sps:$4 sm:$0xff] (!%p564_p2)   ;;  %v5785_v1 = vld [vmem:[%s8194_s2] ss:$8 sps:$4 sm:$0xff] (!%p564_p2)   ;;  %v5786_v3 = vld [vmem:[%s8194_s2 + $0x14] ss:$8 sps:$4 sm:$0xff] (!%p564_p2)  }
  0x12   : > { %790 = vmatprep.subr.bf16.mxu0 (!%p564_p2), %v5783_v0  ;;  %v5788_v4 = vld [vmem:[%s8194_s2 + $0x10] ss:$8 sps:$4 sm:$0xff] (!%p564_p2)   ;;  %v5789_v5 = vld [vmem:[%s8194_s2 + $0x24] ss:$8 sps:$4 sm:$0xff] (!%p564_p2)   ;;  %v5791_v6 = vld [vmem:[%s8194_s2 + $0x20] ss:$8 sps:$4 sm:$0xff] (!%p564_p2)  }
  0x13   : > { %791 = vmatpush1.bf16.msra.mxu0 %v5785_v1  ;;  %v5792_v7 = vld [vmem:[%s8194_s2 + $0x34] ss:$8 sps:$4 sm:$0xff]   ;;  %v5794_v8 = vld [vmem:[%s8194_s2 + $0x30] ss:$8 sps:$4 sm:$0xff]   ;;  %v5795_v9 = vld [vmem:[%s8194_s2 + $0x44] ss:$8 sps:$4 sm:$0xff]  }
  0x14   : > { %792 = vmatprep.subr.bf16.mxu0 %v5786_v3  ;;  %v5797_v10 = vld [vmem:[%s8194_s2 + $0x40] ss:$8 sps:$4 sm:$0xff]   ;;  %v5798_v11 = vld [vmem:[%s8194_s2 + $0x54] ss:$8 sps:$4 sm:$0xff]   ;;  %s8202_s25 = smov (!%p622_p3, %s5144_s25), 127 }
  0x15   : > { %v5800_v12 = vld [vmem:[%s8194_s2 + $0x50] ss:$8 sps:$4 sm:$0xff]   ;;  %v5801_v13 = vld [vmem:[%s8194_s2 + $0x64] ss:$8 sps:$4 sm:$0xff]   ;;  %v5803_v14 = vld [vmem:[%s8194_s2 + $0x60] ss:$8 sps:$4 sm:$0xff]  }
  0x16   : > { %s5145_s27 = sshll.u32 %s8202_s25, 3  ;;  %v5804_v15 = vld [vmem:[%s8194_s2 + $0x74] ss:$8 sps:$4 sm:$0xff]   ;;  %v5807_v16 = vld [vmem:[%s8196_s23 + $0x4] ss:$8 sps:$4 sm:$0xff]   ;;  %s5147_s28 = sshll.u32 %s8202_s25, 2 }
  0x17   : > { %793 = vmatpush1.bf16.msra.mxu0 %v5788_v4  ;;  %s6357_s22 = scalar_lea.vmem %s8195_s0, %s5145_s27  ;;  %v5809_v17 = vld [vmem:[%s8196_s23] ss:$8 sps:$4 sm:$0xff]   ;;  %v5810_v18 = vld [vmem:[%s8196_s23 + $0x14] ss:$8 sps:$4 sm:$0xff]   ;;  %v5806_v19 = vld [vmem:[%s8194_s2 + $0x70] ss:$8 sps:$4 sm:$0xff]   ;;  %1251 = vmatprep.subr.bf16.mxu1 %v5807_v16 }
  0x18   : > { %794 = vmatprep.subr.bf16.mxu0 %v5789_v5  ;;  %v634_v20 = vld [vmem:[%s6357_s22] sm:$0xff]  ;;  %v635_v21 = vld [vmem:[%s6357_s22 + $0x8] sm:$0xff]  ;;  %1252 = vmatpush1.bf16.msra.mxu1 %v5809_v17  ;;  %v5812_v22 = vld [vmem:[%s8196_s23 + $0x10] ss:$8 sps:$4 sm:$0xff]   ;;  %s8198_s27 = sld [smem:[#allocation7_spill]] }
  0x19   : > { %v6376_v23 = vpack.c.bf16 %v635_v21, %v634_v20  ;;  %1253 = vmatprep.subr.bf16.mxu1 %v5810_v18  ;;  %v5813_v24 = vld [vmem:[%s8196_s23 + $0x24] ss:$8 sps:$4 sm:$0xff]   ;;  %v5815_v25 = vld [vmem:[%s8196_s23 + $0x20] ss:$8 sps:$4 sm:$0xff]   ;;  %v5816_v26 = vld [vmem:[%s8196_s23 + $0x34] ss:$8 sps:$4 sm:$0xff]  }
  0x1a   : > { %v636_v27 = vld [vmem:[%s6357_s22 + $0x10] sm:$0xff]  ;;  %v637_v28 = vld [vmem:[%s6357_s22 + $0x18] sm:$0xff]  ;;  %v5819_v31 = vld [vmem:[%s8196_s23 + $0x44] ss:$8 sps:$4 sm:$0xff]  }
  0x1b   : > { %795 = vmatpush1.bf16.msra.mxu0 %v5791_v6  ;;  %v5818_v29 = vld [vmem:[%s8196_s23 + $0x30] ss:$8 sps:$4 sm:$0xff]   ;;  %v6394_v30 = vpack.c.bf16 %v637_v28, %v636_v27  ;;  %v5821_v32 = vld [vmem:[%s8196_s23 + $0x40] ss:$8 sps:$4 sm:$0xff]   ;;  %v5822_v33 = vld [vmem:[%s8196_s23 + $0x54] ss:$8 sps:$4 sm:$0xff]  }
  0x1c   : > { %796 = vmatprep.subr.bf16.mxu0 %v5792_v7  ;;  %1254 = vmatpush1.bf16.msra.mxu1 %v5812_v22  ;;  %v638_v34 = vld [vmem:[%s6357_s22 + $0x20] sm:$0xff]  ;;  %v639_v35 = vld [vmem:[%s6357_s22 + $0x28] sm:$0xff]  ;;  %v5824_v36 = vld [vmem:[%s8196_s23 + $0x50] ss:$8 sps:$4 sm:$0xff]  }
  0x1d   : > { %1255 = vmatprep.subr.bf16.mxu1 %v5813_v24  ;;  %v5825_v37 = vld [vmem:[%s8196_s23 + $0x64] ss:$8 sps:$4 sm:$0xff]   ;;  %v6415_v38 = vpack.c.bf16 %v639_v35, %v638_v34  ;;  %v5827_v39 = vld [vmem:[%s8196_s23 + $0x60] ss:$8 sps:$4 sm:$0xff]   ;;  %v5828_v40 = vld [vmem:[%s8196_s23 + $0x74] ss:$8 sps:$4 sm:$0xff]  }
  0x1e   : > { %v640_v41 = vld [vmem:[%s6357_s22 + $0x30] sm:$0xff]  ;;  %v641_v42 = vld [vmem:[%s6357_s22 + $0x38] sm:$0xff]  ;;  %v5831_v44 = vld [vmem:[%s8196_s23 + $0x84] ss:$8 sps:$4 sm:$0xff]  }
  0x1f   : > { %797 = vmatpush1.bf16.msra.mxu0 %v5794_v8  ;;  %v5830_v43 = vld [vmem:[%s8196_s23 + $0x70] ss:$8 sps:$4 sm:$0xff]   ;;  %v6433_v45 = vpack.c.bf16 %v641_v42, %v640_v41  ;;  %v5833_v46 = vld [vmem:[%s8196_s23 + $0x80] ss:$8 sps:$4 sm:$0xff]   ;;  %v5834_v47 = vld [vmem:[%s8196_s23 + $0x94] ss:$8 sps:$4 sm:$0xff]   ;;  %v700_v41 = vlaneseq }
  0x20   : > { %798 = vmatprep.subr.bf16.mxu0 %v5795_v9  ;;  %1256 = vmatpush1.bf16.msra.mxu1 %v5815_v25  ;;  %v642_v48 = vld [vmem:[%s6357_s22 + $0x40] sm:$0xff]  ;;  %v643_v49 = vld [vmem:[%s6357_s22 + $0x48] sm:$0xff]  ;;  %v5836_v50 = vld [vmem:[%s8196_s23 + $0x90] ss:$8 sps:$4 sm:$0xff]  }
  0x21   : > { %1257 = vmatprep.subr.bf16.mxu1 %v5816_v26  ;;  %v5837_v51 = vld [vmem:[%s8196_s23 + $0xa4] ss:$8 sps:$4 sm:$0xff]   ;;  %v6451_v52 = vpack.c.bf16 %v643_v49, %v642_v48  ;;  %v5839_v53 = vld [vmem:[%s8196_s23 + $0xa0] ss:$8 sps:$4 sm:$0xff]   ;;  %v5840_v54 = vld [vmem:[%s8196_s23 + $0xb4] ss:$8 sps:$4 sm:$0xff]  }
  0x22   : > { %v644_v55 = vld [vmem:[%s6357_s22 + $0x50] sm:$0xff]  ;;  %v645_v56 = vld [vmem:[%s6357_s22 + $0x58] sm:$0xff]  ;;  %v5843_v58 = vld [vmem:[%s8196_s23 + $0xc4] ss:$8 sps:$4 sm:$0xff]   ;;  %v701_v42 = vshrl.u32 %v700_v41, 7 }
  0x23   : > { %799 = vmatpush1.bf16.msra.mxu0 %v5797_v10  ;;  %v5842_v57 = vld [vmem:[%s8196_s23 + $0xb0] ss:$8 sps:$4 sm:$0xff]   ;;  %v6469_v59 = vpack.c.bf16 %v645_v56, %v644_v55  ;;  %v5845_v60 = vld [vmem:[%s8196_s23 + $0xc0] ss:$8 sps:$4 sm:$0xff]   ;;  %v5846_v61 = vld [vmem:[%s8196_s23 + $0xd4] ss:$8 sps:$4 sm:$0xff]  }
  0x24   : > { %800 = vmatprep.subr.bf16.mxu0 %v5798_v11  ;;  %1258 = vmatpush1.bf16.msra.mxu1 %v5818_v29  ;;  %v646_v62 = vld [vmem:[%s6357_s22 + $0x60] sm:$0xff]  ;;  %v647_v63 = vld [vmem:[%s6357_s22 + $0x68] sm:$0xff]  ;;  %v648_v1 = vld [vmem:[%s6357_s22 + $0x70] sm:$0xff]  ;;  %v6576_v48 = vsub.s32 1, %v701_v42 }
  0x25   : > { %1259 = vmatprep.subr.bf16.mxu1 %v5819_v31  ;;  %v6481_v0 = vpack.c.bf16 %v647_v63, %v646_v62  ;;  %v649_v3 = vld [vmem:[%s6357_s22 + $0x78] sm:$0xff]  ;;  %v650_v5 = vld [vmem:[%s6357_s22 + $0x80] sm:$0xff]  ;;  %v651_v6 = vld [vmem:[%s6357_s22 + $0x88] sm:$0xff] }
  0x26   : > { %v6487_v4 = vpack.c.bf16 %v649_v3, %v648_v1  ;;  %v6493_v7 = vpack.c.bf16 %v651_v6, %v650_v5  ;;  %v652_v8 = vld [vmem:[%s6357_s22 + $0x90] sm:$0xff]  ;;  %v653_v9 = vld [vmem:[%s6357_s22 + $0x98] sm:$0xff]  ;;  %v654_v11 = vld [vmem:[%s6357_s22 + $0xa0] sm:$0xff] }
  0x27   : > { %801 = vmatpush1.bf16.msra.mxu0 %v5800_v12  ;;  %v6499_v10 = vpack.c.bf16 %v653_v9, %v652_v8  ;;  %v655_v12 = vld [vmem:[%s6357_s22 + $0xa8] sm:$0xff]  ;;  %v5848_v16 = vld [vmem:[%s8196_s23 + $0xd0] ss:$8 sps:$4 sm:$0xff]   ;;  %v5852_v20 = vld [vmem:[%s8196_s23 + $0xf4] ss:$8 sps:$4 sm:$0xff]  }
  0x28   : > { %802 = vmatprep.subr.bf16.mxu0 %v5801_v13  ;;  %1260 = vmatpush1.bf16.msra.mxu1 %v5821_v32  ;;  %v6505_v13 = vpack.c.bf16 %v655_v12, %v654_v11  ;;  %v5849_v18 = vld [vmem:[%s8196_s23 + $0xe4] ss:$8 sps:$4 sm:$0xff]   ;;  %v5854_v24 = vld [vmem:[%s8196_s23 + $0xf0] ss:$8 sps:$4 sm:$0xff]   ;;  %v5872_v3 = vld [vmem:[%s8168_s5 + $0x54] ss:$8 sps:$4 sm:$0xff]  }
  0x29   : > { %1261 = vmatprep.subr.bf16.mxu1 %v5822_v33  ;;  %v658_v21 = vld [vmem:[%s6357_s22 + $0xc0] sm:$0xff]  ;;  %v659_v22 = vld [vmem:[%s6357_s22 + $0xc8] sm:$0xff]  ;;  %v660_v26 = vld [vmem:[%s6357_s22 + $0xd0] sm:$0xff] }
  0x2a   : > { %v6532_v25 = vpack.c.bf16 %v659_v22, %v658_v21  ;;  %v661_v27 = vld [vmem:[%s6357_s22 + $0xd8] sm:$0xff]  ;;  %v662_v29 = vld [vmem:[%s6357_s22 + $0xe0] sm:$0xff]  ;;  %v663_v31 = vld [vmem:[%s6357_s22 + $0xe8] sm:$0xff] }
  0x2b   : > { %803 = vmatpush1.bf16.msra.mxu0 %v5803_v14  ;;  %v656_v14 = vld [vmem:[%s6357_s22 + $0xb0] sm:$0xff]  ;;  %v6538_v28 = vpack.c.bf16 %v661_v27, %v660_v26  ;;  %v6544_v32 = vpack.c.bf16 %v663_v31, %v662_v29  ;;  %v665_v34 = vld [vmem:[%s6357_s22 + $0xf8] sm:$0xff]  ;;  %v5869_v62 = vld [vmem:[%s8168_s5 + $0x44] ss:$8 sps:$4 sm:$0xff]  }
  0x2c   : > { %804 = vmatprep.subr.bf16.mxu0 %v5804_v15  ;;  %1262 = vmatpush1.bf16.msra.mxu1 %v5824_v36  ;;  %v657_v15 = vld [vmem:[%s6357_s22 + $0xb8] sm:$0xff]  ;;  %v664_v33 = vld [vmem:[%s6357_s22 + $0xf0] sm:$0xff]  ;;  %v5855_v36 = vld [vmem:[%s8168_s5] ss:$8 sps:$4 sm:$0xff]  }
  0x2d   : > { %1263 = vmatprep.subr.bf16.mxu1 %v5825_v37  ;;  %v6514_v17 = vpack.c.bf16 %v657_v15, %v656_v14  ;;  %v6550_v35 = vpack.c.bf16 %v665_v34, %v664_v33  ;;  %v5857_v37 = vld [vmem:[%s8168_s5 + $0x4] ss:$8 sps:$4 sm:$0xff]   ;;  %v5864_v49 = vld [vmem:[%s8168_s5 + $0x30] ss:$8 sps:$4 sm:$0xff]   ;;  %v5878_v22 = vld [vmem:[%s8168_s5 + $0x74] ss:$8 sps:$4 sm:$0xff]  }
  0x2e   : > { %v5870_v8 = vld [vmem:[%s8168_s5 + $0x50] ss:$8 sps:$4 sm:$0xff]   ;;  %v5875_v9 = vld [vmem:[%s8168_s5 + $0x64] ss:$8 sps:$4 sm:$0xff]   ;;  %v5879_v41 = vld [vmem:[%s8168_s5 + $0x80] ss:$8 sps:$4 sm:$0xff]  }
  0x2f   : > { %805 = vmatpush1.bf16.msra.mxu0 %v5806_v19  ;;  %v5851_v19 = vld [vmem:[%s8196_s23 + $0xe0] ss:$8 sps:$4 sm:$0xff]   ;;  %v5876_v31 = vld [vmem:[%s8168_s5 + $0x70] ss:$8 sps:$4 sm:$0xff]   ;;  %v5881_v33 = vld [vmem:[%s8168_s5 + $0x84] ss:$8 sps:$4 sm:$0xff]  }
  0x30   : > { %1264 = vmatpush1.bf16.msra.mxu1 %v5827_v39  ;;  %1712 = vmatprep.subr.bf16.mxu0 %v5857_v37  ;;  %v5858_v39 = vld [vmem:[%s8168_s5 + $0x10] ss:$8 sps:$4 sm:$0xff]  }
  0x31   : > { %1265 = vmatprep.subr.bf16.mxu1 %v5828_v40  ;;  %v5860_v40 = vld [vmem:[%s8168_s5 + $0x14] ss:$8 sps:$4 sm:$0xff]  }
  0x32   : > { %823 = vmatmul.mubr.bf16.vlgmr.msra.gmra.mrb[0].mxu0 %v6376_v23 }
  0x33   : > { %832 = vmatprep.mubr.bf16.mxu0 %v6191_v2  ;;  %1713 = vmatpush1.bf16.msra.mxu0 %v5855_v36 }
  0x34   : > { %1266 = vmatpush1.bf16.msra.mxu1 %v5830_v43  ;;  %1714 = vmatprep.subr.bf16.mxu0 %v5860_v40  ;;  %v5861_v43 = vld [vmem:[%s8168_s5 + $0x20] ss:$8 sps:$4 sm:$0xff]  }
  0x35   : > { %1267 = vmatprep.subr.bf16.mxu1 %v5831_v44  ;;  %v5863_v44 = vld [vmem:[%s8168_s5 + $0x24] ss:$8 sps:$4 sm:$0xff]  }
  0x37   : > { %1715 = vmatpush1.bf16.msra.mxu0 %v5858_v39 }
  0x38   : > { %1268 = vmatpush1.bf16.msra.mxu1 %v5833_v46  ;;  %v6571_v46 = vsub.s32 0, %v701_v42  ;;  %1716 = vmatprep.subr.bf16.mxu0 %v5863_v44 }
  0x39   : > { %1269 = vmatprep.subr.bf16.mxu1 %v5834_v47  ;;  %v698_v47 = vld [vmem:[%s8197_s4] sm:$0x3] }
  0x3a   : > { %833 = vmatmul.mubr.bf16.gmra.mrb[4].mxu0 %v6394_v30 }
  0x3b   : > { %842 = vmatprep.mubr.bf16.mxu0 %v6191_v2  ;;  %1717 = vmatpush1.bf16.msra.mxu0 %v5861_v43 }
  0x3c   : > { %1270 = vmatpush1.bf16.msra.mxu1 %v5836_v50  ;;  %v5866_v50 = vld [vmem:[%s8168_s5 + $0x34] ss:$8 sps:$4 sm:$0xff]  }
  0x3d   : > { %1271 = vmatprep.subr.bf16.mxu1 %v5837_v51  ;;  %v6585_v51 = vrot.slane %v698_v47, %v6571_v46  ;;  %1718 = vmatprep.subr.bf16.mxu0 %v5866_v50 }
  0x3f   : > { %1719 = vmatpush1.bf16.msra.mxu0 %v5864_v49 }
  0x40   : > { %1272 = vmatpush1.bf16.msra.mxu1 %v5839_v53  ;;  %1720 = vmatprep.subr.bf16.mxu0 %v5869_v62 }
  0x41   : > { %1273 = vmatprep.subr.bf16.mxu1 %v5840_v54  ;;  %v6588_v54 = vrot.slane %v698_v47, %v6576_v48  ;;  %v5884_v47 = vld [vmem:[%s8168_s5 + $0x94] ss:$8 sps:$4 sm:$0xff]  }
  0x42   : > { %843 = vmatmul.mubr.bf16.gmra.mrb[8].mxu0 %v6415_v38 }
  0x43   : > { %852 = vmatprep.mubr.bf16.mxu0 %v6191_v2 }
  0x44   : > { %1274 = vmatpush1.bf16.msra.mxu1 %v5842_v57 }
  0x45   : > { %1275 = vmatprep.subr.bf16.mxu1 %v5843_v58 }
  0x48   : > { %1276 = vmatpush1.bf16.msra.mxu1 %v5845_v60 }
  0x49   : > { %1277 = vmatprep.subr.bf16.mxu1 %v5846_v61  ;;  %v5867_v61 = vld [vmem:[%s8168_s5 + $0x40] ss:$8 sps:$4 sm:$0xff]  }
  0x4a   : > { %853 = vmatmul.mubr.bf16.gmra.mrb[12].mxu0 %v6433_v45 }
  0x4b   : > { %862 = vmatprep.mubr.bf16.mxu0 %v6191_v2  ;;  %1721 = vmatpush1.bf16.msra.mxu0 %v5867_v61 }
  0x4c   : > { %1278 = vmatpush1.bf16.msra.mxu1 %v5848_v16  ;;  %1722 = vmatprep.subr.bf16.mxu0 %v5872_v3 }
  0x4d   : > { %1279 = vmatprep.subr.bf16.mxu1 %v5849_v18  ;;  %v5873_v18 = vld [vmem:[%s8168_s5 + $0x60] ss:$8 sps:$4 sm:$0xff]  }
  0x4f   : > { %1723 = vmatpush1.bf16.msra.mxu0 %v5870_v8  ;;  %v5890_v8 = vld [vmem:[%s8168_s5 + $0xb4] ss:$8 sps:$4 sm:$0xff]  }
  0x50   : > { %1280 = vmatpush1.bf16.msra.mxu1 %v5851_v19  ;;  %1724 = vmatprep.subr.bf16.mxu0 %v5875_v9 }
  0x51   : > { %1281 = vmatprep.subr.bf16.mxu1 %v5852_v20 }
  0x52   : > { %863 = vmatmul.mubr.bf16.gmra.mrb[16].mxu0 %v6451_v52 }
  0x53   : > { %872 = vmatprep.mubr.bf16.mxu0 %v6191_v2  ;;  %1725 = vmatpush1.bf16.msra.mxu0 %v5873_v18 }
  0x54   : > { %1282 = vmatpush1.bf16.msra.mxu1 %v5854_v24  ;;  %1726 = vmatprep.subr.bf16.mxu0 %v5878_v22 }
  0x57   : > { %1727 = vmatpush1.bf16.msra.mxu0 %v5876_v31  ;;  %v5896_v31 = vld [vmem:[%s8168_s5 + $0xd4] ss:$8 sps:$4 sm:$0xff]  }
  0x58   : > { %1728 = vmatprep.subr.bf16.mxu0 %v5881_v33 }
  0x5a   : > { %873 = vmatmul.mubr.bf16.gmra.mrb[20].mxu0 %v6469_v59 }
  0x5b   : > { %882 = vmatprep.mubr.bf16.mxu0 %v6191_v2  ;;  %1729 = vmatpush1.bf16.msra.mxu0 %v5879_v41 }
  0x5c   : > { %1730 = vmatprep.subr.bf16.mxu0 %v5884_v47 }
  0x62   : > { %883 = vmatmul.mubr.bf16.gmra.mrb[24].mxu0 %v6481_v0 }
  0x63   : > { %892 = vmatprep.mubr.bf16.mxu0 %v6191_v2 }
  0x6a   : > { %893 = vmatmul.mubr.bf16.gmra.mrb[28].mxu0 %v6487_v4 }
  0x6b   : > { %902 = vmatprep.mubr.bf16.mxu0 %v6191_v2 }
  0x72   : > { %903 = vmatmul.mubr.bf16.gmra.mrb[32].mxu0 %v6493_v7 }
  0x73   : > { %912 = vmatprep.mubr.bf16.mxu0 %v6191_v2 }
  0x7a   : > { %913 = vmatmul.mubr.bf16.gmra.mrb[36].mxu0 %v6499_v10 }
  0x7b   : > { %922 = vmatprep.mubr.bf16.mxu0 %v6191_v2 }
  0x82   : > { %923 = vmatmul.mubr.bf16.gmra.mrb[40].mxu0 %v6505_v13 }
  0x83   : > { %932 = vmatprep.mubr.bf16.mxu0 %v6191_v2 }
  0x8a   : > { %933 = vmatmul.mubr.bf16.gmra.mrb[44].mxu0 %v6514_v17 }
  0x8b   : > { %942 = vmatprep.mubr.bf16.mxu0 %v6191_v2 }
  0x92   : > { %943 = vmatmul.mubr.bf16.gmra.mrb[48].mxu0 %v6532_v25 }
  0x93   : > { %952 = vmatprep.mubr.bf16.mxu0 %v6191_v2 }
  0x9a   : > { %953 = vmatmul.mubr.bf16.gmra.mrb[52].mxu0 %v6538_v28 }
  0x9b   : > { %962 = vmatprep.mubr.bf16.mxu0 %v6191_v2 }
  0xa2   : > { %963 = vmatmul.mubr.bf16.gmra.mrb[56].mxu0 %v6544_v32 }
  0xa3   : > { %972 = vmatprep.mubr.bf16.mxu0 %v6191_v2 }
  0xaa   : > { %973 = vmatmul.mubr.bf16.gmra.mrb[60].mxu0 %v6550_v35 }
 0x105   : > { %v824_v53 = vpop.f32.mrb[0].mxu0 }
 0x106   : > { %v826_v55 = vpop.f32.mrb[1].mxu0  ;;  %v825_v57 = vadd.f32 %v824_v53, %v6585_v51 }
 0x107   : > { %v828_v56 = vpop.f32.mrb[2].mxu0  ;;  %v827_v63 = vadd.f32 %v826_v55, %v6588_v54 }
 0x108   : > { %v829_v58 = vadd.f32 %v828_v56, %v6585_v51  ;;  %v830_v60 = vpop.f32.mrb[3].mxu0  ;;  %v5882_v56 = vld [vmem:[%s8168_s5 + $0x90] ss:$8 sps:$4 sm:$0xff]  }
 0x109   : > { %v831_v1 = vadd.f32 %v830_v60, %v6588_v54  ;;  %1731 = vmatpush1.bf16.msra.mxu0 %v5882_v56 }
 0x10a   : > { %v983_v5 = vpack.c.bf16 %v829_v58, %v825_v57  ;;  %v5887_v57 = vld [vmem:[%s8168_s5 + $0xa4] ss:$8 sps:$4 sm:$0xff]  }
 0x10b   : > { %v984_v6 = vpack.c.bf16 %v831_v1, %v827_v63  ;;  %v5885_v1 = vld [vmem:[%s8168_s5 + $0xa0] ss:$8 sps:$4 sm:$0xff]   ;;  %1732 = vmatprep.subr.bf16.mxu0 %v5887_v57 }
 0x10c   : > { %v1015_v15 = vmax.bf16 %v6191_v2, %v983_v5 }
 0x10d   : > { %v834_v11 = vpop.f32.mrb[4].mxu0  ;;  %v1016_v12 = vmax.bf16 %v6191_v2, %v984_v6  ;;  %1733 = vmatpush1.bf16.msra.mxu0 %v5885_v1 }
 0x10e   : > { %v836_v14 = vpop.f32.mrb[5].mxu0  ;;  %v835_v19 = vadd.f32 %v834_v11, %v6585_v51  ;;  %1734 = vmatprep.subr.bf16.mxu0 %v5890_v8 }
 0x10f   : > { %v838_v16 = vpop.f32.mrb[6].mxu0  ;;  %1283 = vmatprep.mubr.bf16.mxu1 %v1016_v12  ;;  %v837_v24 = vadd.f32 %v836_v14, %v6588_v54 }
 0x110   : > { %v839_v20 = vadd.f32 %v838_v16, %v6585_v51  ;;  %v840_v21 = vpop.f32.mrb[7].mxu0  ;;  %1284 = vmatmul.mubr.bf16.vlgmr.msra.gmra.mrb[0].mxu1 %v1015_v15  ;;  %v5888_v15 = vld [vmem:[%s8168_s5 + $0xb0] ss:$8 sps:$4 sm:$0xff]   ;;  %v5893_v16 = vld [vmem:[%s8168_s5 + $0xc4] ss:$8 sps:$4 sm:$0xff]  }
 0x111   : > { %v841_v26 = vadd.f32 %v840_v21, %v6588_v54  ;;  %1735 = vmatpush1.bf16.msra.mxu0 %v5888_v15 }
 0x112   : > { %v985_v27 = vpack.c.bf16 %v839_v20, %v835_v19  ;;  %1736 = vmatprep.subr.bf16.mxu0 %v5893_v16 }
 0x113   : > { %v986_v29 = vpack.c.bf16 %v841_v26, %v837_v24  ;;  %v5891_v24 = vld [vmem:[%s8168_s5 + $0xc0] ss:$8 sps:$4 sm:$0xff]  }
 0x114   : > { %v1017_v39 = vmax.bf16 %v6191_v2, %v985_v27 }
 0x115   : > { %v844_v34 = vpop.f32.mrb[8].mxu0  ;;  %v1018_v36 = vmax.bf16 %v6191_v2, %v986_v29  ;;  %1737 = vmatpush1.bf16.msra.mxu0 %v5891_v24 }
 0x116   : > { %v846_v37 = vpop.f32.mrb[9].mxu0  ;;  %v845_v42 = vadd.f32 %v844_v34, %v6585_v51  ;;  %1738 = vmatprep.subr.bf16.mxu0 %v5896_v31 }
 0x117   : > { %v848_v40 = vpop.f32.mrb[10].mxu0  ;;  %1293 = vmatprep.mubr.bf16.mxu1 %v1018_v36  ;;  %v847_v49 = vadd.f32 %v846_v37, %v6588_v54 }
 0x118   : > { %v849_v43 = vadd.f32 %v848_v40, %v6585_v51  ;;  %v850_v44 = vpop.f32.mrb[11].mxu0  ;;  %1294 = vmatmul.mubr.bf16.gmra.mrb[4].mxu1 %v1017_v39  ;;  %v5894_v39 = vld [vmem:[%s8168_s5 + $0xd0] ss:$8 sps:$4 sm:$0xff]   ;;  %v5899_v40 = vld [vmem:[%s8168_s5 + $0xe4] ss:$8 sps:$4 sm:$0xff]  }
 0x119   : > { %v851_v50 = vadd.f32 %v850_v44, %v6588_v54  ;;  %1739 = vmatpush1.bf16.msra.mxu0 %v5894_v39 }
 0x11a   : > { %v987_v53 = vpack.c.bf16 %v849_v43, %v845_v42  ;;  %1740 = vmatprep.subr.bf16.mxu0 %v5899_v40 }
 0x11b   : > { %v988_v55 = vpack.c.bf16 %v851_v50, %v847_v49  ;;  %v5897_v49 = vld [vmem:[%s8168_s5 + $0xe0] ss:$8 sps:$4 sm:$0xff]  }
 0x11c   : > { %v1019_v62 = vmax.bf16 %v6191_v2, %v987_v53 }
 0x11d   : > { %v854_v58 = vpop.f32.mrb[12].mxu0  ;;  %v1020_v60 = vmax.bf16 %v6191_v2, %v988_v55  ;;  %1741 = vmatpush1.bf16.msra.mxu0 %v5897_v49 }
 0x11e   : > { %v856_v61 = vpop.f32.mrb[13].mxu0  ;;  %v855_v3 = vadd.f32 %v854_v58, %v6585_v51 }
 0x11f   : > { %v858_v63 = vpop.f32.mrb[14].mxu0  ;;  %1303 = vmatprep.mubr.bf16.mxu1 %v1020_v60  ;;  %v857_v9 = vadd.f32 %v856_v61, %v6588_v54 }
 0x120   : > { %v859_v5 = vadd.f32 %v858_v63, %v6585_v51  ;;  %v860_v6 = vpop.f32.mrb[15].mxu0  ;;  %1304 = vmatmul.mubr.bf16.gmra.mrb[8].mxu1 %v1019_v62 }
 0x121   : > { %v861_v11 = vadd.f32 %v860_v6, %v6588_v54 }
 0x122   : > { %v989_v12 = vpack.c.bf16 %v859_v5, %v855_v3 }
 0x123   : > { %v990_v14 = vpack.c.bf16 %v861_v11, %v857_v9 }
 0x124   : > { %v1021_v21 = vmax.bf16 %v6191_v2, %v989_v12 }
 0x125   : > { %v864_v18 = vpop.f32.mrb[16].mxu0  ;;  %v1022_v19 = vmax.bf16 %v6191_v2, %v990_v14 }
 0x126   : > { %v866_v20 = vpop.f32.mrb[17].mxu0  ;;  %v865_v26 = vadd.f32 %v864_v18, %v6585_v51 }
 0x127   : > { %v868_v22 = vpop.f32.mrb[18].mxu0  ;;  %1313 = vmatprep.mubr.bf16.mxu1 %v1022_v19  ;;  %v867_v33 = vadd.f32 %v866_v20, %v6588_v54 }
 0x128   : > { %v869_v27 = vadd.f32 %v868_v22, %v6585_v51  ;;  %v870_v29 = vpop.f32.mrb[19].mxu0  ;;  %1314 = vmatmul.mubr.bf16.gmra.mrb[12].mxu1 %v1021_v21 }
 0x129   : > { %v871_v34 = vadd.f32 %v870_v29, %v6588_v54 }
 0x12a   : > { %v991_v36 = vpack.c.bf16 %v869_v27, %v865_v26 }
 0x12b   : > { %v992_v37 = vpack.c.bf16 %v871_v34, %v867_v33 }
 0x12c   : > { %v1023_v44 = vmax.bf16 %v6191_v2, %v991_v36 }
 0x12d   : > { %v874_v41 = vpop.f32.mrb[20].mxu0  ;;  %v1024_v42 = vmax.bf16 %v6191_v2, %v992_v37 }
 0x12e   : > { %v876_v43 = vpop.f32.mrb[21].mxu0  ;;  %v875_v50 = vadd.f32 %v874_v41, %v6585_v51 }
 0x12f   : > { %v878_v47 = vpop.f32.mrb[22].mxu0  ;;  %1323 = vmatprep.mubr.bf16.mxu1 %v1024_v42  ;;  %v877_v56 = vadd.f32 %v876_v43, %v6588_v54 }
 0x130   : > { %v879_v53 = vadd.f32 %v878_v47, %v6585_v51  ;;  %v880_v55 = vpop.f32.mrb[23].mxu0  ;;  %1324 = vmatmul.mubr.bf16.gmra.mrb[16].mxu1 %v1023_v44 }
 0x131   : > { %v881_v57 = vadd.f32 %v880_v55, %v6588_v54 }
 0x132   : > { %v993_v58 = vpack.c.bf16 %v879_v53, %v875_v50 }
 0x133   : > { %v994_v60 = vpack.c.bf16 %v881_v57, %v877_v56 }
 0x134   : > { %v1025_v1 = vmax.bf16 %v6191_v2, %v993_v58 }
 0x135   : > { %v884_v61 = vpop.f32.mrb[24].mxu0  ;;  %v1026_v62 = vmax.bf16 %v6191_v2, %v994_v60 }
 0x136   : > { %v886_v63 = vpop.f32.mrb[25].mxu0  ;;  %v885_v5 = vadd.f32 %v884_v61, %v6585_v51 }
 0x137   : > { %v888_v3 = vpop.f32.mrb[26].mxu0  ;;  %1333 = vmatprep.mubr.bf16.mxu1 %v1026_v62  ;;  %v887_v9 = vadd.f32 %v886_v63, %v6588_v54 }
 0x138   : > { %v889_v6 = vadd.f32 %v888_v3, %v6585_v51  ;;  %v890_v8 = vpop.f32.mrb[27].mxu0  ;;  %1334 = vmatmul.mubr.bf16.gmra.mrb[20].mxu1 %v1025_v1 }
 0x139   : > { %v891_v11 = vadd.f32 %v890_v8, %v6588_v54 }
 0x13a   : > { %v995_v12 = vpack.c.bf16 %v889_v6, %v885_v5 }
 0x13b   : > { %v996_v14 = vpack.c.bf16 %v891_v11, %v887_v9 }
 0x13c   : > { %v1027_v19 = vmax.bf16 %v6191_v2, %v995_v12 }
 0x13d   : > { %v894_v15 = vpop.f32.mrb[28].mxu0  ;;  %v1028_v16 = vmax.bf16 %v6191_v2, %v996_v14 }
 0x13e   : > { %v896_v18 = vpop.f32.mrb[29].mxu0  ;;  %v895_v21 = vadd.f32 %v894_v15, %v6585_v51 }
 0x13f   : > { %v898_v20 = vpop.f32.mrb[30].mxu0  ;;  %1343 = vmatprep.mubr.bf16.mxu1 %v1028_v16  ;;  %v897_v26 = vadd.f32 %v896_v18, %v6588_v54 }
 0x140   : > { %v899_v22 = vadd.f32 %v898_v20, %v6585_v51  ;;  %v900_v24 = vpop.f32.mrb[31].mxu0  ;;  %1344 = vmatmul.mubr.bf16.gmra.mrb[24].mxu1 %v1027_v19 }
 0x141   : > { %v901_v27 = vadd.f32 %v900_v24, %v6588_v54 }
 0x142   : > { %v997_v29 = vpack.c.bf16 %v899_v22, %v895_v21 }
 0x143   : > { %v998_v31 = vpack.c.bf16 %v901_v27, %v897_v26 }
 0x144   : > { %v1029_v37 = vmax.bf16 %v6191_v2, %v997_v29 }
 0x145   : > { %v904_v33 = vpop.f32.mrb[32].mxu0  ;;  %v1030_v34 = vmax.bf16 %v6191_v2, %v998_v31 }
 0x146   : > { %v906_v36 = vpop.f32.mrb[33].mxu0  ;;  %v905_v40 = vadd.f32 %v904_v33, %v6585_v51 }
 0x147   : > { %v908_v39 = vpop.f32.mrb[34].mxu0  ;;  %1353 = vmatprep.mubr.bf16.mxu1 %v1030_v34  ;;  %v907_v43 = vadd.f32 %v906_v36, %v6588_v54 }
 0x148   : > { %v909_v41 = vadd.f32 %v908_v39, %v6585_v51  ;;  %v910_v42 = vpop.f32.mrb[35].mxu0  ;;  %1354 = vmatmul.mubr.bf16.gmra.mrb[28].mxu1 %v1029_v37 }
 0x149   : > { %v911_v44 = vadd.f32 %v910_v42, %v6588_v54 }
 0x14a   : > { %v999_v47 = vpack.c.bf16 %v909_v41, %v905_v40 }
 0x14b   : > { %v1000_v49 = vpack.c.bf16 %v911_v44, %v907_v43 }
 0x14c   : > { %v1031_v56 = vmax.bf16 %v6191_v2, %v999_v47 }
 0x14d   : > { %v914_v50 = vpop.f32.mrb[36].mxu0  ;;  %v1032_v53 = vmax.bf16 %v6191_v2, %v1000_v49 }
 0x14e   : > { %v916_v55 = vpop.f32.mrb[37].mxu0  ;;  %v915_v58 = vadd.f32 %v914_v50, %v6585_v51 }
 0x14f   : > { %v918_v57 = vpop.f32.mrb[38].mxu0  ;;  %1363 = vmatprep.mubr.bf16.mxu1 %v1032_v53  ;;  %v917_v62 = vadd.f32 %v916_v55, %v6588_v54  ;;  %v5902_v53 = vld [vmem:[%s8168_s5 + $0xf4] ss:$8 sps:$4 sm:$0xff]  }
 0x150   : > { %v919_v60 = vadd.f32 %v918_v57, %v6585_v51  ;;  %v920_v61 = vpop.f32.mrb[39].mxu0  ;;  %1364 = vmatmul.mubr.bf16.gmra.mrb[32].mxu1 %v1031_v56  ;;  %v5900_v57 = vld [vmem:[%s8168_s5 + $0xf0] ss:$8 sps:$4 sm:$0xff]   ;;  %1742 = vmatprep.subr.bf16.mxu0 %v5902_v53 }
 0x151   : > { %v921_v63 = vadd.f32 %v920_v61, %v6588_v54  ;;  %1743 = vmatpush1.bf16.msra.mxu0 %v5900_v57  ;;  %v5909_v57 = vld [vmem:[%s8170_s7 + $0x20] ss:$8 sps:$4 sm:$0xff]  }
 0x152   : > { %v1001_v1 = vpack.c.bf16 %v919_v60, %v915_v58 }
 0x153   : > { %v1002_v3 = vpack.c.bf16 %v921_v63, %v917_v62 }
 0x154   : > { %v1033_v9 = vmax.bf16 %v6191_v2, %v1001_v1 }
 0x155   : > { %v924_v5 = vpop.f32.mrb[40].mxu0  ;;  %v1034_v6 = vmax.bf16 %v6191_v2, %v1002_v3 }
 0x156   : > { %v926_v8 = vpop.f32.mrb[41].mxu0  ;;  %v925_v12 = vadd.f32 %v924_v5, %v6585_v51 }
 0x157   : > { %v928_v11 = vpop.f32.mrb[42].mxu0  ;;  %1373 = vmatprep.mubr.bf16.mxu1 %v1034_v6  ;;  %v927_v16 = vadd.f32 %v926_v8, %v6588_v54 }
 0x158   : > { %v929_v14 = vadd.f32 %v928_v11, %v6585_v51  ;;  %v930_v15 = vpop.f32.mrb[43].mxu0  ;;  %1374 = vmatmul.mubr.bf16.gmra.mrb[36].mxu1 %v1033_v9 }
 0x159   : > { %v931_v18 = vadd.f32 %v930_v15, %v6588_v54 }
 0x15a   : > { %v1003_v19 = vpack.c.bf16 %v929_v14, %v925_v12 }
 0x15b   : > { %v1004_v20 = vpack.c.bf16 %v931_v18, %v927_v16 }
 0x15c   : > { %v1035_v26 = vmax.bf16 %v6191_v2, %v1003_v19 }
 0x15d   : > { %v934_v21 = vpop.f32.mrb[44].mxu0  ;;  %v1036_v22 = vmax.bf16 %v6191_v2, %v1004_v20 }
 0x15e   : > { %v936_v24 = vpop.f32.mrb[45].mxu0  ;;  %v935_v29 = vadd.f32 %v934_v21, %v6585_v51 }
 0x15f   : > { %v938_v27 = vpop.f32.mrb[46].mxu0  ;;  %1383 = vmatprep.mubr.bf16.mxu1 %v1036_v22  ;;  %v937_v34 = vadd.f32 %v936_v24, %v6588_v54 }
 0x160   : > { %v939_v31 = vadd.f32 %v938_v27, %v6585_v51  ;;  %v940_v33 = vpop.f32.mrb[47].mxu0  ;;  %1384 = vmatmul.mubr.bf16.gmra.mrb[40].mxu1 %v1035_v26 }
 0x161   : > { %v941_v36 = vadd.f32 %v940_v33, %v6588_v54 }
 0x162   : > { %v1005_v37 = vpack.c.bf16 %v939_v31, %v935_v29 }
 0x163   : > { %v1006_v39 = vpack.c.bf16 %v941_v36, %v937_v34 }
 0x164   : > { %v1037_v43 = vmax.bf16 %v6191_v2, %v1005_v37 }
 0x165   : > { %v944_v40 = vpop.f32.mrb[48].mxu0  ;;  %v1038_v41 = vmax.bf16 %v6191_v2, %v1006_v39 }
 0x166   : > { %v946_v42 = vpop.f32.mrb[49].mxu0  ;;  %v945_v47 = vadd.f32 %v944_v40, %v6585_v51 }
 0x167   : > { %v948_v44 = vpop.f32.mrb[50].mxu0  ;;  %1393 = vmatprep.mubr.bf16.mxu1 %v1038_v41  ;;  %v947_v55 = vadd.f32 %v946_v42, %v6588_v54 }
 0x168   : > { %v949_v49 = vadd.f32 %v948_v44, %v6585_v51  ;;  %v950_v50 = vpop.f32.mrb[51].mxu0  ;;  %1394 = vmatmul.mubr.bf16.gmra.mrb[44].mxu1 %v1037_v43 }
 0x169   : > { %v951_v56 = vadd.f32 %v950_v50, %v6588_v54 }
 0x16a   : > { %v1007_v58 = vpack.c.bf16 %v949_v49, %v945_v47 }
 0x16b   : > { %v1008_v60 = vpack.c.bf16 %v951_v56, %v947_v55  ;;  %v5903_v55 = vld [vmem:[%s8170_s7] ss:$8 sps:$4 sm:$0xff]   ;;  %v5908_v56 = vld [vmem:[%s8170_s7 + $0x14] ss:$8 sps:$4 sm:$0xff]  }
 0x16c   : > { %v1039_v1 = vmax.bf16 %v6191_v2, %v1007_v58  ;;  %v5911_v58 = vld [vmem:[%s8170_s7 + $0x24] ss:$8 sps:$4 sm:$0xff]  }
 0x16d   : > { %v954_v61 = vpop.f32.mrb[52].mxu0  ;;  %v1040_v62 = vmax.bf16 %v6191_v2, %v1008_v60  ;;  %v1079_v60 = vld [vmem:[%s8198_s27] sm:$0x3]  ;;  %s8199_s27 = sld [smem:[#allocation8_spill]] }
 0x16e   : > { %v956_v63 = vpop.f32.mrb[53].mxu0  ;;  %v955_v5 = vadd.f32 %v954_v61, %v6585_v51  ;;  %v5912_v61 = vld [vmem:[%s8170_s7 + $0x30] ss:$8 sps:$4 sm:$0xff]  }
 0x16f   : > { %v958_v3 = vpop.f32.mrb[54].mxu0  ;;  %1403 = vmatprep.mubr.bf16.mxu1 %v1040_v62  ;;  %v957_v9 = vadd.f32 %v956_v63, %v6588_v54  ;;  %v5914_v62 = vld [vmem:[%s8170_s7 + $0x34] ss:$8 sps:$4 sm:$0xff]   ;;  %v6786_v63 = vrot.slane %v1079_v60, %v6571_v46 }
 0x170   : > { %v959_v6 = vadd.f32 %v958_v3, %v6585_v51  ;;  %v960_v8 = vpop.f32.mrb[55].mxu0  ;;  %1404 = vmatmul.mubr.bf16.gmra.mrb[48].mxu1 %v1039_v1  ;;  %v6789_v3 = vrot.slane %v1079_v60, %v6576_v48  ;;  %v5927_v60 = vld [vmem:[%s8170_s7 + $0x80] ss:$8 sps:$4 sm:$0xff]  }
 0x171   : > { %v961_v11 = vadd.f32 %v960_v8, %v6588_v54 }
 0x172   : > { %v1009_v12 = vpack.c.bf16 %v959_v6, %v955_v5 }
 0x173   : > { %v1010_v14 = vpack.c.bf16 %v961_v11, %v957_v9  ;;  %s8112_s29 = scalar_lea.vmem %s8199_s27, %s5147_s28 }
 0x174   : > { %v1041_v19 = vmax.bf16 %v6191_v2, %v1009_v12  ;;  %v5915_v12 = vld [vmem:[%s8170_s7 + $0x40] ss:$8 sps:$4 sm:$0xff]  }
 0x175   : > { %v964_v15 = vpop.f32.mrb[56].mxu0  ;;  %v1042_v16 = vmax.bf16 %v6191_v2, %v1010_v14  ;;  %v5917_v14 = vld [vmem:[%s8170_s7 + $0x44] ss:$8 sps:$4 sm:$0xff]  }
 0x176   : > { %v966_v18 = vpop.f32.mrb[57].mxu0  ;;  %v965_v21 = vadd.f32 %v964_v15, %v6585_v51 }
 0x177   : > { %v968_v20 = vpop.f32.mrb[58].mxu0  ;;  %1413 = vmatprep.mubr.bf16.mxu1 %v1042_v16  ;;  %v967_v26 = vadd.f32 %v966_v18, %v6588_v54  ;;  %v5920_v18 = vld [vmem:[%s8170_s7 + $0x54] ss:$8 sps:$4 sm:$0xff]  }
 0x178   : > { %v969_v22 = vadd.f32 %v968_v20, %v6585_v51  ;;  %v970_v24 = vpop.f32.mrb[59].mxu0  ;;  %1414 = vmatmul.mubr.bf16.gmra.mrb[52].mxu1 %v1041_v19 }
 0x179   : > { %v971_v27 = vadd.f32 %v970_v24, %v6588_v54 }
 0x17a   : > { %v1011_v29 = vpack.c.bf16 %v969_v22, %v965_v21  ;;  %v5918_v21 = vld [vmem:[%s8170_s7 + $0x50] ss:$8 sps:$4 sm:$0xff]   ;;  %v5923_v22 = vld [vmem:[%s8170_s7 + $0x64] ss:$8 sps:$4 sm:$0xff]  }
 0x17b   : > { %v1012_v31 = vpack.c.bf16 %v971_v27, %v967_v26 }
 0x17c   : > { %v1043_v37 = vmax.bf16 %v6191_v2, %v1011_v29 }
 0x17d   : > { %v974_v33 = vpop.f32.mrb[60].mxu0  ;;  %v1044_v34 = vmax.bf16 %v6191_v2, %v1012_v31  ;;  %v5939_v31 = vld [vmem:[%s8173_s10] ss:$8 sps:$4 sm:$0xff]  }
 0x17e   : > { %v976_v36 = vpop.f32.mrb[61].mxu0  ;;  %v975_v40 = vadd.f32 %v974_v33, %v6585_v51  ;;  %v5941_v33 = vld [vmem:[%s8173_s10 + $0x4] ss:$8 sps:$4 sm:$0xff]  }
 0x17f   : > { %v978_v39 = vpop.f32.mrb[62].mxu0  ;;  %1423 = vmatprep.mubr.bf16.mxu1 %v1044_v34  ;;  %v977_v43 = vadd.f32 %v976_v36, %v6588_v54  ;;  %v5921_v36 = vld [vmem:[%s8170_s7 + $0x60] ss:$8 sps:$4 sm:$0xff]   ;;  %2558 = vmatprep.subr.bf16.mxu0 %v5941_v33 }
 0x180   : > { %v979_v41 = vadd.f32 %v978_v39, %v6585_v51  ;;  %v980_v42 = vpop.f32.mrb[63].mxu0  ;;  %1424 = vmatmul.mubr.bf16.gmra.mrb[56].mxu1 %v1043_v37  ;;  %v5905_v51 = vld [vmem:[%s8170_s7 + $0x4] ss:$8 sps:$4 sm:$0xff]  }
 0x181   : > { %v981_v44 = vadd.f32 %v980_v42, %v6588_v54  ;;  %2173 = vmatprep.subr.bf16.mxu1 %v5905_v51  ;;  %v5906_v54 = vld [vmem:[%s8170_s7 + $0x10] ss:$8 sps:$4 sm:$0xff]  }
 0x182   : > { %v1013_v47 = vpack.c.bf16 %v979_v41, %v975_v40  ;;  %2174 = vmatpush1.bf16.msra.mxu1 %v5903_v55  ;;  %v5926_v41 = vld [vmem:[%s8170_s7 + $0x74] ss:$8 sps:$4 sm:$0xff]   ;;  %v5929_v55 = vld [vmem:[%s8170_s7 + $0x84] ss:$8 sps:$4 sm:$0xff]  }
 0x183   : > { %v1014_v49 = vpack.c.bf16 %v981_v44, %v977_v43  ;;  %2175 = vmatprep.subr.bf16.mxu1 %v5908_v56  ;;  %v5950_v44 = vld [vmem:[%s8173_s10 + $0x14] ss:$8 sps:$4 sm:$0xff]  }
 0x184   : > { %v1045_v53 = vmax.bf16 %v6191_v2, %v1013_v47 }
 0x185   : > { %v1046_v50 = vmax.bf16 %v6191_v2, %v1014_v49  ;;  %v5948_v49 = vld [vmem:[%s8173_s10 + $0x10] ss:$8 sps:$4 sm:$0xff]  }
 0x186   : > { %2176 = vmatpush1.bf16.msra.mxu1 %v5906_v54 }
 0x187   : > { %1433 = vmatprep.mubr.bf16.mxu1 %v1046_v50  ;;  %2177 = vmatprep.subr.bf16.mxu1 %v5911_v58 }
 0x188   : > { %1434 = vmatmul.mubr.bf16.gmra.mrb[60].mxu1 %v1045_v53  ;;  %v5924_v53 = vld [vmem:[%s8170_s7 + $0x70] ss:$8 sps:$4 sm:$0xff]  }
 0x18a   : > { %2178 = vmatpush1.bf16.msra.mxu1 %v5909_v57 }
 0x18b   : > { %2179 = vmatprep.subr.bf16.mxu1 %v5914_v62 }
 0x18e   : > { %2180 = vmatpush1.bf16.msra.mxu1 %v5912_v61 }
 0x18f   : > { %2181 = vmatprep.subr.bf16.mxu1 %v5917_v14  ;;  %v5935_v14 = vld [vmem:[%s8170_s7 + $0xa4] ss:$8 sps:$4 sm:$0xff]  }
 0x192   : > { %2182 = vmatpush1.bf16.msra.mxu1 %v5915_v12  ;;  %v5930_v12 = vld [vmem:[%s8170_s7 + $0x90] ss:$8 sps:$4 sm:$0xff]  }
 0x193   : > { %2183 = vmatprep.subr.bf16.mxu1 %v5920_v18 }
 0x196   : > { %2184 = vmatpush1.bf16.msra.mxu1 %v5918_v21  ;;  %v5933_v21 = vld [vmem:[%s8170_s7 + $0xa0] ss:$8 sps:$4 sm:$0xff]  }
 0x197   : > { %2185 = vmatprep.subr.bf16.mxu1 %v5923_v22 }
 0x19a   : > { %2186 = vmatpush1.bf16.msra.mxu1 %v5921_v36  ;;  %v5936_v36 = vld [vmem:[%s8170_s7 + $0xb0] ss:$8 sps:$4 sm:$0xff]  }
 0x19b   : > { %2187 = vmatprep.subr.bf16.mxu1 %v5926_v41 }
 0x19e   : > { %2188 = vmatpush1.bf16.msra.mxu1 %v5924_v53  ;;  %v5947_v53 = vld [vmem:[%s8170_s7 + $0xd4] ss:$8 sps:$4 sm:$0xff]  }
 0x19f   : > { %2189 = vmatprep.subr.bf16.mxu1 %v5929_v55 }
 0x1a2   : > { %2190 = vmatpush1.bf16.msra.mxu1 %v5927_v60 }
 0x1e3   : > { %v1285_v1 = vpop.f32.mrb[0].mxu1 }
 0x1e4   : > { %v1287_v5 = vpop.f32.mrb[1].mxu1  ;;  %v1286_v8 = vadd.f32 %v1285_v1, %v6786_v63 }
 0x1e5   : > { %v1289_v6 = vpop.f32.mrb[2].mxu1  ;;  %v1288_v15 = vadd.f32 %v1287_v5, %v6789_v3  ;;  %v5932_v5 = vld [vmem:[%s8170_s7 + $0x94] ss:$8 sps:$4 sm:$0xff]  }
 0x1e6   : > { %v1290_v9 = vadd.f32 %v1289_v6, %v6786_v63  ;;  %v1291_v11 = vpop.f32.mrb[3].mxu1  ;;  %2191 = vmatprep.subr.bf16.mxu1 %v5932_v5 }
 0x1e7   : > { %v1292_v16 = vadd.f32 %v1291_v11, %v6789_v3  ;;  %2192 = vmatpush1.bf16.msra.mxu1 %v5930_v12 }
 0x1e8   : > { %v1444_v19 = vpack.c.bf16 %v1290_v9, %v1286_v8  ;;  %2193 = vmatprep.subr.bf16.mxu1 %v5935_v14 }
 0x1e9   : > { %v1445_v20 = vpack.c.bf16 %v1292_v16, %v1288_v15 }
 0x1ea   : > { %v1476_v27 = vmax.bf16 %v6191_v2, %v1444_v19 }
 0x1eb   : > { %v1295_v24 = vpop.f32.mrb[4].mxu1  ;;  %v1477_v26 = vmax.bf16 %v6191_v2, %v1445_v20  ;;  %2194 = vmatpush1.bf16.msra.mxu1 %v5933_v21 }
 0x1ec   : > { %v1297_v29 = vpop.f32.mrb[5].mxu1  ;;  %v1296_v37 = vadd.f32 %v1295_v24, %v6786_v63 }
 0x1ed   : > { %v1299_v34 = vpop.f32.mrb[6].mxu1  ;;  %1744 = vmatprep.mubr.bf16.mxu0 %v1477_v26  ;;  %v1298_v42 = vadd.f32 %v1297_v29, %v6789_v3 }
 0x1ee   : > { %v1300_v39 = vadd.f32 %v1299_v34, %v6786_v63  ;;  %v1301_v40 = vpop.f32.mrb[7].mxu1  ;;  %1745 = vmatmul.mubr.bf16.vlgmr.msra.gmra.mrb[64].mxu0 %v1476_v27  ;;  %v5938_v27 = vld [vmem:[%s8170_s7 + $0xb4] ss:$8 sps:$4 sm:$0xff]  }
 0x1ef   : > { %v1302_v43 = vadd.f32 %v1301_v40, %v6789_v3  ;;  %2559 = vmatpush1.bf16.msra.mxu0 %v5939_v31  ;;  %2195 = vmatprep.subr.bf16.mxu1 %v5938_v27 }
 0x1f0   : > { %v1446_v47 = vpack.c.bf16 %v1300_v39, %v1296_v37  ;;  %2560 = vmatprep.subr.bf16.mxu0 %v5950_v44  ;;  %v5944_v37 = vld [vmem:[%s8170_s7 + $0xc4] ss:$8 sps:$4 sm:$0xff]   ;;  %2196 = vmatpush1.bf16.msra.mxu1 %v5936_v36  ;;  %v5942_v44 = vld [vmem:[%s8170_s7 + $0xc0] ss:$8 sps:$4 sm:$0xff]  }
 0x1f1   : > { %v1447_v50 = vpack.c.bf16 %v1302_v43, %v1298_v42  ;;  %2197 = vmatprep.subr.bf16.mxu1 %v5944_v37 }
 0x1f2   : > { %v1478_v57 = vmax.bf16 %v6191_v2, %v1446_v47 }
 0x1f3   : > { %v1305_v51 = vpop.f32.mrb[8].mxu1  ;;  %v1479_v54 = vmax.bf16 %v6191_v2, %v1447_v50  ;;  %2561 = vmatpush1.bf16.msra.mxu0 %v5948_v49 }
 0x1f4   : > { %v1307_v56 = vpop.f32.mrb[9].mxu1  ;;  %v1306_v61 = vadd.f32 %v1305_v51, %v6786_v63  ;;  %2198 = vmatpush1.bf16.msra.mxu1 %v5942_v44 }
 0x1f5   : > { %v1309_v58 = vpop.f32.mrb[10].mxu1  ;;  %1754 = vmatprep.mubr.bf16.mxu0 %v1479_v54  ;;  %v1308_v6 = vadd.f32 %v1307_v56, %v6789_v3  ;;  %2199 = vmatprep.subr.bf16.mxu1 %v5947_v53 }
 0x1f6   : > { %v1310_v62 = vadd.f32 %v1309_v58, %v6786_v63  ;;  %v1311_v1 = vpop.f32.mrb[11].mxu1  ;;  %1755 = vmatmul.mubr.bf16.gmra.mrb[68].mxu0 %v1478_v57  ;;  %v5945_v57 = vld [vmem:[%s8170_s7 + $0xd0] ss:$8 sps:$4 sm:$0xff]   ;;  %v5953_v58 = vld [vmem:[%s8170_s7 + $0xe4] ss:$8 sps:$4 sm:$0xff]  }
 0x1f7   : > { %v1312_v8 = vadd.f32 %v1311_v1, %v6789_v3 }
 0x1f8   : > { %v1448_v9 = vpack.c.bf16 %v1310_v62, %v1306_v61  ;;  %2200 = vmatpush1.bf16.msra.mxu1 %v5945_v57 }
 0x1f9   : > { %v1449_v11 = vpack.c.bf16 %v1312_v8, %v1308_v6  ;;  %v5951_v6 = vld [vmem:[%s8170_s7 + $0xe0] ss:$8 sps:$4 sm:$0xff]   ;;  %2201 = vmatprep.subr.bf16.mxu1 %v5953_v58 }
 0x1fa   : > { %v1480_v19 = vmax.bf16 %v6191_v2, %v1448_v9 }
 0x1fb   : > { %v1315_v15 = vpop.f32.mrb[12].mxu1  ;;  %v1481_v16 = vmax.bf16 %v6191_v2, %v1449_v11 }
 0x1fc   : > { %v1317_v18 = vpop.f32.mrb[13].mxu1  ;;  %v1316_v22 = vadd.f32 %v1315_v15, %v6786_v63  ;;  %2202 = vmatpush1.bf16.msra.mxu1 %v5951_v6 }
 0x1fd   : > { %v1319_v20 = vpop.f32.mrb[14].mxu1  ;;  %1764 = vmatprep.mubr.bf16.mxu0 %v1481_v16  ;;  %v1318_v29 = vadd.f32 %v1317_v18, %v6789_v3 }
 0x1fe   : > { %v1320_v24 = vadd.f32 %v1319_v20, %v6786_v63  ;;  %v1321_v26 = vpop.f32.mrb[15].mxu1  ;;  %1765 = vmatmul.mubr.bf16.gmra.mrb[72].mxu0 %v1480_v19 }
 0x1ff   : > { %v1322_v31 = vadd.f32 %v1321_v26, %v6789_v3 }
 0x200   : > { %v1450_v33 = vpack.c.bf16 %v1320_v24, %v1316_v22 }
 0x201   : > { %v1451_v34 = vpack.c.bf16 %v1322_v31, %v1318_v29 }
 0x202   : > { %v1482_v42 = vmax.bf16 %v6191_v2, %v1450_v33 }
 0x203   : > { %v1325_v39 = vpop.f32.mrb[16].mxu1  ;;  %v1483_v40 = vmax.bf16 %v6191_v2, %v1451_v34 }
 0x204   : > { %v1327_v41 = vpop.f32.mrb[17].mxu1  ;;  %v1326_v47 = vadd.f32 %v1325_v39, %v6786_v63 }
 0x205   : > { %v1329_v43 = vpop.f32.mrb[18].mxu1  ;;  %1774 = vmatprep.mubr.bf16.mxu0 %v1483_v40  ;;  %v1328_v55 = vadd.f32 %v1327_v41, %v6789_v3 }
 0x206   : > { %v1330_v49 = vadd.f32 %v1329_v43, %v6786_v63  ;;  %v1331_v50 = vpop.f32.mrb[19].mxu1  ;;  %1775 = vmatmul.mubr.bf16.gmra.mrb[76].mxu0 %v1482_v42 }
 0x207   : > { %v1332_v51 = vadd.f32 %v1331_v50, %v6789_v3 }
 0x208   : > { %v1452_v54 = vpack.c.bf16 %v1330_v49, %v1326_v47 }
 0x209   : > { %v1453_v56 = vpack.c.bf16 %v1332_v51, %v1328_v55 }
 0x20a   : > { %v1484_v1 = vmax.bf16 %v6191_v2, %v1452_v54 }
 0x20b   : > { %v1335_v60 = vpop.f32.mrb[20].mxu1  ;;  %v1485_v61 = vmax.bf16 %v6191_v2, %v1453_v56 }
 0x20c   : > { %v1337_v62 = vpop.f32.mrb[21].mxu1  ;;  %v1336_v8 = vadd.f32 %v1335_v60, %v6786_v63 }
 0x20d   : > { %v1339_v5 = vpop.f32.mrb[22].mxu1  ;;  %1784 = vmatprep.mubr.bf16.mxu0 %v1485_v61  ;;  %v1338_v12 = vadd.f32 %v1337_v62, %v6789_v3 }
 0x20e   : > { %v1340_v9 = vadd.f32 %v1339_v5, %v6786_v63  ;;  %v1341_v11 = vpop.f32.mrb[23].mxu1  ;;  %1785 = vmatmul.mubr.bf16.gmra.mrb[80].mxu0 %v1484_v1 }
 0x20f   : > { %v1342_v14 = vadd.f32 %v1341_v11, %v6789_v3 }
 0x210   : > { %v1454_v15 = vpack.c.bf16 %v1340_v9, %v1336_v8 }
 0x211   : > { %v1455_v16 = vpack.c.bf16 %v1342_v14, %v1338_v12 }
 0x212   : > { %v1486_v21 = vmax.bf16 %v6191_v2, %v1454_v15 }
 0x213   : > { %v1345_v18 = vpop.f32.mrb[24].mxu1  ;;  %v1487_v19 = vmax.bf16 %v6191_v2, %v1455_v16 }
 0x214   : > { %v1347_v20 = vpop.f32.mrb[25].mxu1  ;;  %v1346_v24 = vadd.f32 %v1345_v18, %v6786_v63 }
 0x215   : > { %v1349_v22 = vpop.f32.mrb[26].mxu1  ;;  %1794 = vmatprep.mubr.bf16.mxu0 %v1487_v19  ;;  %v1348_v29 = vadd.f32 %v1347_v20, %v6789_v3 }
 0x216   : > { %v1350_v26 = vadd.f32 %v1349_v22, %v6786_v63  ;;  %v1351_v27 = vpop.f32.mrb[27].mxu1  ;;  %1795 = vmatmul.mubr.bf16.gmra.mrb[84].mxu0 %v1486_v21 }
 0x217   : > { %v1352_v31 = vadd.f32 %v1351_v27, %v6789_v3 }
 0x218   : > { %v1456_v33 = vpack.c.bf16 %v1350_v26, %v1346_v24 }
 0x219   : > { %v1457_v34 = vpack.c.bf16 %v1352_v31, %v1348_v29 }
 0x21a   : > { %v1488_v40 = vmax.bf16 %v6191_v2, %v1456_v33 }
 0x21b   : > { %v1355_v36 = vpop.f32.mrb[28].mxu1  ;;  %v1489_v37 = vmax.bf16 %v6191_v2, %v1457_v34 }
 0x21c   : > { %v1357_v39 = vpop.f32.mrb[29].mxu1  ;;  %v1356_v42 = vadd.f32 %v1355_v36, %v6786_v63 }
 0x21d   : > { %v1359_v41 = vpop.f32.mrb[30].mxu1  ;;  %1804 = vmatprep.mubr.bf16.mxu0 %v1489_v37  ;;  %v1358_v47 = vadd.f32 %v1357_v39, %v6789_v3 }
 0x21e   : > { %v1360_v43 = vadd.f32 %v1359_v41, %v6786_v63  ;;  %v1361_v44 = vpop.f32.mrb[31].mxu1  ;;  %1805 = vmatmul.mubr.bf16.gmra.mrb[88].mxu0 %v1488_v40 }
 0x21f   : > { %v1362_v49 = vadd.f32 %v1361_v44, %v6789_v3 }
 0x220   : > { %v1458_v50 = vpack.c.bf16 %v1360_v43, %v1356_v42 }
 0x221   : > { %v1459_v53 = vpack.c.bf16 %v1362_v49, %v1358_v47 }
 0x222   : > { %v1490_v56 = vmax.bf16 %v6191_v2, %v1458_v50 }
 0x223   : > { %v1365_v55 = vpop.f32.mrb[32].mxu1  ;;  %v1491_v51 = vmax.bf16 %v6191_v2, %v1459_v53 }
 0x224   : > { %v1367_v54 = vpop.f32.mrb[33].mxu1  ;;  %v1366_v58 = vadd.f32 %v1365_v55, %v6786_v63 }
 0x225   : > { %v1369_v57 = vpop.f32.mrb[34].mxu1  ;;  %1814 = vmatprep.mubr.bf16.mxu0 %v1491_v51  ;;  %v1368_v62 = vadd.f32 %v1367_v54, %v6789_v3 }
 0x226   : > { %v1370_v60 = vadd.f32 %v1369_v57, %v6786_v63  ;;  %v1371_v61 = vpop.f32.mrb[35].mxu1  ;;  %1815 = vmatmul.mubr.bf16.gmra.mrb[92].mxu0 %v1490_v56 }
 0x227   : > { %v1372_v1 = vadd.f32 %v1371_v61, %v6789_v3 }
 0x228   : > { %v1460_v5 = vpack.c.bf16 %v1370_v60, %v1366_v58 }
 0x229   : > { %v1461_v6 = vpack.c.bf16 %v1372_v1, %v1368_v62 }
 0x22a   : > { %v1492_v12 = vmax.bf16 %v6191_v2, %v1460_v5 }
 0x22b   : > { %v1375_v8 = vpop.f32.mrb[36].mxu1  ;;  %v1493_v9 = vmax.bf16 %v6191_v2, %v1461_v6 }
 0x22c   : > { %v1377_v11 = vpop.f32.mrb[37].mxu1  ;;  %v1376_v15 = vadd.f32 %v1375_v8, %v6786_v63 }
 0x22d   : > { %v1379_v14 = vpop.f32.mrb[38].mxu1  ;;  %1824 = vmatprep.mubr.bf16.mxu0 %v1493_v9  ;;  %v1378_v19 = vadd.f32 %v1377_v11, %v6789_v3  ;;  %v5956_v9 = vld [vmem:[%s8170_s7 + $0xf4] ss:$8 sps:$4 sm:$0xff]  }
 0x22e   : > { %v1380_v16 = vadd.f32 %v1379_v14, %v6786_v63  ;;  %v1381_v18 = vpop.f32.mrb[39].mxu1  ;;  %1825 = vmatmul.mubr.bf16.gmra.mrb[96].mxu0 %v1492_v12  ;;  %v5954_v14 = vld [vmem:[%s8170_s7 + $0xf0] ss:$8 sps:$4 sm:$0xff]   ;;  %2203 = vmatprep.subr.bf16.mxu1 %v5956_v9 }
 0x22f   : > { %v1382_v20 = vadd.f32 %v1381_v18, %v6789_v3  ;;  %2204 = vmatpush1.bf16.msra.mxu1 %v5954_v14  ;;  %v5957_v18 = vld [vmem:[%s8173_s10 + $0x20] ss:$8 sps:$4 sm:$0xff]  }
 0x230   : > { %v1462_v21 = vpack.c.bf16 %v1380_v16, %v1376_v15 }
 0x231   : > { %v1463_v22 = vpack.c.bf16 %v1382_v20, %v1378_v19  ;;  %v5959_v19 = vld [vmem:[%s8173_s10 + $0x24] ss:$8 sps:$4 sm:$0xff]  }
 0x232   : > { %v1494_v29 = vmax.bf16 %v6191_v2, %v1462_v21  ;;  %2562 = vmatprep.subr.bf16.mxu0 %v5959_v19  ;;  %v5969_v19 = vld [vmem:[%s8173_s10 + $0x60] ss:$8 sps:$4 sm:$0xff]  }
 0x233   : > { %v1385_v24 = vpop.f32.mrb[40].mxu1  ;;  %v1495_v26 = vmax.bf16 %v6191_v2, %v1463_v22  ;;  %2563 = vmatpush1.bf16.msra.mxu0 %v5957_v18  ;;  %v5968_v18 = vld [vmem:[%s8173_s10 + $0x54] ss:$8 sps:$4 sm:$0xff]  }
 0x234   : > { %v1387_v27 = vpop.f32.mrb[41].mxu1  ;;  %v1386_v33 = vadd.f32 %v1385_v24, %v6786_v63 }
 0x235   : > { %v1389_v31 = vpop.f32.mrb[42].mxu1  ;;  %1834 = vmatprep.mubr.bf16.mxu0 %v1495_v26  ;;  %v1388_v37 = vadd.f32 %v1387_v27, %v6789_v3 }
 0x236   : > { %v1390_v34 = vadd.f32 %v1389_v31, %v6786_v63  ;;  %v1391_v36 = vpop.f32.mrb[43].mxu1  ;;  %1835 = vmatmul.mubr.bf16.gmra.mrb[100].mxu0 %v1494_v29 }
 0x237   : > { %v1392_v39 = vadd.f32 %v1391_v36, %v6789_v3 }
 0x238   : > { %v1464_v40 = vpack.c.bf16 %v1390_v34, %v1386_v33 }
 0x239   : > { %v1465_v41 = vpack.c.bf16 %v1392_v39, %v1388_v37 }
 0x23a   : > { %v1496_v47 = vmax.bf16 %v6191_v2, %v1464_v40 }
 0x23b   : > { %v1395_v42 = vpop.f32.mrb[44].mxu1  ;;  %v1497_v43 = vmax.bf16 %v6191_v2, %v1465_v41 }
 0x23c   : > { %v1397_v44 = vpop.f32.mrb[45].mxu1  ;;  %v1396_v50 = vadd.f32 %v1395_v42, %v6786_v63 }
 0x23d   : > { %v1399_v49 = vpop.f32.mrb[46].mxu1  ;;  %1844 = vmatprep.mubr.bf16.mxu0 %v1497_v43  ;;  %v1398_v51 = vadd.f32 %v1397_v44, %v6789_v3 }
 0x23e   : > { %v1400_v53 = vadd.f32 %v1399_v49, %v6786_v63  ;;  %v1401_v55 = vpop.f32.mrb[47].mxu1  ;;  %1845 = vmatmul.mubr.bf16.gmra.mrb[104].mxu0 %v1496_v47 }
 0x23f   : > { %v1402_v54 = vadd.f32 %v1401_v55, %v6789_v3 }
 0x240   : > { %v1466_v56 = vpack.c.bf16 %v1400_v53, %v1396_v50 }
 0x241   : > { %v1467_v57 = vpack.c.bf16 %v1402_v54, %v1398_v51  ;;  %v5960_v54 = vld [vmem:[%s8173_s10 + $0x30] ss:$8 sps:$4 sm:$0xff]  }
 0x242   : > { %v1498_v62 = vmax.bf16 %v6191_v2, %v1466_v56  ;;  %v5962_v56 = vld [vmem:[%s8173_s10 + $0x34] ss:$8 sps:$4 sm:$0xff]  }
 0x243   : > { %v1405_v58 = vpop.f32.mrb[48].mxu1  ;;  %v1499_v60 = vmax.bf16 %v6191_v2, %v1467_v57  ;;  %2564 = vmatprep.subr.bf16.mxu0 %v5962_v56 }
 0x244   : > { %v1407_v61 = vpop.f32.mrb[49].mxu1  ;;  %v1406_v5 = vadd.f32 %v1405_v58, %v6786_v63  ;;  %2565 = vmatpush1.bf16.msra.mxu0 %v5960_v54 }
 0x245   : > { %v1409_v1 = vpop.f32.mrb[50].mxu1  ;;  %1854 = vmatprep.mubr.bf16.mxu0 %v1499_v60  ;;  %v1408_v11 = vadd.f32 %v1407_v61, %v6789_v3 }
 0x246   : > { %v1410_v6 = vadd.f32 %v1409_v1, %v6786_v63  ;;  %v1411_v8 = vpop.f32.mrb[51].mxu1  ;;  %1855 = vmatmul.mubr.bf16.gmra.mrb[108].mxu0 %v1498_v62 }
 0x247   : > { %v1412_v12 = vadd.f32 %v1411_v8, %v6789_v3 }
 0x248   : > { %v1468_v15 = vpack.c.bf16 %v1410_v6, %v1406_v5 }
 0x249   : > { %v1469_v16 = vpack.c.bf16 %v1412_v12, %v1408_v11 }
 0x24a   : > { %v1500_v24 = vmax.bf16 %v6191_v2, %v1468_v15 }
 0x24b   : > { %v1415_v20 = vpop.f32.mrb[52].mxu1  ;;  %v1501_v21 = vmax.bf16 %v6191_v2, %v1469_v16  ;;  %v5965_v16 = vld [vmem:[%s8173_s10 + $0x44] ss:$8 sps:$4 sm:$0xff]  }
 0x24c   : > { %v1417_v22 = vpop.f32.mrb[53].mxu1  ;;  %v1416_v27 = vadd.f32 %v1415_v20, %v6786_v63  ;;  %2566 = vmatprep.subr.bf16.mxu0 %v5965_v16  ;;  %v5971_v20 = vld [vmem:[%s8173_s10 + $0x64] ss:$8 sps:$4 sm:$0xff]  }
 0x24d   : > { %v1419_v26 = vpop.f32.mrb[54].mxu1  ;;  %1864 = vmatprep.mubr.bf16.mxu0 %v1501_v21  ;;  %v1418_v33 = vadd.f32 %v1417_v22, %v6789_v3  ;;  %v5972_v21 = vld [vmem:[%s8173_s10 + $0x70] ss:$8 sps:$4 sm:$0xff]   ;;  %v5974_v22 = vld [vmem:[%s8173_s10 + $0x74] ss:$8 sps:$4 sm:$0xff]  }
 0x24e   : > { %v1420_v29 = vadd.f32 %v1419_v26, %v6786_v63  ;;  %v1421_v31 = vpop.f32.mrb[55].mxu1  ;;  %1865 = vmatmul.mubr.bf16.gmra.mrb[112].mxu0 %v1500_v24  ;;  %v5975_v24 = vld [vmem:[%s8172_s9] ss:$8 sps:$4 sm:$0xff]   ;;  %v5977_v26 = vld [vmem:[%s8172_s9 + $0x4] ss:$8 sps:$4 sm:$0xff]  }
 0x24f   : > { %v1422_v34 = vadd.f32 %v1421_v31, %v6789_v3  ;;  %v5986_v31 = vld [vmem:[%s8172_s9 + $0x34] ss:$8 sps:$4 sm:$0xff]  }
 0x250   : > { %v1470_v36 = vpack.c.bf16 %v1420_v29, %v1416_v27  ;;  %v5983_v27 = vld [vmem:[%s8172_s9 + $0x24] ss:$8 sps:$4 sm:$0xff]   ;;  %v1540_v29 = vld [vmem:[%s8169_s6] sm:$0x3] }
 0x251   : > { %v1471_v37 = vpack.c.bf16 %v1422_v34, %v1418_v33  ;;  %v7044_v33 = vrot.slane %v1540_v29, %v6571_v46 }
 0x252   : > { %v1502_v42 = vmax.bf16 %v6191_v2, %v1470_v36  ;;  %v7048_v36 = vrot.slane %v1540_v29, %v6576_v48 }
 0x253   : > { %v1425_v39 = vpop.f32.mrb[56].mxu1  ;;  %v1503_v40 = vmax.bf16 %v6191_v2, %v1471_v37 }
 0x254   : > { %v1427_v41 = vpop.f32.mrb[57].mxu1  ;;  %v1426_v44 = vadd.f32 %v1425_v39, %v6786_v63 }
 0x255   : > { %v1429_v43 = vpop.f32.mrb[58].mxu1  ;;  %1874 = vmatprep.mubr.bf16.mxu0 %v1503_v40  ;;  %v1428_v50 = vadd.f32 %v1427_v41, %v6789_v3 }
 0x256   : > { %v1430_v47 = vadd.f32 %v1429_v43, %v6786_v63  ;;  %v1431_v49 = vpop.f32.mrb[59].mxu1  ;;  %1875 = vmatmul.mubr.bf16.gmra.mrb[116].mxu0 %v1502_v42  ;;  %v5987_v43 = vld [vmem:[%s8172_s9 + $0x40] ss:$8 sps:$4 sm:$0xff]  }
 0x257   : > { %v1432_v53 = vadd.f32 %v1431_v49, %v6789_v3  ;;  %v5992_v49 = vld [vmem:[%s8172_s9 + $0x54] ss:$8 sps:$4 sm:$0xff]  }
 0x258   : > { %v1472_v55 = vpack.c.bf16 %v1430_v47, %v1426_v44 }
 0x259   : > { %v1473_v51 = vpack.c.bf16 %v1432_v53, %v1428_v50 }
 0x25a   : > { %v1504_v61 = vmax.bf16 %v6191_v2, %v1472_v55  ;;  %v5990_v55 = vld [vmem:[%s8172_s9 + $0x50] ss:$8 sps:$4 sm:$0xff]  }
 0x25b   : > { %v1435_v57 = vpop.f32.mrb[60].mxu1  ;;  %v1505_v58 = vmax.bf16 %v6191_v2, %v1473_v51  ;;  %v5995_v51 = vld [vmem:[%s8172_s9 + $0x64] ss:$8 sps:$4 sm:$0xff]  }
 0x25c   : > { %v1437_v60 = vpop.f32.mrb[61].mxu1  ;;  %v1436_v1 = vadd.f32 %v1435_v57, %v6786_v63 }
 0x25d   : > { %v1439_v62 = vpop.f32.mrb[62].mxu1  ;;  %1884 = vmatprep.mubr.bf16.mxu0 %v1505_v58  ;;  %v1438_v8 = vadd.f32 %v1437_v60, %v6789_v3 }
 0x25e   : > { %v1440_v5 = vadd.f32 %v1439_v62, %v6786_v63  ;;  %v1441_v6 = vpop.f32.mrb[63].mxu1  ;;  %1885 = vmatmul.mubr.bf16.gmra.mrb[120].mxu0 %v1504_v61  ;;  %v5963_v63 = vld [vmem:[%s8173_s10 + $0x40] ss:$8 sps:$4 sm:$0xff]  }
 0x25f   : > { %v1442_v9 = vadd.f32 %v1441_v6, %v6789_v3  ;;  %2567 = vmatpush1.bf16.msra.mxu0 %v5963_v63  ;;  %v5966_v3 = vld [vmem:[%s8173_s10 + $0x50] ss:$8 sps:$4 sm:$0xff]   ;;  %v5993_v61 = vld [vmem:[%s8172_s9 + $0x60] ss:$8 sps:$4 sm:$0xff]  }
 0x260   : > { %v1474_v11 = vpack.c.bf16 %v1440_v5, %v1436_v1  ;;  %2568 = vmatprep.subr.bf16.mxu0 %v5968_v18  ;;  %v5998_v5 = vld [vmem:[%s8172_s9 + $0x74] ss:$8 sps:$4 sm:$0xff]  }
 0x261   : > { %v1475_v12 = vpack.c.bf16 %v1442_v9, %v1438_v8 }
 0x262   : > { %v1506_v15 = vmax.bf16 %v6191_v2, %v1474_v11 }
 0x263   : > { %v1507_v14 = vmax.bf16 %v6191_v2, %v1475_v12  ;;  %2569 = vmatpush1.bf16.msra.mxu0 %v5966_v3  ;;  %v5996_v12 = vld [vmem:[%s8172_s9 + $0x70] ss:$8 sps:$4 sm:$0xff]  }
 0x264   : > { %2570 = vmatprep.subr.bf16.mxu0 %v5971_v20 }
 0x265   : > { %1894 = vmatprep.mubr.bf16.mxu0 %v1507_v14  ;;  %v6001_v14 = vld [vmem:[%s8172_s9 + $0x84] ss:$8 sps:$4 sm:$0xff]  }
 0x266   : > { %1895 = vmatmul.mubr.bf16.gmra.mrb[124].mxu0 %v1506_v15 }
 0x267   : > { %2590 = vmatprep.mubr.bf16.mxu0 %v6191_v2  ;;  %2571 = vmatpush1.bf16.msra.mxu0 %v5969_v19 }
 0x268   : > { %2572 = vmatprep.subr.bf16.mxu0 %v5974_v22  ;;  %v6004_v22 = vld [vmem:[%s8172_s9 + $0x94] ss:$8 sps:$4 sm:$0xff]  }
 0x26b   : > { %2573 = vmatpush1.bf16.msra.mxu0 %v5972_v21 }
 0x26c   : > { %2911 = vmatprep.subr.bf16.mxu0 %v5977_v26 }
 0x26e   : > { %2591 = vmatmul.mubr.bf16.vlgmr.msra.gmra.mrb[128].mxu0 %v6376_v23  ;;  %v5978_v23 = vld [vmem:[%s8172_s9 + $0x10] ss:$8 sps:$4 sm:$0xff]  }
 0x26f   : > { %2600 = vmatprep.mubr.bf16.mxu0 %v6191_v2  ;;  %2912 = vmatpush1.bf16.msra.mxu0 %v5975_v24 }
 0x276   : > { %2601 = vmatmul.mubr.bf16.gmra.mrb[132].mxu0 %v6394_v30  ;;  %v5980_v30 = vld [vmem:[%s8172_s9 + $0x14] ss:$8 sps:$4 sm:$0xff]  }
 0x277   : > { %2610 = vmatprep.mubr.bf16.mxu0 %v6191_v2  ;;  %2913 = vmatprep.subr.bf16.mxu0 %v5980_v30 }
 0x278   : > { %2914 = vmatpush1.bf16.msra.mxu0 %v5978_v23 }
 0x279   : > { %2915 = vmatprep.subr.bf16.mxu0 %v5983_v27  ;;  %v6007_v27 = vld [vmem:[%s8172_s9 + $0xa4] ss:$8 sps:$4 sm:$0xff]  }
 0x27e   : > { %2611 = vmatmul.mubr.bf16.gmra.mrb[136].mxu0 %v6415_v38  ;;  %v5981_v38 = vld [vmem:[%s8172_s9 + $0x20] ss:$8 sps:$4 sm:$0xff]  }
 0x27f   : > { %2620 = vmatprep.mubr.bf16.mxu0 %v6191_v2  ;;  %2916 = vmatpush1.bf16.msra.mxu0 %v5981_v38  ;;  %v6002_v38 = vld [vmem:[%s8172_s9 + $0x90] ss:$8 sps:$4 sm:$0xff]  }
 0x280   : > { %2917 = vmatprep.subr.bf16.mxu0 %v5986_v31 }
 0x286   : > { %2621 = vmatmul.mubr.bf16.gmra.mrb[140].mxu0 %v6433_v45  ;;  %v5984_v45 = vld [vmem:[%s8172_s9 + $0x30] ss:$8 sps:$4 sm:$0xff]  }
 0x287   : > { %2630 = vmatprep.mubr.bf16.mxu0 %v6191_v2  ;;  %2918 = vmatpush1.bf16.msra.mxu0 %v5984_v45 }
 0x28e   : > { %2631 = vmatmul.mubr.bf16.gmra.mrb[144].mxu0 %v6451_v52  ;;  %v5989_v52 = vld [vmem:[%s8172_s9 + $0x44] ss:$8 sps:$4 sm:$0xff]  }
 0x28f   : > { %2640 = vmatprep.mubr.bf16.mxu0 %v6191_v2  ;;  %2919 = vmatprep.subr.bf16.mxu0 %v5989_v52 }
 0x290   : > { %2920 = vmatpush1.bf16.msra.mxu0 %v5987_v43 }
 0x291   : > { %2921 = vmatprep.subr.bf16.mxu0 %v5992_v49  ;;  %v6008_v49 = vld [vmem:[%s8172_s9 + $0xb0] ss:$8 sps:$4 sm:$0xff]  }
 0x294   : > { %2922 = vmatpush1.bf16.msra.mxu0 %v5990_v55 }
 0x295   : > { %2923 = vmatprep.subr.bf16.mxu0 %v5995_v51 }
 0x296   : > { %2641 = vmatmul.mubr.bf16.gmra.mrb[148].mxu0 %v6469_v59 }
 0x297   : > { %2650 = vmatprep.mubr.bf16.mxu0 %v6191_v2 }
 0x298   : > { %2924 = vmatpush1.bf16.msra.mxu0 %v5993_v61  ;;  %v6016_v61 = vld [vmem:[%s8172_s9 + $0xd4] ss:$8 sps:$4 sm:$0xff]  }
 0x299   : > { %2925 = vmatprep.subr.bf16.mxu0 %v5998_v5 }
 0x29c   : > { %2926 = vmatpush1.bf16.msra.mxu0 %v5996_v12 }
 0x29d   : > { %2927 = vmatprep.subr.bf16.mxu0 %v6001_v14 }
 0x29e   : > { %2651 = vmatmul.mubr.bf16.gmra.mrb[152].mxu0 %v6481_v0  ;;  %v5999_v0 = vld [vmem:[%s8172_s9 + $0x80] ss:$8 sps:$4 sm:$0xff]  }
 0x29f   : > { %2660 = vmatprep.mubr.bf16.mxu0 %v6191_v2 }
 0x2a0   : > { %2928 = vmatpush1.bf16.msra.mxu0 %v5999_v0 }
 0x2a1   : > { %2929 = vmatprep.subr.bf16.mxu0 %v6004_v22 }
 0x2a4   : > { %2930 = vmatpush1.bf16.msra.mxu0 %v6002_v38 }
 0x2a5   : > { %2931 = vmatprep.subr.bf16.mxu0 %v6007_v27 }
 0x2a6   : > { %2661 = vmatmul.mubr.bf16.gmra.mrb[156].mxu0 %v6487_v4  ;;  %v6005_v4 = vld [vmem:[%s8172_s9 + $0xa0] ss:$8 sps:$4 sm:$0xff]  }
 0x2a7   : > { %2670 = vmatprep.mubr.bf16.mxu0 %v6191_v2 }
 0x2a8   : > { %2932 = vmatpush1.bf16.msra.mxu0 %v6005_v4 }
 0x2ae   : > { %2671 = vmatmul.mubr.bf16.gmra.mrb[160].mxu0 %v6493_v7  ;;  %v6011_v7 = vld [vmem:[%s8172_s9 + $0xc0] ss:$8 sps:$4 sm:$0xff]  }
 0x2af   : > { %2680 = vmatprep.mubr.bf16.mxu0 %v6191_v2 }
 0x2b6   : > { %2681 = vmatmul.mubr.bf16.gmra.mrb[164].mxu0 %v6499_v10  ;;  %v6017_v10 = vld [vmem:[%s8172_s9 + $0xe0] ss:$8 sps:$4 sm:$0xff]  }
 0x2b7   : > { %2690 = vmatprep.mubr.bf16.mxu0 %v6191_v2 }
 0x2be   : > { %2691 = vmatmul.mubr.bf16.gmra.mrb[168].mxu0 %v6505_v13 }
 0x2bf   : > { %2700 = vmatprep.mubr.bf16.mxu0 %v6191_v2 }
 0x2c1   : > { %v1746_v34 = vpop.f32.mrb[64].mxu0 }
 0x2c2   : > { %v1748_v37 = vpop.f32.mrb[65].mxu0  ;;  %v1747_v40 = vadd.f32 %v1746_v34, %v7044_v33 }
 0x2c3   : > { %v1750_v39 = vpop.f32.mrb[66].mxu0  ;;  %v1749_v44 = vadd.f32 %v1748_v37, %v7048_v36 }
 0x2c4   : > { %v1751_v41 = vadd.f32 %v1750_v39, %v7044_v33  ;;  %v1752_v42 = vpop.f32.mrb[67].mxu0 }
 0x2c5   : > { %v1753_v47 = vadd.f32 %v1752_v42, %v7048_v36  ;;  %v6010_v42 = vld [vmem:[%s8172_s9 + $0xb4] ss:$8 sps:$4 sm:$0xff]  }
 0x2c6   : > { %v1905_v50 = vpack.c.bf16 %v1751_v41, %v1747_v40  ;;  %2933 = vmatprep.subr.bf16.mxu0 %v6010_v42  ;;  %2701 = vmatmul.mubr.bf16.gmra.mrb[172].mxu0 %v6514_v17 }
 0x2c7   : > { %v1906_v53 = vpack.c.bf16 %v1753_v47, %v1749_v44  ;;  %2934 = vmatpush1.bf16.msra.mxu0 %v6008_v49  ;;  %2710 = vmatprep.mubr.bf16.mxu0 %v6191_v2 }
 0x2c8   : > { %v1937_v57 = vmax.bf16 %v6191_v2, %v1905_v50  ;;  %v6013_v50 = vld [vmem:[%s8172_s9 + $0xc4] ss:$8 sps:$4 sm:$0xff]  }
 0x2c9   : > { %v1756_v54 = vpop.f32.mrb[68].mxu0  ;;  %v1938_v56 = vmax.bf16 %v6191_v2, %v1906_v53  ;;  %2935 = vmatprep.subr.bf16.mxu0 %v6013_v50 }
 0x2ca   : > { %v1758_v58 = vpop.f32.mrb[69].mxu0  ;;  %v1757_v59 = vadd.f32 %v1756_v54, %v7044_v33 }
 0x2cb   : > { %v1760_v60 = vpop.f32.mrb[70].mxu0  ;;  %2205 = vmatprep.mubr.bf16.mxu1 %v1938_v56  ;;  %v1759_v6 = vadd.f32 %v1758_v58, %v7048_v36  ;;  %2936 = vmatpush1.bf16.msra.mxu0 %v6011_v7 }
 0x2cc   : > { %v1761_v62 = vadd.f32 %v1760_v60, %v7044_v33  ;;  %v1762_v1 = vpop.f32.mrb[71].mxu0  ;;  %2206 = vmatmul.mubr.bf16.vlgmr.msra.gmra.mrb[64].mxu1 %v1937_v57  ;;  %2937 = vmatprep.subr.bf16.mxu0 %v6016_v61 }
 0x2cd   : > { %v1763_v8 = vadd.f32 %v1762_v1, %v7048_v36 }
 0x2ce   : > { %v1907_v9 = vpack.c.bf16 %v1761_v62, %v1757_v59  ;;  %2711 = vmatmul.mubr.bf16.gmra.mrb[176].mxu0 %v6532_v25 }
 0x2cf   : > { %v1908_v11 = vpack.c.bf16 %v1763_v8, %v1759_v6  ;;  %v6014_v6 = vld [vmem:[%s8172_s9 + $0xd0] ss:$8 sps:$4 sm:$0xff]   ;;  %v6019_v8 = vld [vmem:[%s8172_s9 + $0xe4] ss:$8 sps:$4 sm:$0xff]   ;;  %2720 = vmatprep.mubr.bf16.mxu0 %v6191_v2 }
 0x2d0   : > { %v1939_v3 = vmax.bf16 %v6191_v2, %v1907_v9  ;;  %2938 = vmatpush1.bf16.msra.mxu0 %v6014_v6 }
 0x2d1   : > { %v1766_v15 = vpop.f32.mrb[72].mxu0  ;;  %v1940_v63 = vmax.bf16 %v6191_v2, %v1908_v11  ;;  %2939 = vmatprep.subr.bf16.mxu0 %v6019_v8 }
 0x2d2   : > { %v1768_v16 = vpop.f32.mrb[73].mxu0  ;;  %v1767_v19 = vadd.f32 %v1766_v15, %v7044_v33 }
 0x2d3   : > { %v1770_v18 = vpop.f32.mrb[74].mxu0  ;;  %2215 = vmatprep.mubr.bf16.mxu1 %v1940_v63  ;;  %v1769_v24 = vadd.f32 %v1768_v16, %v7048_v36 }
 0x2d4   : > { %v1771_v20 = vadd.f32 %v1770_v18, %v7044_v33  ;;  %v1772_v21 = vpop.f32.mrb[75].mxu0  ;;  %2216 = vmatmul.mubr.bf16.gmra.mrb[68].mxu1 %v1939_v3  ;;  %2940 = vmatpush1.bf16.msra.mxu0 %v6017_v10 }
 0x2d5   : > { %v1773_v26 = vadd.f32 %v1772_v21, %v7048_v36 }
 0x2d6   : > { %v1909_v23 = vpack.c.bf16 %v1771_v20, %v1767_v19  ;;  %2721 = vmatmul.mubr.bf16.gmra.mrb[180].mxu0 %v6538_v28 }
 0x2d7   : > { %v1910_v30 = vpack.c.bf16 %v1773_v26, %v1769_v24  ;;  %2730 = vmatprep.mubr.bf16.mxu0 %v6191_v2 }
 0x2d8   : > { %v1941_v34 = vmax.bf16 %v6191_v2, %v1909_v23 }
 0x2d9   : > { %v1776_v29 = vpop.f32.mrb[76].mxu0  ;;  %v1942_v45 = vmax.bf16 %v6191_v2, %v1910_v30 }
 0x2da   : > { %v1778_v31 = vpop.f32.mrb[77].mxu0  ;;  %v1777_v39 = vadd.f32 %v1776_v29, %v7044_v33 }
 0x2db   : > { %v1780_v37 = vpop.f32.mrb[78].mxu0  ;;  %2225 = vmatprep.mubr.bf16.mxu1 %v1942_v45  ;;  %v1779_v43 = vadd.f32 %v1778_v31, %v7048_v36 }
 0x2dc   : > { %v1781_v40 = vadd.f32 %v1780_v37, %v7044_v33  ;;  %v1782_v41 = vpop.f32.mrb[79].mxu0  ;;  %2226 = vmatmul.mubr.bf16.gmra.mrb[72].mxu1 %v1941_v34 }
 0x2dd   : > { %v1783_v52 = vadd.f32 %v1782_v41, %v7048_v36 }
 0x2de   : > { %v1911_v44 = vpack.c.bf16 %v1781_v40, %v1777_v39  ;;  %2731 = vmatmul.mubr.bf16.gmra.mrb[184].mxu0 %v6544_v32 }
 0x2df   : > { %v1912_v47 = vpack.c.bf16 %v1783_v52, %v1779_v43  ;;  %2740 = vmatprep.mubr.bf16.mxu0 %v6191_v2 }
 0x2e0   : > { %v1943_v54 = vmax.bf16 %v6191_v2, %v1911_v44 }
 0x2e1   : > { %v1786_v53 = vpop.f32.mrb[80].mxu0  ;;  %v1944_v55 = vmax.bf16 %v6191_v2, %v1912_v47 }
 0x2e2   : > { %v1788_v51 = vpop.f32.mrb[81].mxu0  ;;  %v1787_v57 = vadd.f32 %v1786_v53, %v7044_v33 }
 0x2e3   : > { %v1790_v56 = vpop.f32.mrb[82].mxu0  ;;  %2235 = vmatprep.mubr.bf16.mxu1 %v1944_v55  ;;  %v1789_v59 = vadd.f32 %v1788_v51, %v7048_v36 }
 0x2e4   : > { %v1791_v58 = vadd.f32 %v1790_v56, %v7044_v33  ;;  %v1792_v60 = vpop.f32.mrb[83].mxu0  ;;  %2236 = vmatmul.mubr.bf16.gmra.mrb[76].mxu1 %v1943_v54 }
 0x2e5   : > { %v1793_v62 = vadd.f32 %v1792_v60, %v7048_v36 }
 0x2e6   : > { %v1913_v1 = vpack.c.bf16 %v1791_v58, %v1787_v57  ;;  %2741 = vmatmul.mubr.bf16.gmra.mrb[188].mxu0 %v6550_v35 }
 0x2e7   : > { %v1914_v5 = vpack.c.bf16 %v1793_v62, %v1789_v59 }
 0x2e8   : > { %v1945_v14 = vmax.bf16 %v6191_v2, %v1913_v1 }
 0x2e9   : > { %v1796_v9 = vpop.f32.mrb[84].mxu0  ;;  %v1946_v11 = vmax.bf16 %v6191_v2, %v1914_v5 }
 0x2ea   : > { %v1798_v12 = vpop.f32.mrb[85].mxu0  ;;  %v1797_v63 = vadd.f32 %v1796_v9, %v7044_v33 }
 0x2eb   : > { %v1800_v15 = vpop.f32.mrb[86].mxu0  ;;  %2245 = vmatprep.mubr.bf16.mxu1 %v1946_v11  ;;  %v1799_v18 = vadd.f32 %v1798_v12, %v7048_v36 }
 0x2ec   : > { %v1801_v16 = vadd.f32 %v1800_v15, %v7044_v33  ;;  %v1802_v3 = vpop.f32.mrb[87].mxu0  ;;  %2246 = vmatmul.mubr.bf16.gmra.mrb[80].mxu1 %v1945_v14 }
 0x2ed   : > { %v1803_v0 = vadd.f32 %v1802_v3, %v7048_v36 }
 0x2ee   : > { %v1915_v19 = vpack.c.bf16 %v1801_v16, %v1797_v63 }
 0x2ef   : > { %v1916_v20 = vpack.c.bf16 %v1803_v0, %v1799_v18 }
 0x2f0   : > { %v1947_v26 = vmax.bf16 %v6191_v2, %v1915_v19 }
 0x2f1   : > { %v1806_v21 = vpop.f32.mrb[88].mxu0  ;;  %v1948_v22 = vmax.bf16 %v6191_v2, %v1916_v20 }
 0x2f2   : > { %v1808_v24 = vpop.f32.mrb[89].mxu0  ;;  %v1807_v30 = vadd.f32 %v1806_v21, %v7044_v33 }
 0x2f3   : > { %v1810_v23 = vpop.f32.mrb[90].mxu0  ;;  %2255 = vmatprep.mubr.bf16.mxu1 %v1948_v22  ;;  %v1809_v29 = vadd.f32 %v1808_v24, %v7048_v36 }
 0x2f4   : > { %v1811_v38 = vadd.f32 %v1810_v23, %v7044_v33  ;;  %v1812_v27 = vpop.f32.mrb[91].mxu0  ;;  %2256 = vmatmul.mubr.bf16.gmra.mrb[84].mxu1 %v1947_v26 }
 0x2f5   : > { %v1813_v13 = vadd.f32 %v1812_v27, %v7048_v36 }
 0x2f6   : > { %v1917_v45 = vpack.c.bf16 %v1811_v38, %v1807_v30 }
 0x2f7   : > { %v1918_v31 = vpack.c.bf16 %v1813_v13, %v1809_v29 }
 0x2f8   : > { %v1949_v39 = vmax.bf16 %v6191_v2, %v1917_v45 }
 0x2f9   : > { %v1816_v34 = vpop.f32.mrb[92].mxu0  ;;  %v1950_v37 = vmax.bf16 %v6191_v2, %v1918_v31 }
 0x2fa   : > { %v1818_v4 = vpop.f32.mrb[93].mxu0  ;;  %v1817_v41 = vadd.f32 %v1816_v34, %v7044_v33 }
 0x2fb   : > { %v1820_v40 = vpop.f32.mrb[94].mxu0  ;;  %2265 = vmatprep.mubr.bf16.mxu1 %v1950_v37  ;;  %v1819_v52 = vadd.f32 %v1818_v4, %v7048_v36 }
 0x2fc   : > { %v1821_v42 = vadd.f32 %v1820_v40, %v7044_v33  ;;  %v1822_v43 = vpop.f32.mrb[95].mxu0  ;;  %2266 = vmatmul.mubr.bf16.gmra.mrb[88].mxu1 %v1949_v39 }
 0x2fd   : > { %v1823_v17 = vadd.f32 %v1822_v43, %v7048_v36 }
 0x2fe   : > { %v1919_v44 = vpack.c.bf16 %v1821_v42, %v1817_v41 }
 0x2ff   : > { %v1920_v47 = vpack.c.bf16 %v1823_v17, %v1819_v52  ;;  %v6022_v17 = vld [vmem:[%s8172_s9 + $0xf4] ss:$8 sps:$4 sm:$0xff]  }
 0x300   : > { %v1951_v55 = vmax.bf16 %v6191_v2, %v1919_v44  ;;  %2941 = vmatprep.subr.bf16.mxu0 %v6022_v17  ;;  %v6035_v17 = vld [vmem:[%s8175_s12 + $0x40] ss:$8 sps:$4 sm:$0xff]  }
 0x301   : > { %v1826_v49 = vpop.f32.mrb[96].mxu0  ;;  %v1952_v50 = vmax.bf16 %v6191_v2, %v1920_v47 }
 0x302   : > { %v1828_v53 = vpop.f32.mrb[97].mxu0  ;;  %v1827_v54 = vadd.f32 %v1826_v49, %v7044_v33  ;;  %v6020_v49 = vld [vmem:[%s8172_s9 + $0xf0] ss:$8 sps:$4 sm:$0xff]  }
 0x303   : > { %v1830_v51 = vpop.f32.mrb[98].mxu0  ;;  %2275 = vmatprep.mubr.bf16.mxu1 %v1952_v50  ;;  %v1829_v57 = vadd.f32 %v1828_v53, %v7048_v36  ;;  %2942 = vmatpush1.bf16.msra.mxu0 %v6020_v49 }
 0x304   : > { %v1831_v56 = vadd.f32 %v1830_v51, %v7044_v33  ;;  %v1832_v7 = vpop.f32.mrb[99].mxu0  ;;  %2276 = vmatmul.mubr.bf16.gmra.mrb[92].mxu1 %v1951_v55 }
 0x305   : > { %v1833_v25 = vadd.f32 %v1832_v7, %v7048_v36 }
 0x306   : > { %v1921_v58 = vpack.c.bf16 %v1831_v56, %v1827_v54 }
 0x307   : > { %v1922_v60 = vpack.c.bf16 %v1833_v25, %v1829_v57 }
 0x308   : > { %v1953_v1 = vmax.bf16 %v6191_v2, %v1921_v58 }
 0x309   : > { %v1836_v61 = vpop.f32.mrb[100].mxu0  ;;  %v1954_v59 = vmax.bf16 %v6191_v2, %v1922_v60 }
 0x30a   : > { %v1838_v62 = vpop.f32.mrb[101].mxu0  ;;  %v1837_v6 = vadd.f32 %v1836_v61, %v7044_v33 }
 0x30b   : > { %v1840_v5 = vpop.f32.mrb[102].mxu0  ;;  %2285 = vmatprep.mubr.bf16.mxu1 %v1954_v59  ;;  %v1839_v11 = vadd.f32 %v1838_v62, %v7048_v36 }
 0x30c   : > { %v1841_v8 = vadd.f32 %v1840_v5, %v7044_v33  ;;  %v1842_v9 = vpop.f32.mrb[103].mxu0  ;;  %2286 = vmatmul.mubr.bf16.gmra.mrb[96].mxu1 %v1953_v1 }
 0x30d   : > { %v1843_v28 = vadd.f32 %v1842_v9, %v7048_v36 }
 0x30e   : > { %v1923_v12 = vpack.c.bf16 %v1841_v8, %v1837_v6 }
 0x30f   : > { %v1924_v14 = vpack.c.bf16 %v1843_v28, %v1839_v11 }
 0x310   : > { %v1955_v16 = vmax.bf16 %v6191_v2, %v1923_v12 }
 0x311   : > { %v1846_v15 = vpop.f32.mrb[104].mxu0  ;;  %v1956_v10 = vmax.bf16 %v6191_v2, %v1924_v14 }
 0x312   : > { %v1848_v63 = vpop.f32.mrb[105].mxu0  ;;  %v1847_v18 = vadd.f32 %v1846_v15, %v7044_v33 }
 0x313   : > { %v1850_v3 = vpop.f32.mrb[106].mxu0  ;;  %2295 = vmatprep.mubr.bf16.mxu1 %v1956_v10  ;;  %v1849_v20 = vadd.f32 %v1848_v63, %v7048_v36 }
 0x314   : > { %v1851_v0 = vadd.f32 %v1850_v3, %v7044_v33  ;;  %v1852_v19 = vpop.f32.mrb[107].mxu0  ;;  %2296 = vmatmul.mubr.bf16.gmra.mrb[100].mxu1 %v1955_v16 }
 0x315   : > { %v1853_v32 = vadd.f32 %v1852_v19, %v7048_v36 }
 0x316   : > { %v1925_v21 = vpack.c.bf16 %v1851_v0, %v1847_v18 }
 0x317   : > { %v1926_v22 = vpack.c.bf16 %v1853_v32, %v1849_v20 }
 0x318   : > { %v1957_v30 = vmax.bf16 %v6191_v2, %v1925_v21 }
 0x319   : > { %v1856_v24 = vpop.f32.mrb[108].mxu0  ;;  %v1958_v26 = vmax.bf16 %v6191_v2, %v1926_v22 }
 0x31a   : > { %v1858_v23 = vpop.f32.mrb[109].mxu0  ;;  %v1857_v27 = vadd.f32 %v1856_v24, %v7044_v33 }
 0x31b   : > { %v1860_v38 = vpop.f32.mrb[110].mxu0  ;;  %2305 = vmatprep.mubr.bf16.mxu1 %v1958_v26  ;;  %v1859_v45 = vadd.f32 %v1858_v23, %v7048_v36 }
 0x31c   : > { %v1861_v29 = vadd.f32 %v1860_v38, %v7044_v33  ;;  %v1862_v13 = vpop.f32.mrb[111].mxu0  ;;  %2306 = vmatmul.mubr.bf16.gmra.mrb[104].mxu1 %v1957_v30 }
 0x31d   : > { %v1863_v31 = vadd.f32 %v1862_v13, %v7048_v36  ;;  %v6029_v13 = vld [vmem:[%s8175_s12 + $0x20] ss:$8 sps:$4 sm:$0xff]  }
 0x31e   : > { %v1927_v34 = vpack.c.bf16 %v1861_v29, %v1857_v27  ;;  %v6023_v27 = vld [vmem:[%s8175_s12] ss:$8 sps:$4 sm:$0xff]   ;;  %v6028_v29 = vld [vmem:[%s8175_s12 + $0x14] ss:$8 sps:$4 sm:$0xff]  }
 0x31f   : > { %v1928_v35 = vpack.c.bf16 %v1863_v31, %v1859_v45  ;;  %v6031_v45 = vld [vmem:[%s8175_s12 + $0x24] ss:$8 sps:$4 sm:$0xff]   ;;  %v2001_v31 = vld [vmem:[%s8171_s8] sm:$0x3] }
 0x320   : > { %v1959_v40 = vmax.bf16 %v6191_v2, %v1927_v34  ;;  %v6032_v34 = vld [vmem:[%s8175_s12 + $0x30] ss:$8 sps:$4 sm:$0xff]  }
 0x321   : > { %v1866_v37 = vpop.f32.mrb[112].mxu0  ;;  %v1960_v4 = vmax.bf16 %v6191_v2, %v1928_v35  ;;  %v6034_v35 = vld [vmem:[%s8175_s12 + $0x34] ss:$8 sps:$4 sm:$0xff]  }
 0x322   : > { %v1868_v39 = vpop.f32.mrb[113].mxu0  ;;  %v1867_v42 = vadd.f32 %v1866_v37, %v7044_v33  ;;  %v7268_v37 = vrot.slane %v2001_v31, %v6571_v46 }
 0x323   : > { %v1870_v41 = vpop.f32.mrb[114].mxu0  ;;  %2315 = vmatprep.mubr.bf16.mxu1 %v1960_v4  ;;  %v1869_v44 = vadd.f32 %v1868_v39, %v7048_v36  ;;  %v7271_v39 = vrot.slane %v2001_v31, %v6576_v48  ;;  %v6058_v31 = vld [vmem:[%s8175_s12 + $0xb4] ss:$8 sps:$4 sm:$0xff]  }
 0x324   : > { %v1871_v43 = vadd.f32 %v1870_v41, %v7044_v33  ;;  %v1872_v52 = vpop.f32.mrb[115].mxu0  ;;  %2316 = vmatmul.mubr.bf16.gmra.mrb[108].mxu1 %v1959_v40 }
 0x325   : > { %v1873_v47 = vadd.f32 %v1872_v52, %v7048_v36 }
 0x326   : > { %v1929_v50 = vpack.c.bf16 %v1871_v43, %v1867_v42 }
 0x327   : > { %v1930_v53 = vpack.c.bf16 %v1873_v47, %v1869_v44  ;;  %v6037_v44 = vld [vmem:[%s8175_s12 + $0x44] ss:$8 sps:$4 sm:$0xff]  }
 0x328   : > { %v1961_v56 = vmax.bf16 %v6191_v2, %v1929_v50  ;;  %v6040_v50 = vld [vmem:[%s8175_s12 + $0x54] ss:$8 sps:$4 sm:$0xff]  }
 0x329   : > { %v1876_v55 = vpop.f32.mrb[116].mxu0  ;;  %v1962_v51 = vmax.bf16 %v6191_v2, %v1930_v53 }
 0x32a   : > { %v1878_v54 = vpop.f32.mrb[117].mxu0  ;;  %v1877_v57 = vadd.f32 %v1876_v55, %v7044_v33 }
 0x32b   : > { %v1880_v7 = vpop.f32.mrb[118].mxu0  ;;  %2325 = vmatprep.mubr.bf16.mxu1 %v1962_v51  ;;  %v1879_v60 = vadd.f32 %v1878_v54, %v7048_v36  ;;  %v6038_v51 = vld [vmem:[%s8175_s12 + $0x50] ss:$8 sps:$4 sm:$0xff]   ;;  %v6043_v54 = vld [vmem:[%s8175_s12 + $0x64] ss:$8 sps:$4 sm:$0xff]  }
 0x32c   : > { %v1881_v25 = vadd.f32 %v1880_v7, %v7044_v33  ;;  %v1882_v58 = vpop.f32.mrb[119].mxu0  ;;  %2326 = vmatmul.mubr.bf16.gmra.mrb[112].mxu1 %v1961_v56 }
 0x32d   : > { %v1883_v61 = vadd.f32 %v1882_v58, %v7048_v36 }
 0x32e   : > { %v1931_v59 = vpack.c.bf16 %v1881_v25, %v1877_v57 }
 0x32f   : > { %v1932_v62 = vpack.c.bf16 %v1883_v61, %v1879_v60  ;;  %v6041_v60 = vld [vmem:[%s8175_s12 + $0x60] ss:$8 sps:$4 sm:$0xff]  }
 0x330   : > { %v1963_v8 = vmax.bf16 %v6191_v2, %v1931_v59 }
 0x331   : > { %v1886_v1 = vpop.f32.mrb[120].mxu0  ;;  %v1964_v5 = vmax.bf16 %v6191_v2, %v1932_v62 }
 0x332   : > { %v1888_v6 = vpop.f32.mrb[121].mxu0  ;;  %v1887_v11 = vadd.f32 %v1886_v1, %v7044_v33  ;;  %v6046_v1 = vld [vmem:[%s8175_s12 + $0x74] ss:$8 sps:$4 sm:$0xff]  }
 0x333   : > { %v1890_v9 = vpop.f32.mrb[122].mxu0  ;;  %2335 = vmatprep.mubr.bf16.mxu1 %v1964_v5  ;;  %v1889_v14 = vadd.f32 %v1888_v6, %v7048_v36 }
 0x334   : > { %v1891_v28 = vadd.f32 %v1890_v9, %v7044_v33  ;;  %v1892_v12 = vpop.f32.mrb[123].mxu0  ;;  %2336 = vmatmul.mubr.bf16.gmra.mrb[116].mxu1 %v1963_v8 }
 0x335   : > { %v1893_v15 = vadd.f32 %v1892_v12, %v7048_v36 }
 0x336   : > { %v1933_v10 = vpack.c.bf16 %v1891_v28, %v1887_v11  ;;  %v6044_v11 = vld [vmem:[%s8175_s12 + $0x70] ss:$8 sps:$4 sm:$0xff]   ;;  %v6049_v28 = vld [vmem:[%s8175_s12 + $0x84] ss:$8 sps:$4 sm:$0xff]  }
 0x337   : > { %v1934_v63 = vpack.c.bf16 %v1893_v15, %v1889_v14 }
 0x338   : > { %v1965_v0 = vmax.bf16 %v6191_v2, %v1933_v10 }
 0x339   : > { %v1896_v16 = vpop.f32.mrb[124].mxu0  ;;  %v1966_v3 = vmax.bf16 %v6191_v2, %v1934_v63 }
 0x33a   : > { %v1898_v18 = vpop.f32.mrb[125].mxu0  ;;  %v1897_v20 = vadd.f32 %v1896_v16, %v7044_v33  ;;  %v6047_v16 = vld [vmem:[%s8175_s12 + $0x80] ss:$8 sps:$4 sm:$0xff]  }
 0x33b   : > { %v1900_v19 = vpop.f32.mrb[126].mxu0  ;;  %2345 = vmatprep.mubr.bf16.mxu1 %v1966_v3  ;;  %v1899_v22 = vadd.f32 %v1898_v18, %v7048_v36 }
 0x33c   : > { %v1901_v32 = vadd.f32 %v1900_v19, %v7044_v33  ;;  %v1902_v21 = vpop.f32.mrb[127].mxu0  ;;  %2346 = vmatmul.mubr.bf16.gmra.mrb[120].mxu1 %v1965_v0  ;;  %v6025_v33 = vld [vmem:[%s8175_s12 + $0x4] ss:$8 sps:$4 sm:$0xff]   ;;  %v6052_v19 = vld [vmem:[%s8175_s12 + $0x94] ss:$8 sps:$4 sm:$0xff]  }
 0x33d   : > { %v1903_v24 = vadd.f32 %v1902_v21, %v7048_v36  ;;  %3448 = vmatprep.subr.bf16.mxu1 %v6025_v33  ;;  %v6026_v36 = vld [vmem:[%s8175_s12 + $0x10] ss:$8 sps:$4 sm:$0xff]  }
 0x33e   : > { %v1935_v26 = vpack.c.bf16 %v1901_v32, %v1897_v20  ;;  %3449 = vmatpush1.bf16.msra.mxu1 %v6023_v27 }
 0x33f   : > { %v1936_v23 = vpack.c.bf16 %v1903_v24, %v1899_v22  ;;  %3450 = vmatprep.subr.bf16.mxu1 %v6028_v29  ;;  %v6050_v24 = vld [vmem:[%s8175_s12 + $0x90] ss:$8 sps:$4 sm:$0xff]  }
 0x340   : > { %v1967_v38 = vmax.bf16 %v6191_v2, %v1935_v26  ;;  %v6055_v26 = vld [vmem:[%s8175_s12 + $0xa4] ss:$8 sps:$4 sm:$0xff]  }
 0x341   : > { %v1968_v30 = vmax.bf16 %v6191_v2, %v1936_v23 }
 0x342   : > { %3451 = vmatpush1.bf16.msra.mxu1 %v6026_v36  ;;  %v6053_v36 = vld [vmem:[%s8175_s12 + $0xa0] ss:$8 sps:$4 sm:$0xff]  }
 0x343   : > { %2355 = vmatprep.mubr.bf16.mxu1 %v1968_v30  ;;  %3452 = vmatprep.subr.bf16.mxu1 %v6031_v45 }
 0x344   : > { %2356 = vmatmul.mubr.bf16.gmra.mrb[124].mxu1 %v1967_v38 }
 0x346   : > { %3453 = vmatpush1.bf16.msra.mxu1 %v6029_v13 }
 0x347   : > { %3454 = vmatprep.subr.bf16.mxu1 %v6034_v35 }
 0x34a   : > { %3455 = vmatpush1.bf16.msra.mxu1 %v6032_v34 }
 0x34b   : > { %3456 = vmatprep.subr.bf16.mxu1 %v6037_v44 }
 0x34e   : > { %3457 = vmatpush1.bf16.msra.mxu1 %v6035_v17 }
 0x34f   : > { %3458 = vmatprep.subr.bf16.mxu1 %v6040_v50 }
 0x352   : > { %3459 = vmatpush1.bf16.msra.mxu1 %v6038_v51  ;;  %v6064_v51 = vld [vmem:[%s8175_s12 + $0xd4] ss:$8 sps:$4 sm:$0xff]  }
 0x353   : > { %3460 = vmatprep.subr.bf16.mxu1 %v6043_v54 }
 0x356   : > { %3461 = vmatpush1.bf16.msra.mxu1 %v6041_v60 }
 0x357   : > { %3462 = vmatprep.subr.bf16.mxu1 %v6046_v1 }
 0x35a   : > { %3463 = vmatpush1.bf16.msra.mxu1 %v6044_v11 }
 0x35b   : > { %3464 = vmatprep.subr.bf16.mxu1 %v6049_v28 }
 0x35e   : > { %3465 = vmatpush1.bf16.msra.mxu1 %v6047_v16 }
 0x35f   : > { %3466 = vmatprep.subr.bf16.mxu1 %v6052_v19 }
 0x362   : > { %3467 = vmatpush1.bf16.msra.mxu1 %v6050_v24 }
 0x363   : > { %3468 = vmatprep.subr.bf16.mxu1 %v6055_v26 }
 0x366   : > { %3469 = vmatpush1.bf16.msra.mxu1 %v6053_v36 }
 0x367   : > { %3470 = vmatprep.subr.bf16.mxu1 %v6058_v31 }
 0x39f   : > { %v2207_v4 = vpop.f32.mrb[64].mxu1 }
 0x3a0   : > { %v2209_v40 = vpop.f32.mrb[65].mxu1  ;;  %v2208_v42 = vadd.f32 %v2207_v4, %v7268_v37 }
 0x3a1   : > { %v2211_v41 = vpop.f32.mrb[66].mxu1  ;;  %v2210_v47 = vadd.f32 %v2209_v40, %v7271_v39 }
 0x3a2   : > { %v2212_v43 = vadd.f32 %v2211_v41, %v7268_v37  ;;  %v2213_v52 = vpop.f32.mrb[67].mxu1  ;;  %v6056_v41 = vld [vmem:[%s8175_s12 + $0xb0] ss:$8 sps:$4 sm:$0xff]  }
 0x3a3   : > { %v2214_v49 = vadd.f32 %v2213_v52, %v7271_v39  ;;  %3471 = vmatpush1.bf16.msra.mxu1 %v6056_v41 }
 0x3a4   : > { %v2366_v53 = vpack.c.bf16 %v2212_v43, %v2208_v42  ;;  %v6061_v42 = vld [vmem:[%s8175_s12 + $0xc4] ss:$8 sps:$4 sm:$0xff]  }
 0x3a5   : > { %v2367_v55 = vpack.c.bf16 %v2214_v49, %v2210_v47  ;;  %v6059_v49 = vld [vmem:[%s8175_s12 + $0xc0] ss:$8 sps:$4 sm:$0xff]   ;;  %3472 = vmatprep.subr.bf16.mxu1 %v6061_v42 }
 0x3a6   : > { %v2398_v57 = vmax.bf16 %v6191_v2, %v2366_v53 }
 0x3a7   : > { %v2217_v56 = vpop.f32.mrb[68].mxu1  ;;  %v2399_v7 = vmax.bf16 %v6191_v2, %v2367_v55  ;;  %3473 = vmatpush1.bf16.msra.mxu1 %v6059_v49 }
 0x3a8   : > { %v2219_v25 = vpop.f32.mrb[69].mxu1  ;;  %v2218_v61 = vadd.f32 %v2217_v56, %v7268_v37  ;;  %3474 = vmatprep.subr.bf16.mxu1 %v6064_v51 }
 0x3a9   : > { %v2221_v58 = vpop.f32.mrb[70].mxu1  ;;  %2943 = vmatprep.mubr.bf16.mxu0 %v2399_v7  ;;  %v2220_v5 = vadd.f32 %v2219_v25, %v7271_v39  ;;  %v6062_v25 = vld [vmem:[%s8175_s12 + $0xd0] ss:$8 sps:$4 sm:$0xff]  }
 0x3aa   : > { %v2222_v59 = vadd.f32 %v2221_v58, %v7268_v37  ;;  %v2223_v62 = vpop.f32.mrb[71].mxu1  ;;  %2944 = vmatmul.mubr.bf16.vlgmr.msra.gmra.mrb[128].mxu0 %v2398_v57  ;;  %v6067_v58 = vld [vmem:[%s8175_s12 + $0xe4] ss:$8 sps:$4 sm:$0xff]  }
 0x3ab   : > { %v2224_v6 = vadd.f32 %v2223_v62, %v7271_v39  ;;  %3475 = vmatpush1.bf16.msra.mxu1 %v6062_v25 }
 0x3ac   : > { %v2368_v8 = vpack.c.bf16 %v2222_v59, %v2218_v61  ;;  %3476 = vmatprep.subr.bf16.mxu1 %v6067_v58 }
 0x3ad   : > { %v2369_v9 = vpack.c.bf16 %v2224_v6, %v2220_v5  ;;  %v6065_v5 = vld [vmem:[%s8175_s12 + $0xe0] ss:$8 sps:$4 sm:$0xff]  }
 0x3ae   : > { %v2400_v10 = vmax.bf16 %v6191_v2, %v2368_v8 }
 0x3af   : > { %v2227_v12 = vpop.f32.mrb[72].mxu1  ;;  %v2401_v14 = vmax.bf16 %v6191_v2, %v2369_v9  ;;  %3477 = vmatpush1.bf16.msra.mxu1 %v6065_v5 }
 0x3b0   : > { %v2229_v15 = vpop.f32.mrb[73].mxu1  ;;  %v2228_v3 = vadd.f32 %v2227_v12, %v7268_v37 }
 0x3b1   : > { %v2231_v63 = vpop.f32.mrb[74].mxu1  ;;  %2953 = vmatprep.mubr.bf16.mxu0 %v2401_v14  ;;  %v2230_v20 = vadd.f32 %v2229_v15, %v7271_v39 }
 0x3b2   : > { %v2232_v18 = vadd.f32 %v2231_v63, %v7268_v37  ;;  %v2233_v0 = vpop.f32.mrb[75].mxu1  ;;  %2954 = vmatmul.mubr.bf16.gmra.mrb[132].mxu0 %v2400_v10 }
 0x3b3   : > { %v2234_v32 = vadd.f32 %v2233_v0, %v7271_v39 }
 0x3b4   : > { %v2370_v21 = vpack.c.bf16 %v2232_v18, %v2228_v3 }
 0x3b5   : > { %v2371_v22 = vpack.c.bf16 %v2234_v32, %v2230_v20 }
 0x3b6   : > { %v2402_v27 = vmax.bf16 %v6191_v2, %v2370_v21 }
 0x3b7   : > { %v2237_v23 = vpop.f32.mrb[76].mxu1  ;;  %v2403_v30 = vmax.bf16 %v6191_v2, %v2371_v22 }
 0x3b8   : > { %v2239_v38 = vpop.f32.mrb[77].mxu1  ;;  %v2238_v29 = vadd.f32 %v2237_v23, %v7268_v37 }
 0x3b9   : > { %v2241_v33 = vpop.f32.mrb[78].mxu1  ;;  %2963 = vmatprep.mubr.bf16.mxu0 %v2403_v30  ;;  %v2240_v34 = vadd.f32 %v2239_v38, %v7271_v39 }
 0x3ba   : > { %v2242_v13 = vadd.f32 %v2241_v33, %v7268_v37  ;;  %v2243_v45 = vpop.f32.mrb[79].mxu1  ;;  %2964 = vmatmul.mubr.bf16.gmra.mrb[136].mxu0 %v2402_v27 }
 0x3bb   : > { %v2244_v35 = vadd.f32 %v2243_v45, %v7271_v39 }
 0x3bc   : > { %v2372_v4 = vpack.c.bf16 %v2242_v13, %v2238_v29 }
 0x3bd   : > { %v2373_v40 = vpack.c.bf16 %v2244_v35, %v2240_v34 }
 0x3be   : > { %v2404_v44 = vmax.bf16 %v6191_v2, %v2372_v4 }
 0x3bf   : > { %v2247_v43 = vpop.f32.mrb[80].mxu1  ;;  %v2405_v52 = vmax.bf16 %v6191_v2, %v2373_v40 }
 0x3c0   : > { %v2249_v17 = vpop.f32.mrb[81].mxu1  ;;  %v2248_v50 = vadd.f32 %v2247_v43, %v7268_v37 }
 0x3c1   : > { %v2251_v47 = vpop.f32.mrb[82].mxu1  ;;  %2973 = vmatprep.mubr.bf16.mxu0 %v2405_v52  ;;  %v2250_v54 = vadd.f32 %v2249_v17, %v7271_v39 }
 0x3c2   : > { %v2252_v53 = vadd.f32 %v2251_v47, %v7268_v37  ;;  %v2253_v55 = vpop.f32.mrb[83].mxu1  ;;  %2974 = vmatmul.mubr.bf16.gmra.mrb[140].mxu0 %v2404_v44 }
 0x3c3   : > { %v2254_v56 = vadd.f32 %v2253_v55, %v7271_v39 }
 0x3c4   : > { %v2374_v7 = vpack.c.bf16 %v2252_v53, %v2248_v50 }
 0x3c5   : > { %v2375_v57 = vpack.c.bf16 %v2254_v56, %v2250_v54 }
 0x3c6   : > { %v2406_v62 = vmax.bf16 %v6191_v2, %v2374_v7 }
 0x3c7   : > { %v2257_v60 = vpop.f32.mrb[84].mxu1  ;;  %v2407_v61 = vmax.bf16 %v6191_v2, %v2375_v57 }
 0x3c8   : > { %v2259_v59 = vpop.f32.mrb[85].mxu1  ;;  %v2258_v6 = vadd.f32 %v2257_v60, %v7268_v37 }
 0x3c9   : > { %v2261_v1 = vpop.f32.mrb[86].mxu1  ;;  %2983 = vmatprep.mubr.bf16.mxu0 %v2407_v61  ;;  %v2260_v11 = vadd.f32 %v2259_v59, %v7271_v39 }
 0x3ca   : > { %v2262_v8 = vadd.f32 %v2261_v1, %v7268_v37  ;;  %v2263_v9 = vpop.f32.mrb[87].mxu1  ;;  %2984 = vmatmul.mubr.bf16.gmra.mrb[144].mxu0 %v2406_v62 }
 0x3cb   : > { %v2264_v28 = vadd.f32 %v2263_v9, %v7271_v39 }
 0x3cc   : > { %v2376_v12 = vpack.c.bf16 %v2262_v8, %v2258_v6 }
 0x3cd   : > { %v2377_v14 = vpack.c.bf16 %v2264_v28, %v2260_v11 }
 0x3ce   : > { %v2408_v16 = vmax.bf16 %v6191_v2, %v2376_v12 }
 0x3cf   : > { %v2267_v15 = vpop.f32.mrb[88].mxu1  ;;  %v2409_v10 = vmax.bf16 %v6191_v2, %v2377_v14 }
 0x3d0   : > { %v2269_v63 = vpop.f32.mrb[89].mxu1  ;;  %v2268_v18 = vadd.f32 %v2267_v15, %v7268_v37 }
 0x3d1   : > { %v2271_v3 = vpop.f32.mrb[90].mxu1  ;;  %2993 = vmatprep.mubr.bf16.mxu0 %v2409_v10  ;;  %v2270_v20 = vadd.f32 %v2269_v63, %v7271_v39 }
 0x3d2   : > { %v2272_v0 = vadd.f32 %v2271_v3, %v7268_v37  ;;  %v2273_v19 = vpop.f32.mrb[91].mxu1  ;;  %2994 = vmatmul.mubr.bf16.gmra.mrb[148].mxu0 %v2408_v16 }
 0x3d3   : > { %v2274_v32 = vadd.f32 %v2273_v19, %v7271_v39 }
 0x3d4   : > { %v2378_v21 = vpack.c.bf16 %v2272_v0, %v2268_v18 }
 0x3d5   : > { %v2379_v22 = vpack.c.bf16 %v2274_v32, %v2270_v20 }
 0x3d6   : > { %v2410_v30 = vmax.bf16 %v6191_v2, %v2378_v21 }
 0x3d7   : > { %v2277_v24 = vpop.f32.mrb[92].mxu1  ;;  %v2411_v26 = vmax.bf16 %v6191_v2, %v2379_v22 }
 0x3d8   : > { %v2279_v23 = vpop.f32.mrb[93].mxu1  ;;  %v2278_v27 = vadd.f32 %v2277_v24, %v7268_v37 }
 0x3d9   : > { %v2281_v38 = vpop.f32.mrb[94].mxu1  ;;  %3003 = vmatprep.mubr.bf16.mxu0 %v2411_v26  ;;  %v2280_v29 = vadd.f32 %v2279_v23, %v7271_v39 }
 0x3da   : > { %v2282_v33 = vadd.f32 %v2281_v38, %v7268_v37  ;;  %v2283_v36 = vpop.f32.mrb[95].mxu1  ;;  %3004 = vmatmul.mubr.bf16.gmra.mrb[152].mxu0 %v2410_v30 }
 0x3db   : > { %v2284_v13 = vadd.f32 %v2283_v36, %v7271_v39 }
 0x3dc   : > { %v2380_v45 = vpack.c.bf16 %v2282_v33, %v2278_v27 }
 0x3dd   : > { %v2381_v31 = vpack.c.bf16 %v2284_v13, %v2280_v29  ;;  %v6070_v13 = vld [vmem:[%s8175_s12 + $0xf4] ss:$8 sps:$4 sm:$0xff]  }
 0x3de   : > { %v2412_v40 = vmax.bf16 %v6191_v2, %v2380_v45  ;;  %3478 = vmatprep.subr.bf16.mxu1 %v6070_v13 }
 0x3df   : > { %v2287_v34 = vpop.f32.mrb[96].mxu1  ;;  %v2413_v35 = vmax.bf16 %v6191_v2, %v2381_v31 }
 0x3e0   : > { %v2289_v4 = vpop.f32.mrb[97].mxu1  ;;  %v2288_v42 = vadd.f32 %v2287_v34, %v7268_v37  ;;  %v6068_v34 = vld [vmem:[%s8175_s12 + $0xf0] ss:$8 sps:$4 sm:$0xff]  }
 0x3e1   : > { %v2291_v41 = vpop.f32.mrb[98].mxu1  ;;  %3013 = vmatprep.mubr.bf16.mxu0 %v2413_v35  ;;  %v2290_v17 = vadd.f32 %v2289_v4, %v7271_v39  ;;  %3479 = vmatpush1.bf16.msra.mxu1 %v6068_v34 }
 0x3e2   : > { %v2292_v43 = vadd.f32 %v2291_v41, %v7268_v37  ;;  %v2293_v52 = vpop.f32.mrb[99].mxu1  ;;  %3014 = vmatmul.mubr.bf16.gmra.mrb[156].mxu0 %v2412_v40 }
 0x3e3   : > { %v2294_v44 = vadd.f32 %v2293_v52, %v7271_v39 }
 0x3e4   : > { %v2382_v47 = vpack.c.bf16 %v2292_v43, %v2288_v42 }
 0x3e5   : > { %v2383_v49 = vpack.c.bf16 %v2294_v44, %v2290_v17 }
 0x3e6   : > { %v2414_v51 = vmax.bf16 %v6191_v2, %v2382_v47 }
 0x3e7   : > { %v2297_v50 = vpop.f32.mrb[100].mxu1  ;;  %v2415_v53 = vmax.bf16 %v6191_v2, %v2383_v49 }
 0x3e8   : > { %v2299_v55 = vpop.f32.mrb[101].mxu1  ;;  %v2298_v56 = vadd.f32 %v2297_v50, %v7268_v37 }
 0x3e9   : > { %v2301_v54 = vpop.f32.mrb[102].mxu1  ;;  %3023 = vmatprep.mubr.bf16.mxu0 %v2415_v53  ;;  %v2300_v25 = vadd.f32 %v2299_v55, %v7271_v39 }
 0x3ea   : > { %v2302_v7 = vadd.f32 %v2301_v54, %v7268_v37  ;;  %v2303_v57 = vpop.f32.mrb[103].mxu1  ;;  %3024 = vmatmul.mubr.bf16.gmra.mrb[160].mxu0 %v2414_v51 }
 0x3eb   : > { %v2304_v58 = vadd.f32 %v2303_v57, %v7271_v39 }
 0x3ec   : > { %v2384_v60 = vpack.c.bf16 %v2302_v7, %v2298_v56 }
 0x3ed   : > { %v2385_v61 = vpack.c.bf16 %v2304_v58, %v2300_v25 }
 0x3ee   : > { %v2416_v5 = vmax.bf16 %v6191_v2, %v2384_v60 }
 0x3ef   : > { %v2307_v59 = vpop.f32.mrb[104].mxu1  ;;  %v2417_v62 = vmax.bf16 %v6191_v2, %v2385_v61 }
 0x3f0   : > { %v2309_v1 = vpop.f32.mrb[105].mxu1  ;;  %v2308_v8 = vadd.f32 %v2307_v59, %v7268_v37 }
 0x3f1   : > { %v2311_v6 = vpop.f32.mrb[106].mxu1  ;;  %3033 = vmatprep.mubr.bf16.mxu0 %v2417_v62  ;;  %v2310_v28 = vadd.f32 %v2309_v1, %v7271_v39 }
 0x3f2   : > { %v2312_v9 = vadd.f32 %v2311_v6, %v7268_v37  ;;  %v2313_v11 = vpop.f32.mrb[107].mxu1  ;;  %3034 = vmatmul.mubr.bf16.gmra.mrb[164].mxu0 %v2416_v5 }
 0x3f3   : > { %v2314_v12 = vadd.f32 %v2313_v11, %v7271_v39 }
 0x3f4   : > { %v2386_v14 = vpack.c.bf16 %v2312_v9, %v2308_v8 }
 0x3f5   : > { %v2387_v15 = vpack.c.bf16 %v2314_v12, %v2310_v28 }
 0x3f6   : > { %v2418_v3 = vmax.bf16 %v6191_v2, %v2386_v14 }
 0x3f7   : > { %v2317_v10 = vpop.f32.mrb[108].mxu1  ;;  %v2419_v63 = vmax.bf16 %v6191_v2, %v2387_v15 }
 0x3f8   : > { %v2319_v16 = vpop.f32.mrb[109].mxu1  ;;  %v2318_v0 = vadd.f32 %v2317_v10, %v7268_v37 }
 0x3f9   : > { %v2321_v18 = vpop.f32.mrb[110].mxu1  ;;  %3043 = vmatprep.mubr.bf16.mxu0 %v2419_v63  ;;  %v2320_v32 = vadd.f32 %v2319_v16, %v7271_v39 }
 0x3fa   : > { %v2322_v19 = vadd.f32 %v2321_v18, %v7268_v37  ;;  %v2323_v20 = vpop.f32.mrb[111].mxu1  ;;  %3044 = vmatmul.mubr.bf16.gmra.mrb[168].mxu0 %v2418_v3 }
 0x3fb   : > { %v2324_v21 = vadd.f32 %v2323_v20, %v7271_v39 }
 0x3fc   : > { %v2388_v22 = vpack.c.bf16 %v2322_v19, %v2318_v0  ;;  %v6073_v0 = vld [vmem:[%s8177_s14 + $0x4] ss:$8 sps:$4 sm:$0xff]  }
 0x3fd   : > { %v2389_v24 = vpack.c.bf16 %v2324_v21, %v2320_v32  ;;  %3909 = vmatprep.subr.bf16.mxu1 %v6073_v0 }
 0x3fe   : > { %v2420_v38 = vmax.bf16 %v6191_v2, %v2388_v22 }
 0x3ff   : > { %v2327_v26 = vpop.f32.mrb[112].mxu1  ;;  %v2421_v23 = vmax.bf16 %v6191_v2, %v2389_v24 }
 0x400   : > { %v2329_v30 = vpop.f32.mrb[113].mxu1  ;;  %v2328_v33 = vadd.f32 %v2327_v26, %v7268_v37 }
 0x401   : > { %v2331_v27 = vpop.f32.mrb[114].mxu1  ;;  %3053 = vmatprep.mubr.bf16.mxu0 %v2421_v23  ;;  %v2330_v45 = vadd.f32 %v2329_v30, %v7271_v39 }
 0x402   : > { %v2332_v36 = vadd.f32 %v2331_v27, %v7268_v37  ;;  %v2333_v29 = vpop.f32.mrb[115].mxu1  ;;  %3054 = vmatmul.mubr.bf16.gmra.mrb[172].mxu0 %v2420_v38 }
 0x403   : > { %v2334_v31 = vadd.f32 %v2333_v29, %v7271_v39  ;;  %v6071_v29 = vld [vmem:[%s8177_s14] ss:$8 sps:$4 sm:$0xff]  }
 0x404   : > { %v2390_v35 = vpack.c.bf16 %v2332_v36, %v2328_v33 }
 0x405   : > { %v2391_v4 = vpack.c.bf16 %v2334_v31, %v2330_v45  ;;  %v6076_v31 = vld [vmem:[%s8177_s14 + $0x14] ss:$8 sps:$4 sm:$0xff]  }
 0x406   : > { %v2422_v43 = vmax.bf16 %v6191_v2, %v2390_v35 }
 0x407   : > { %v2337_v40 = vpop.f32.mrb[116].mxu1  ;;  %v2423_v41 = vmax.bf16 %v6191_v2, %v2391_v4 }
 0x408   : > { %v2339_v42 = vpop.f32.mrb[117].mxu1  ;;  %v2338_v17 = vadd.f32 %v2337_v40, %v7268_v37 }
 0x409   : > { %v2341_v52 = vpop.f32.mrb[118].mxu1  ;;  %3063 = vmatprep.mubr.bf16.mxu0 %v2423_v41  ;;  %v2340_v49 = vadd.f32 %v2339_v42, %v7271_v39 }
 0x40a   : > { %v2342_v44 = vadd.f32 %v2341_v52, %v7268_v37  ;;  %v2343_v47 = vpop.f32.mrb[119].mxu1  ;;  %3064 = vmatmul.mubr.bf16.gmra.mrb[176].mxu0 %v2422_v43  ;;  %v6074_v43 = vld [vmem:[%s8177_s14 + $0x10] ss:$8 sps:$4 sm:$0xff]  }
 0x40b   : > { %v2344_v50 = vadd.f32 %v2343_v47, %v7271_v39 }
 0x40c   : > { %v2392_v53 = vpack.c.bf16 %v2342_v44, %v2338_v17  ;;  %v6079_v17 = vld [vmem:[%s8177_s14 + $0x24] ss:$8 sps:$4 sm:$0xff]  }
 0x40d   : > { %v2393_v55 = vpack.c.bf16 %v2344_v50, %v2340_v49  ;;  %v6077_v50 = vld [vmem:[%s8177_s14 + $0x20] ss:$8 sps:$4 sm:$0xff]  }
 0x40e   : > { %v2424_v7 = vmax.bf16 %v6191_v2, %v2392_v53 }
 0x40f   : > { %v2347_v51 = vpop.f32.mrb[120].mxu1  ;;  %v2425_v54 = vmax.bf16 %v6191_v2, %v2393_v55 }
 0x410   : > { %v2349_v56 = vpop.f32.mrb[121].mxu1  ;;  %v2348_v25 = vadd.f32 %v2347_v51, %v7268_v37  ;;  %v6082_v51 = vld [vmem:[%s8177_s14 + $0x34] ss:$8 sps:$4 sm:$0xff]  }
 0x411   : > { %v2351_v57 = vpop.f32.mrb[122].mxu1  ;;  %3073 = vmatprep.mubr.bf16.mxu0 %v2425_v54  ;;  %v2350_v61 = vadd.f32 %v2349_v56, %v7271_v39 }
 0x412   : > { %v2352_v58 = vadd.f32 %v2351_v57, %v7268_v37  ;;  %v2353_v60 = vpop.f32.mrb[123].mxu1  ;;  %3074 = vmatmul.mubr.bf16.gmra.mrb[180].mxu0 %v2424_v7 }
 0x413   : > { %v2354_v59 = vadd.f32 %v2353_v60, %v7271_v39  ;;  %v6080_v60 = vld [vmem:[%s8177_s14 + $0x30] ss:$8 sps:$4 sm:$0xff]  }
 0x414   : > { %v2394_v62 = vpack.c.bf16 %v2352_v58, %v2348_v25 }
 0x415   : > { %v2395_v1 = vpack.c.bf16 %v2354_v59, %v2350_v61  ;;  %v6085_v59 = vld [vmem:[%s8177_s14 + $0x44] ss:$8 sps:$4 sm:$0xff]  }
 0x416   : > { %v2426_v9 = vmax.bf16 %v6191_v2, %v2394_v62 }
 0x417   : > { %v2357_v5 = vpop.f32.mrb[124].mxu1  ;;  %v2427_v6 = vmax.bf16 %v6191_v2, %v2395_v1 }
 0x418   : > { %v2359_v8 = vpop.f32.mrb[125].mxu1  ;;  %v2358_v28 = vadd.f32 %v2357_v5, %v7268_v37 }
 0x419   : > { %v2361_v11 = vpop.f32.mrb[126].mxu1  ;;  %3083 = vmatprep.mubr.bf16.mxu0 %v2427_v6  ;;  %v2360_v15 = vadd.f32 %v2359_v8, %v7271_v39  ;;  %v6083_v6 = vld [vmem:[%s8177_s14 + $0x40] ss:$8 sps:$4 sm:$0xff]  }
 0x41a   : > { %v2362_v12 = vadd.f32 %v2361_v11, %v7268_v37  ;;  %v2363_v14 = vpop.f32.mrb[127].mxu1  ;;  %3084 = vmatmul.mubr.bf16.gmra.mrb[184].mxu0 %v2426_v9  ;;  %v3104_v37 = vld [vmem:[%s8174_s11] sm:$0x3]  ;;  %v6088_v11 = vld [vmem:[%s8177_s14 + $0x54] ss:$8 sps:$4 sm:$0xff]  }
 0x41b   : > { %v2364_v10 = vadd.f32 %v2363_v14, %v7271_v39  ;;  %v7448_v19 = vrot.slane %v3104_v37, %v6571_v46  ;;  %v7451_v20 = vrot.slane %v3104_v37, %v6576_v48 }
 0x41c   : > { %v2396_v63 = vpack.c.bf16 %v2362_v12, %v2358_v28 }
 0x41d   : > { %v2397_v16 = vpack.c.bf16 %v2364_v10, %v2360_v15 }
 0x41e   : > { %v2428_v18 = vmax.bf16 %v6191_v2, %v2396_v63 }
 0x41f   : > { %v2429_v3 = vmax.bf16 %v6191_v2, %v2397_v16  ;;  %v6086_v16 = vld [vmem:[%s8177_s14 + $0x50] ss:$8 sps:$4 sm:$0xff]  }
 0x421   : > { %3093 = vmatprep.mubr.bf16.mxu0 %v2429_v3 }
 0x422   : > { %3094 = vmatmul.mubr.bf16.gmra.mrb[188].mxu0 %v2428_v18  ;;  %v6091_v18 = vld [vmem:[%s8177_s14 + $0x64] ss:$8 sps:$4 sm:$0xff]  }
 0x47d   : > { %v2945_v39 = vpop.f32.mrb[128].mxu0 }
 0x47e   : > { %v2947_v32 = vpop.f32.mrb[129].mxu0  ;;  %v3116_v22 = vadd.f32 %v7448_v19, %v2945_v39 }
 0x47f   : > { %v2949_v21 = vpop.f32.mrb[130].mxu0  ;;  %v3117_v23 = vadd.f32 %v7451_v20, %v2947_v32  ;;  %v6089_v32 = vld [vmem:[%s8177_s14 + $0x60] ss:$8 sps:$4 sm:$0xff]  }
 0x480   : > { %v3118_v24 = vadd.f32 %v7448_v19, %v2949_v21  ;;  %v2951_v26 = vpop.f32.mrb[131].mxu0 }
 0x481   : > { %v3119_v30 = vadd.f32 %v7451_v20, %v2951_v26 }
 0x482   : > { %v3180_v38 = vpack.c.bf16 %v3118_v24, %v3116_v22  ;;  %v6094_v24 = vld [vmem:[%s8177_s14 + $0x74] ss:$8 sps:$4 sm:$0xff]  }
 0x483   : > { %v3181_v27 = vpack.c.bf16 %v3119_v30, %v3117_v23 }
 0x484   : > { %v3212_v13 = vmax.bf16 %v6191_v2, %v3180_v38 }
 0x485   : > { %v2955_v33 = vpop.f32.mrb[132].mxu0  ;;  %v3213_v36 = vmax.bf16 %v6191_v2, %v3181_v27 }
 0x486   : > { %v2957_v45 = vpop.f32.mrb[133].mxu0  ;;  %v3120_v35 = vadd.f32 %v7448_v19, %v2955_v33 }
 0x487   : > { %v2959_v34 = vpop.f32.mrb[134].mxu0  ;;  %3480 = vmatprep.mubr.bf16.mxu1 %v3213_v36  ;;  %v3121_v41 = vadd.f32 %v7451_v20, %v2957_v45  ;;  %v6092_v36 = vld [vmem:[%s8177_s14 + $0x70] ss:$8 sps:$4 sm:$0xff]  }
 0x488   : > { %v3122_v4 = vadd.f32 %v7448_v19, %v2959_v34  ;;  %v2961_v40 = vpop.f32.mrb[135].mxu0  ;;  %3481 = vmatmul.mubr.bf16.vlgmr.msra.gmra.mrb[128].mxu1 %v3212_v13  ;;  %v6097_v13 = vld [vmem:[%s8177_s14 + $0x84] ss:$8 sps:$4 sm:$0xff]  }
 0x489   : > { %v3123_v42 = vadd.f32 %v7451_v20, %v2961_v40  ;;  %3910 = vmatpush1.bf16.msra.mxu1 %v6071_v29 }
 0x48a   : > { %v3182_v52 = vpack.c.bf16 %v3122_v4, %v3120_v35  ;;  %3911 = vmatprep.subr.bf16.mxu1 %v6076_v31  ;;  %v6095_v35 = vld [vmem:[%s8177_s14 + $0x80] ss:$8 sps:$4 sm:$0xff]  }
 0x48b   : > { %v3183_v44 = vpack.c.bf16 %v3123_v42, %v3121_v41  ;;  %v6100_v41 = vld [vmem:[%s8177_s14 + $0x94] ss:$8 sps:$4 sm:$0xff]  }
 0x48c   : > { %v3214_v55 = vmax.bf16 %v6191_v2, %v3182_v52 }
 0x48d   : > { %v2965_v47 = vpop.f32.mrb[136].mxu0  ;;  %v3215_v49 = vmax.bf16 %v6191_v2, %v3183_v44  ;;  %3912 = vmatpush1.bf16.msra.mxu1 %v6074_v43 }
 0x48e   : > { %v2967_v53 = vpop.f32.mrb[137].mxu0  ;;  %3913 = vmatprep.subr.bf16.mxu1 %v6079_v17  ;;  %v3124_v56 = vadd.f32 %v7448_v19, %v2965_v47 }
 0x48f   : > { %v2969_v54 = vpop.f32.mrb[138].mxu0  ;;  %3490 = vmatprep.mubr.bf16.mxu1 %v3215_v49  ;;  %v3125_v25 = vadd.f32 %v7451_v20, %v2967_v53  ;;  %v6098_v49 = vld [vmem:[%s8177_s14 + $0x90] ss:$8 sps:$4 sm:$0xff]   ;;  %v6103_v53 = vld [vmem:[%s8177_s14 + $0xa4] ss:$8 sps:$4 sm:$0xff]  }
 0x490   : > { %v3126_v7 = vadd.f32 %v7448_v19, %v2969_v54  ;;  %v2971_v57 = vpop.f32.mrb[139].mxu0  ;;  %3491 = vmatmul.mubr.bf16.gmra.mrb[132].mxu1 %v3214_v55 }
 0x491   : > { %v3127_v58 = vadd.f32 %v7451_v20, %v2971_v57  ;;  %3914 = vmatpush1.bf16.msra.mxu1 %v6077_v50 }
 0x492   : > { %v3184_v61 = vpack.c.bf16 %v3126_v7, %v3124_v56  ;;  %3915 = vmatprep.subr.bf16.mxu1 %v6082_v51  ;;  %v6101_v56 = vld [vmem:[%s8177_s14 + $0xa0] ss:$8 sps:$4 sm:$0xff]  }
 0x493   : > { %v3185_v62 = vpack.c.bf16 %v3127_v58, %v3125_v25  ;;  %v6106_v25 = vld [vmem:[%s8177_s14 + $0xb4] ss:$8 sps:$4 sm:$0xff]  }
 0x494   : > { %v3216_v9 = vmax.bf16 %v6191_v2, %v3184_v61 }
 0x495   : > { %v2975_v1 = vpop.f32.mrb[140].mxu0  ;;  %v3217_v5 = vmax.bf16 %v6191_v2, %v3185_v62  ;;  %3916 = vmatpush1.bf16.msra.mxu1 %v6080_v60 }
 0x496   : > { %v2977_v8 = vpop.f32.mrb[141].mxu0  ;;  %3917 = vmatprep.subr.bf16.mxu1 %v6085_v59  ;;  %v3128_v12 = vadd.f32 %v7448_v19, %v2975_v1 }
 0x497   : > { %v2979_v28 = vpop.f32.mrb[142].mxu0  ;;  %3500 = vmatprep.mubr.bf16.mxu1 %v3217_v5  ;;  %v3129_v10 = vadd.f32 %v7451_v20, %v2977_v8  ;;  %v6104_v5 = vld [vmem:[%s8177_s14 + $0xb0] ss:$8 sps:$4 sm:$0xff]   ;;  %v6109_v8 = vld [vmem:[%s8177_s14 + $0xc4] ss:$8 sps:$4 sm:$0xff]  }
 0x498   : > { %v3130_v14 = vadd.f32 %v7448_v19, %v2979_v28  ;;  %v2981_v15 = vpop.f32.mrb[143].mxu0  ;;  %3501 = vmatmul.mubr.bf16.gmra.mrb[136].mxu1 %v3216_v9 }
 0x499   : > { %v3131_v63 = vadd.f32 %v7451_v20, %v2981_v15  ;;  %3918 = vmatpush1.bf16.msra.mxu1 %v6083_v6 }
 0x49a   : > { %v3186_v3 = vpack.c.bf16 %v3130_v14, %v3128_v12  ;;  %3919 = vmatprep.subr.bf16.mxu1 %v6088_v11  ;;  %v6107_v12 = vld [vmem:[%s8177_s14 + $0xc0] ss:$8 sps:$4 sm:$0xff]  }
 0x49b   : > { %v3187_v0 = vpack.c.bf16 %v3131_v63, %v3129_v10  ;;  %v6112_v10 = vld [vmem:[%s8177_s14 + $0xd4] ss:$8 sps:$4 sm:$0xff]  }
 0x49c   : > { %v3218_v22 = vmax.bf16 %v6191_v2, %v3186_v3 }
 0x49d   : > { %v2985_v37 = vpop.f32.mrb[144].mxu0  ;;  %v3219_v39 = vmax.bf16 %v6191_v2, %v3187_v0  ;;  %3920 = vmatpush1.bf16.msra.mxu1 %v6086_v16 }
 0x49e   : > { %v2987_v21 = vpop.f32.mrb[145].mxu0  ;;  %3921 = vmatprep.subr.bf16.mxu1 %v6091_v18  ;;  %v3132_v23 = vadd.f32 %v7448_v19, %v2985_v37 }
 0x49f   : > { %v2989_v26 = vpop.f32.mrb[146].mxu0  ;;  %3510 = vmatprep.mubr.bf16.mxu1 %v3219_v39  ;;  %v3133_v27 = vadd.f32 %v7451_v20, %v2987_v21  ;;  %v6110_v39 = vld [vmem:[%s8177_s14 + $0xd0] ss:$8 sps:$4 sm:$0xff]   ;;  %v6115_v21 = vld [vmem:[%s8177_s14 + $0xe4] ss:$8 sps:$4 sm:$0xff]  }
 0x4a0   : > { %v3134_v30 = vadd.f32 %v7448_v19, %v2989_v26  ;;  %v2991_v38 = vpop.f32.mrb[147].mxu0  ;;  %3511 = vmatmul.mubr.bf16.gmra.mrb[140].mxu1 %v3218_v22 }
 0x4a1   : > { %v3135_v33 = vadd.f32 %v7451_v20, %v2991_v38  ;;  %3922 = vmatpush1.bf16.msra.mxu1 %v6089_v32 }
 0x4a2   : > { %v3188_v29 = vpack.c.bf16 %v3134_v30, %v3132_v23  ;;  %3923 = vmatprep.subr.bf16.mxu1 %v6094_v24  ;;  %v6113_v23 = vld [vmem:[%s8177_s14 + $0xe0] ss:$8 sps:$4 sm:$0xff]  }
 0x4a3   : > { %v3189_v45 = vpack.c.bf16 %v3135_v33, %v3133_v27 }
 0x4a4   : > { %v3220_v40 = vmax.bf16 %v6191_v2, %v3188_v29 }
 0x4a5   : > { %v2995_v31 = vpop.f32.mrb[148].mxu0  ;;  %v3221_v34 = vmax.bf16 %v6191_v2, %v3189_v45  ;;  %3924 = vmatpush1.bf16.msra.mxu1 %v6092_v36 }
 0x4a6   : > { %v2997_v4 = vpop.f32.mrb[149].mxu0  ;;  %3925 = vmatprep.subr.bf16.mxu1 %v6097_v13  ;;  %v3136_v43 = vadd.f32 %v7448_v19, %v2995_v31 }
 0x4a7   : > { %v2999_v42 = vpop.f32.mrb[150].mxu0  ;;  %3520 = vmatprep.mubr.bf16.mxu1 %v3221_v34  ;;  %v3137_v44 = vadd.f32 %v7451_v20, %v2997_v4 }
 0x4a8   : > { %v3138_v52 = vadd.f32 %v7448_v19, %v2999_v42  ;;  %v3001_v17 = vpop.f32.mrb[151].mxu0  ;;  %3521 = vmatmul.mubr.bf16.gmra.mrb[144].mxu1 %v3220_v40 }
 0x4a9   : > { %v3139_v47 = vadd.f32 %v7451_v20, %v3001_v17  ;;  %3926 = vmatpush1.bf16.msra.mxu1 %v6095_v35 }
 0x4aa   : > { %v3190_v50 = vpack.c.bf16 %v3138_v52, %v3136_v43  ;;  %3927 = vmatprep.subr.bf16.mxu1 %v6100_v41 }
 0x4ab   : > { %v3191_v55 = vpack.c.bf16 %v3139_v47, %v3137_v44 }
 0x4ac   : > { %v3222_v57 = vmax.bf16 %v6191_v2, %v3190_v50 }
 0x4ad   : > { %v3005_v51 = vpop.f32.mrb[152].mxu0  ;;  %v3223_v54 = vmax.bf16 %v6191_v2, %v3191_v55  ;;  %3928 = vmatpush1.bf16.msra.mxu1 %v6098_v49 }
 0x4ae   : > { %v3007_v7 = vpop.f32.mrb[153].mxu0  ;;  %3929 = vmatprep.subr.bf16.mxu1 %v6103_v53  ;;  %v3140_v60 = vadd.f32 %v7448_v19, %v3005_v51 }
 0x4af   : > { %v3009_v58 = vpop.f32.mrb[154].mxu0  ;;  %3530 = vmatprep.mubr.bf16.mxu1 %v3223_v54  ;;  %v3141_v62 = vadd.f32 %v7451_v20, %v3007_v7 }
 0x4b0   : > { %v3142_v61 = vadd.f32 %v7448_v19, %v3009_v58  ;;  %v3011_v59 = vpop.f32.mrb[155].mxu0  ;;  %3531 = vmatmul.mubr.bf16.gmra.mrb[148].mxu1 %v3222_v57 }
 0x4b1   : > { %v3143_v1 = vadd.f32 %v7451_v20, %v3011_v59  ;;  %3930 = vmatpush1.bf16.msra.mxu1 %v6101_v56 }
 0x4b2   : > { %v3192_v6 = vpack.c.bf16 %v3142_v61, %v3140_v60  ;;  %3931 = vmatprep.subr.bf16.mxu1 %v6106_v25 }
 0x4b3   : > { %v3193_v9 = vpack.c.bf16 %v3143_v1, %v3141_v62 }
 0x4b4   : > { %v3224_v15 = vmax.bf16 %v6191_v2, %v3192_v6 }
 0x4b5   : > { %v3015_v11 = vpop.f32.mrb[156].mxu0  ;;  %v3225_v28 = vmax.bf16 %v6191_v2, %v3193_v9  ;;  %3932 = vmatpush1.bf16.msra.mxu1 %v6104_v5 }
 0x4b6   : > { %v3017_v14 = vpop.f32.mrb[157].mxu0  ;;  %3933 = vmatprep.subr.bf16.mxu1 %v6109_v8  ;;  %v3144_v16 = vadd.f32 %v7448_v19, %v3015_v11 }
 0x4b7   : > { %v3019_v63 = vpop.f32.mrb[158].mxu0  ;;  %3540 = vmatprep.mubr.bf16.mxu1 %v3225_v28  ;;  %v3145_v0 = vadd.f32 %v7451_v20, %v3017_v14 }
 0x4b8   : > { %v3146_v3 = vadd.f32 %v7448_v19, %v3019_v63  ;;  %v3021_v18 = vpop.f32.mrb[159].mxu0  ;;  %3541 = vmatmul.mubr.bf16.gmra.mrb[152].mxu1 %v3224_v15 }
 0x4b9   : > { %v3147_v37 = vadd.f32 %v7451_v20, %v3021_v18  ;;  %3934 = vmatpush1.bf16.msra.mxu1 %v6107_v12 }
 0x4ba   : > { %v3194_v32 = vpack.c.bf16 %v3146_v3, %v3144_v16  ;;  %3935 = vmatprep.subr.bf16.mxu1 %v6112_v10 }
 0x4bb   : > { %v3195_v22 = vpack.c.bf16 %v3147_v37, %v3145_v0 }
 0x4bc   : > { %v3226_v38 = vmax.bf16 %v6191_v2, %v3194_v32 }
 0x4bd   : > { %v3025_v24 = vpop.f32.mrb[160].mxu0  ;;  %v3227_v26 = vmax.bf16 %v6191_v2, %v3195_v22  ;;  %3936 = vmatpush1.bf16.msra.mxu1 %v6110_v39 }
 0x4be   : > { %v3027_v30 = vpop.f32.mrb[161].mxu0  ;;  %3937 = vmatprep.subr.bf16.mxu1 %v6115_v21  ;;  %v3148_v33 = vadd.f32 %v7448_v19, %v3025_v24  ;;  %v6118_v21 = vld [vmem:[%s8177_s14 + $0xf4] ss:$8 sps:$4 sm:$0xff]  }
 0x4bf   : > { %v3029_v27 = vpop.f32.mrb[162].mxu0  ;;  %3550 = vmatprep.mubr.bf16.mxu1 %v3227_v26  ;;  %v3149_v13 = vadd.f32 %v7451_v20, %v3027_v30  ;;  %v6116_v26 = vld [vmem:[%s8177_s14 + $0xf0] ss:$8 sps:$4 sm:$0xff]  }
 0x4c0   : > { %v3150_v36 = vadd.f32 %v7448_v19, %v3029_v27  ;;  %v3031_v29 = vpop.f32.mrb[163].mxu0  ;;  %3551 = vmatmul.mubr.bf16.gmra.mrb[156].mxu1 %v3226_v38 }
 0x4c1   : > { %v3151_v45 = vadd.f32 %v7451_v20, %v3031_v29  ;;  %3938 = vmatpush1.bf16.msra.mxu1 %v6113_v23 }
 0x4c2   : > { %v3196_v31 = vpack.c.bf16 %v3150_v36, %v3148_v33  ;;  %3939 = vmatprep.subr.bf16.mxu1 %v6118_v21  ;;  %v6131_v21 = vld [vmem:[%s8179_s16 + $0x40] ss:$8 sps:$4 sm:$0xff]  }
 0x4c3   : > { %v3197_v34 = vpack.c.bf16 %v3151_v45, %v3149_v13 }
 0x4c4   : > { %v3228_v41 = vmax.bf16 %v6191_v2, %v3196_v31 }
 0x4c5   : > { %v3035_v35 = vpop.f32.mrb[164].mxu0  ;;  %v3229_v4 = vmax.bf16 %v6191_v2, %v3197_v34  ;;  %3940 = vmatpush1.bf16.msra.mxu1 %v6116_v26 }
 0x4c6   : > { %v3037_v40 = vpop.f32.mrb[165].mxu0  ;;  %v3152_v43 = vadd.f32 %v7448_v19, %v3035_v35 }
 0x4c7   : > { %v3039_v42 = vpop.f32.mrb[166].mxu0  ;;  %3560 = vmatprep.mubr.bf16.mxu1 %v3229_v4  ;;  %v3153_v44 = vadd.f32 %v7451_v20, %v3037_v40 }
 0x4c8   : > { %v3154_v52 = vadd.f32 %v7448_v19, %v3039_v42  ;;  %v3041_v17 = vpop.f32.mrb[167].mxu0  ;;  %3561 = vmatmul.mubr.bf16.gmra.mrb[160].mxu1 %v3228_v41 }
 0x4c9   : > { %v3155_v47 = vadd.f32 %v7451_v20, %v3041_v17 }
 0x4ca   : > { %v3198_v49 = vpack.c.bf16 %v3154_v52, %v3152_v43 }
 0x4cb   : > { %v3199_v50 = vpack.c.bf16 %v3155_v47, %v3153_v44 }
 0x4cc   : > { %v3230_v54 = vmax.bf16 %v6191_v2, %v3198_v49 }
 0x4cd   : > { %v3045_v53 = vpop.f32.mrb[168].mxu0  ;;  %v3231_v55 = vmax.bf16 %v6191_v2, %v3199_v50 }
 0x4ce   : > { %v3047_v51 = vpop.f32.mrb[169].mxu0  ;;  %v3156_v7 = vadd.f32 %v7448_v19, %v3045_v53 }
 0x4cf   : > { %v3049_v56 = vpop.f32.mrb[170].mxu0  ;;  %3570 = vmatprep.mubr.bf16.mxu1 %v3231_v55  ;;  %v3157_v58 = vadd.f32 %v7451_v20, %v3047_v51 }
 0x4d0   : > { %v3158_v57 = vadd.f32 %v7448_v19, %v3049_v56  ;;  %v3051_v25 = vpop.f32.mrb[171].mxu0  ;;  %3571 = vmatmul.mubr.bf16.gmra.mrb[164].mxu1 %v3230_v54 }
 0x4d1   : > { %v3159_v60 = vadd.f32 %v7451_v20, %v3051_v25 }
 0x4d2   : > { %v3200_v61 = vpack.c.bf16 %v3158_v57, %v3156_v7 }
 0x4d3   : > { %v3201_v59 = vpack.c.bf16 %v3159_v60, %v3157_v58 }
 0x4d4   : > { %v3232_v6 = vmax.bf16 %v6191_v2, %v3200_v61 }
 0x4d5   : > { %v3055_v62 = vpop.f32.mrb[172].mxu0  ;;  %v3233_v1 = vmax.bf16 %v6191_v2, %v3201_v59 }
 0x4d6   : > { %v3057_v5 = vpop.f32.mrb[173].mxu0  ;;  %v3160_v9 = vadd.f32 %v7448_v19, %v3055_v62 }
 0x4d7   : > { %v3059_v8 = vpop.f32.mrb[174].mxu0  ;;  %3580 = vmatprep.mubr.bf16.mxu1 %v3233_v1  ;;  %v3161_v12 = vadd.f32 %v7451_v20, %v3057_v5 }
 0x4d8   : > { %v3162_v11 = vadd.f32 %v7448_v19, %v3059_v8  ;;  %v3061_v28 = vpop.f32.mrb[175].mxu0  ;;  %3581 = vmatmul.mubr.bf16.gmra.mrb[168].mxu1 %v3232_v6 }
 0x4d9   : > { %v3163_v14 = vadd.f32 %v7451_v20, %v3061_v28  ;;  %v6125_v28 = vld [vmem:[%s8179_s16 + $0x20] ss:$8 sps:$4 sm:$0xff]  }
 0x4da   : > { %v3202_v15 = vpack.c.bf16 %v3162_v11, %v3160_v9  ;;  %v6119_v9 = vld [vmem:[%s8179_s16] ss:$8 sps:$4 sm:$0xff]   ;;  %v6124_v11 = vld [vmem:[%s8179_s16 + $0x14] ss:$8 sps:$4 sm:$0xff]  }
 0x4db   : > { %v3203_v10 = vpack.c.bf16 %v3163_v14, %v3161_v12  ;;  %v6127_v12 = vld [vmem:[%s8179_s16 + $0x24] ss:$8 sps:$4 sm:$0xff]   ;;  %v3276_v14 = vld [vmem:[%s8176_s13] sm:$0x3] }
 0x4dc   : > { %v3234_v18 = vmax.bf16 %v6191_v2, %v3202_v15  ;;  %v6128_v15 = vld [vmem:[%s8179_s16 + $0x30] ss:$8 sps:$4 sm:$0xff]  }
 0x4dd   : > { %v3065_v63 = vpop.f32.mrb[176].mxu0  ;;  %v3235_v16 = vmax.bf16 %v6191_v2, %v3203_v10  ;;  %v6130_v10 = vld [vmem:[%s8179_s16 + $0x34] ss:$8 sps:$4 sm:$0xff]  }
 0x4de   : > { %v3067_v3 = vpop.f32.mrb[177].mxu0  ;;  %v3164_v37 = vadd.f32 %v7448_v19, %v3065_v63  ;;  %v7670_v63 = vrot.slane %v3276_v14, %v6571_v46 }
 0x4df   : > { %v3069_v0 = vpop.f32.mrb[178].mxu0  ;;  %3590 = vmatprep.mubr.bf16.mxu1 %v3235_v16  ;;  %v3165_v22 = vadd.f32 %v7451_v20, %v3067_v3  ;;  %v7673_v3 = vrot.slane %v3276_v14, %v6576_v48  ;;  %v6154_v14 = vld [vmem:[%s8179_s16 + $0xb4] ss:$8 sps:$4 sm:$0xff]  }
 0x4e0   : > { %v3166_v39 = vadd.f32 %v7448_v19, %v3069_v0  ;;  %v3071_v32 = vpop.f32.mrb[179].mxu0  ;;  %3591 = vmatmul.mubr.bf16.gmra.mrb[172].mxu1 %v3234_v18 }
 0x4e1   : > { %v3167_v24 = vadd.f32 %v7451_v20, %v3071_v32 }
 0x4e2   : > { %v3204_v23 = vpack.c.bf16 %v3166_v39, %v3164_v37 }
 0x4e3   : > { %v3205_v30 = vpack.c.bf16 %v3167_v24, %v3165_v22  ;;  %v6133_v22 = vld [vmem:[%s8179_s16 + $0x44] ss:$8 sps:$4 sm:$0xff]  }
 0x4e4   : > { %v3236_v36 = vmax.bf16 %v6191_v2, %v3204_v23  ;;  %v6136_v23 = vld [vmem:[%s8179_s16 + $0x54] ss:$8 sps:$4 sm:$0xff]  }
 0x4e5   : > { %v3075_v38 = vpop.f32.mrb[180].mxu0  ;;  %v3237_v27 = vmax.bf16 %v6191_v2, %v3205_v30 }
 0x4e6   : > { %v3077_v33 = vpop.f32.mrb[181].mxu0  ;;  %v3168_v13 = vadd.f32 %v7448_v19, %v3075_v38 }
 0x4e7   : > { %v3079_v29 = vpop.f32.mrb[182].mxu0  ;;  %3600 = vmatprep.mubr.bf16.mxu1 %v3237_v27  ;;  %v3169_v34 = vadd.f32 %v7451_v20, %v3077_v33  ;;  %v6134_v27 = vld [vmem:[%s8179_s16 + $0x50] ss:$8 sps:$4 sm:$0xff]   ;;  %v6139_v33 = vld [vmem:[%s8179_s16 + $0x64] ss:$8 sps:$4 sm:$0xff]  }
 0x4e8   : > { %v3170_v45 = vadd.f32 %v7448_v19, %v3079_v29  ;;  %v3081_v31 = vpop.f32.mrb[183].mxu0  ;;  %3601 = vmatmul.mubr.bf16.gmra.mrb[176].mxu1 %v3236_v36 }
 0x4e9   : > { %v3171_v35 = vadd.f32 %v7451_v20, %v3081_v31 }
 0x4ea   : > { %v3206_v4 = vpack.c.bf16 %v3170_v45, %v3168_v13 }
 0x4eb   : > { %v3207_v40 = vpack.c.bf16 %v3171_v35, %v3169_v34  ;;  %v6137_v34 = vld [vmem:[%s8179_s16 + $0x60] ss:$8 sps:$4 sm:$0xff]  }
 0x4ec   : > { %v3238_v52 = vmax.bf16 %v6191_v2, %v3206_v4 }
 0x4ed   : > { %v3085_v41 = vpop.f32.mrb[184].mxu0  ;;  %v3239_v42 = vmax.bf16 %v6191_v2, %v3207_v40 }
 0x4ee   : > { %v3087_v43 = vpop.f32.mrb[185].mxu0  ;;  %v3172_v44 = vadd.f32 %v7448_v19, %v3085_v41  ;;  %v6142_v41 = vld [vmem:[%s8179_s16 + $0x74] ss:$8 sps:$4 sm:$0xff]  }
 0x4ef   : > { %v3089_v17 = vpop.f32.mrb[186].mxu0  ;;  %3610 = vmatprep.mubr.bf16.mxu1 %v3239_v42  ;;  %v3173_v50 = vadd.f32 %v7451_v20, %v3087_v43 }
 0x4f0   : > { %v3174_v47 = vadd.f32 %v7448_v19, %v3089_v17  ;;  %v3091_v49 = vpop.f32.mrb[187].mxu0  ;;  %3611 = vmatmul.mubr.bf16.gmra.mrb[180].mxu1 %v3238_v52 }
 0x4f1   : > { %v3175_v53 = vadd.f32 %v7451_v20, %v3091_v49 }
 0x4f2   : > { %v3208_v55 = vpack.c.bf16 %v3174_v47, %v3172_v44  ;;  %v6140_v44 = vld [vmem:[%s8179_s16 + $0x70] ss:$8 sps:$4 sm:$0xff]   ;;  %v6145_v47 = vld [vmem:[%s8179_s16 + $0x84] ss:$8 sps:$4 sm:$0xff]  }
 0x4f3   : > { %v3209_v51 = vpack.c.bf16 %v3175_v53, %v3173_v50 }
 0x4f4   : > { %v3240_v57 = vmax.bf16 %v6191_v2, %v3208_v55 }
 0x4f5   : > { %v3095_v54 = vpop.f32.mrb[188].mxu0  ;;  %v3241_v56 = vmax.bf16 %v6191_v2, %v3209_v51 }
 0x4f6   : > { %v3097_v7 = vpop.f32.mrb[189].mxu0  ;;  %v3176_v58 = vadd.f32 %v7448_v19, %v3095_v54  ;;  %v6143_v54 = vld [vmem:[%s8179_s16 + $0x80] ss:$8 sps:$4 sm:$0xff]  }
 0x4f7   : > { %v3099_v25 = vpop.f32.mrb[190].mxu0  ;;  %3620 = vmatprep.mubr.bf16.mxu1 %v3241_v56  ;;  %v3177_v59 = vadd.f32 %v7451_v20, %v3097_v7 }
 0x4f8   : > { %v3178_v60 = vadd.f32 %v7448_v19, %v3099_v25  ;;  %v3101_v61 = vpop.f32.mrb[191].mxu0  ;;  %3621 = vmatmul.mubr.bf16.gmra.mrb[184].mxu1 %v3240_v57  ;;  %v6121_v19 = vld [vmem:[%s8179_s16 + $0x4] ss:$8 sps:$4 sm:$0xff]   ;;  %v6148_v25 = vld [vmem:[%s8179_s16 + $0x94] ss:$8 sps:$4 sm:$0xff]  }
 0x4f9   : > { %v3179_v62 = vadd.f32 %v7451_v20, %v3101_v61  ;;  %4370 = vmatprep.subr.bf16.mxu0 %v6121_v19  ;;  %v6122_v20 = vld [vmem:[%s8179_s16 + $0x10] ss:$8 sps:$4 sm:$0xff]  }
 0x4fa   : > { %v3210_v1 = vpack.c.bf16 %v3178_v60, %v3176_v58  ;;  %4371 = vmatpush1.bf16.msra.mxu0 %v6119_v9 }
 0x4fb   : > { %v3211_v5 = vpack.c.bf16 %v3179_v62, %v3177_v59  ;;  %4372 = vmatprep.subr.bf16.mxu0 %v6124_v11  ;;  %v6146_v62 = vld [vmem:[%s8179_s16 + $0x90] ss:$8 sps:$4 sm:$0xff]  }
 0x4fc   : > { %v3242_v8 = vmax.bf16 %v6191_v2, %v3210_v1  ;;  %v6151_v1 = vld [vmem:[%s8179_s16 + $0xa4] ss:$8 sps:$4 sm:$0xff]  }
 0x4fd   : > { %v3243_v6 = vmax.bf16 %v6191_v2, %v3211_v5 }
 0x4fe   : > { %4373 = vmatpush1.bf16.msra.mxu0 %v6122_v20  ;;  %v6149_v20 = vld [vmem:[%s8179_s16 + $0xa0] ss:$8 sps:$4 sm:$0xff]  }
 0x4ff   : > { %3630 = vmatprep.mubr.bf16.mxu1 %v3243_v6  ;;  %4374 = vmatprep.subr.bf16.mxu0 %v6127_v12 }
 0x500   : > { %3631 = vmatmul.mubr.bf16.gmra.mrb[188].mxu1 %v3242_v8 }
 0x502   : > { %4375 = vmatpush1.bf16.msra.mxu0 %v6125_v28 }
 0x503   : > { %4376 = vmatprep.subr.bf16.mxu0 %v6130_v10 }
 0x506   : > { %4377 = vmatpush1.bf16.msra.mxu0 %v6128_v15 }
 0x507   : > { %4378 = vmatprep.subr.bf16.mxu0 %v6133_v22 }
 0x50a   : > { %4379 = vmatpush1.bf16.msra.mxu0 %v6131_v21 }
 0x50b   : > { %4380 = vmatprep.subr.bf16.mxu0 %v6136_v23 }
 0x50e   : > { %4381 = vmatpush1.bf16.msra.mxu0 %v6134_v27  ;;  %v6160_v27 = vld [vmem:[%s8179_s16 + $0xd4] ss:$8 sps:$4 sm:$0xff]  }
 0x50f   : > { %4382 = vmatprep.subr.bf16.mxu0 %v6139_v33 }
 0x512   : > { %4383 = vmatpush1.bf16.msra.mxu0 %v6137_v34 }
 0x513   : > { %4384 = vmatprep.subr.bf16.mxu0 %v6142_v41 }
 0x516   : > { %4385 = vmatpush1.bf16.msra.mxu0 %v6140_v44 }
 0x517   : > { %4386 = vmatprep.subr.bf16.mxu0 %v6145_v47 }
 0x51a   : > { %4387 = vmatpush1.bf16.msra.mxu0 %v6143_v54 }
 0x51b   : > { %4388 = vmatprep.subr.bf16.mxu0 %v6148_v25 }
 0x51e   : > { %4389 = vmatpush1.bf16.msra.mxu0 %v6146_v62 }
 0x51f   : > { %4390 = vmatprep.subr.bf16.mxu0 %v6151_v1 }
 0x522   : > { %4391 = vmatpush1.bf16.msra.mxu0 %v6149_v20 }
 0x523   : > { %4392 = vmatprep.subr.bf16.mxu0 %v6154_v14 }
 0x55b   : > { %v3482_v16 = vpop.f32.mrb[128].mxu1 }
 0x55c   : > { %v3484_v18 = vpop.f32.mrb[129].mxu1  ;;  %v3483_v37 = vadd.f32 %v3482_v16, %v7670_v63 }
 0x55d   : > { %v3486_v0 = vpop.f32.mrb[130].mxu1  ;;  %v3485_v24 = vadd.f32 %v3484_v18, %v7673_v3 }
 0x55e   : > { %v3487_v39 = vadd.f32 %v3486_v0, %v7670_v63  ;;  %v3488_v32 = vpop.f32.mrb[131].mxu1  ;;  %v6152_v0 = vld [vmem:[%s8179_s16 + $0xb0] ss:$8 sps:$4 sm:$0xff]  }
 0x55f   : > { %v3489_v26 = vadd.f32 %v3488_v32, %v7673_v3  ;;  %4393 = vmatpush1.bf16.msra.mxu0 %v6152_v0 }
 0x560   : > { %v3641_v30 = vpack.c.bf16 %v3487_v39, %v3483_v37  ;;  %v6157_v37 = vld [vmem:[%s8179_s16 + $0xc4] ss:$8 sps:$4 sm:$0xff]  }
 0x561   : > { %v3642_v38 = vpack.c.bf16 %v3489_v26, %v3485_v24  ;;  %v6155_v26 = vld [vmem:[%s8179_s16 + $0xc0] ss:$8 sps:$4 sm:$0xff]   ;;  %4394 = vmatprep.subr.bf16.mxu0 %v6157_v37 }
 0x562   : > { %v3673_v13 = vmax.bf16 %v6191_v2, %v3641_v30 }
 0x563   : > { %v3492_v36 = vpop.f32.mrb[132].mxu1  ;;  %v3674_v29 = vmax.bf16 %v6191_v2, %v3642_v38  ;;  %4395 = vmatpush1.bf16.msra.mxu0 %v6155_v26 }
 0x564   : > { %v3494_v45 = vpop.f32.mrb[133].mxu1  ;;  %v3493_v35 = vadd.f32 %v3492_v36, %v7670_v63  ;;  %4396 = vmatprep.subr.bf16.mxu0 %v6160_v27 }
 0x565   : > { %v3496_v31 = vpop.f32.mrb[134].mxu1  ;;  %3941 = vmatprep.mubr.bf16.mxu1 %v3674_v29  ;;  %v3495_v42 = vadd.f32 %v3494_v45, %v7673_v3  ;;  %v6158_v45 = vld [vmem:[%s8179_s16 + $0xd0] ss:$8 sps:$4 sm:$0xff]  }
 0x566   : > { %v3497_v4 = vadd.f32 %v3496_v31, %v7670_v63  ;;  %v3498_v40 = vpop.f32.mrb[135].mxu1  ;;  %3942 = vmatmul.mubr.bf16.vlgmr.msra.gmra.mrb[192].mxu1 %v3673_v13  ;;  %v6163_v31 = vld [vmem:[%s8179_s16 + $0xe4] ss:$8 sps:$4 sm:$0xff]  }
 0x567   : > { %v3499_v43 = vadd.f32 %v3498_v40, %v7673_v3  ;;  %4397 = vmatpush1.bf16.msra.mxu0 %v6158_v45 }
 0x568   : > { %v3643_v52 = vpack.c.bf16 %v3497_v4, %v3493_v35  ;;  %4398 = vmatprep.subr.bf16.mxu0 %v6163_v31 }
 0x569   : > { %v3644_v17 = vpack.c.bf16 %v3499_v43, %v3495_v42  ;;  %v6161_v42 = vld [vmem:[%s8179_s16 + $0xe0] ss:$8 sps:$4 sm:$0xff]  }
 0x56a   : > { %v3675_v55 = vmax.bf16 %v6191_v2, %v3643_v52 }
 0x56b   : > { %v3502_v49 = vpop.f32.mrb[136].mxu1  ;;  %v3676_v50 = vmax.bf16 %v6191_v2, %v3644_v17  ;;  %4399 = vmatpush1.bf16.msra.mxu0 %v6161_v42 }
 0x56c   : > { %v3504_v53 = vpop.f32.mrb[137].mxu1  ;;  %v3503_v56 = vadd.f32 %v3502_v49, %v7670_v63 }
 0x56d   : > { %v3506_v51 = vpop.f32.mrb[138].mxu1  ;;  %3951 = vmatprep.mubr.bf16.mxu1 %v3676_v50  ;;  %v3505_v58 = vadd.f32 %v3504_v53, %v7673_v3 }
 0x56e   : > { %v3507_v7 = vadd.f32 %v3506_v51, %v7670_v63  ;;  %v3508_v57 = vpop.f32.mrb[139].mxu1  ;;  %3952 = vmatmul.mubr.bf16.gmra.mrb[196].mxu1 %v3675_v55 }
 0x56f   : > { %v3509_v60 = vadd.f32 %v3508_v57, %v7673_v3 }
 0x570   : > { %v3645_v61 = vpack.c.bf16 %v3507_v7, %v3503_v56 }
 0x571   : > { %v3646_v59 = vpack.c.bf16 %v3509_v60, %v3505_v58 }
 0x572   : > { %v3677_v9 = vmax.bf16 %v6191_v2, %v3645_v61 }
 0x573   : > { %v3512_v5 = vpop.f32.mrb[140].mxu1  ;;  %v3678_v6 = vmax.bf16 %v6191_v2, %v3646_v59 }
 0x574   : > { %v3514_v8 = vpop.f32.mrb[141].mxu1  ;;  %v3513_v11 = vadd.f32 %v3512_v5, %v7670_v63 }
 0x575   : > { %v3516_v19 = vpop.f32.mrb[142].mxu1  ;;  %3961 = vmatprep.mubr.bf16.mxu1 %v3678_v6  ;;  %v3515_v15 = vadd.f32 %v3514_v8, %v7673_v3 }
 0x576   : > { %v3517_v28 = vadd.f32 %v3516_v19, %v7670_v63  ;;  %v3518_v12 = vpop.f32.mrb[143].mxu1  ;;  %3962 = vmatmul.mubr.bf16.gmra.mrb[200].mxu1 %v3677_v9 }
 0x577   : > { %v3519_v10 = vadd.f32 %v3518_v12, %v7673_v3 }
 0x578   : > { %v3647_v16 = vpack.c.bf16 %v3517_v28, %v3513_v11 }
 0x579   : > { %v3648_v18 = vpack.c.bf16 %v3519_v10, %v3515_v15 }
 0x57a   : > { %v3679_v22 = vmax.bf16 %v6191_v2, %v3647_v16 }
 0x57b   : > { %v3522_v39 = vpop.f32.mrb[144].mxu1  ;;  %v3680_v32 = vmax.bf16 %v6191_v2, %v3648_v18 }
 0x57c   : > { %v3524_v21 = vpop.f32.mrb[145].mxu1  ;;  %v3523_v23 = vadd.f32 %v3522_v39, %v7670_v63 }
 0x57d   : > { %v3526_v24 = vpop.f32.mrb[146].mxu1  ;;  %3971 = vmatprep.mubr.bf16.mxu1 %v3680_v32  ;;  %v3525_v33 = vadd.f32 %v3524_v21, %v7673_v3 }
 0x57e   : > { %v3527_v30 = vadd.f32 %v3526_v24, %v7670_v63  ;;  %v3528_v38 = vpop.f32.mrb[147].mxu1  ;;  %3972 = vmatmul.mubr.bf16.gmra.mrb[204].mxu1 %v3679_v22 }
 0x57f   : > { %v3529_v36 = vadd.f32 %v3528_v38, %v7673_v3 }
 0x580   : > { %v3649_v29 = vpack.c.bf16 %v3527_v30, %v3523_v23 }
 0x581   : > { %v3650_v13 = vpack.c.bf16 %v3529_v36, %v3525_v33 }
 0x582   : > { %v3681_v40 = vmax.bf16 %v6191_v2, %v3649_v29 }
 0x583   : > { %v3532_v34 = vpop.f32.mrb[148].mxu1  ;;  %v3682_v35 = vmax.bf16 %v6191_v2, %v3650_v13 }
 0x584   : > { %v3534_v4 = vpop.f32.mrb[149].mxu1  ;;  %v3533_v43 = vadd.f32 %v3532_v34, %v7670_v63 }
 0x585   : > { %v3536_v41 = vpop.f32.mrb[150].mxu1  ;;  %3981 = vmatprep.mubr.bf16.mxu1 %v3682_v35  ;;  %v3535_v44 = vadd.f32 %v3534_v4, %v7673_v3 }
 0x586   : > { %v3537_v52 = vadd.f32 %v3536_v41, %v7670_v63  ;;  %v3538_v17 = vpop.f32.mrb[151].mxu1  ;;  %3982 = vmatmul.mubr.bf16.gmra.mrb[208].mxu1 %v3681_v40 }
 0x587   : > { %v3539_v47 = vadd.f32 %v3538_v17, %v7673_v3 }
 0x588   : > { %v3651_v49 = vpack.c.bf16 %v3537_v52, %v3533_v43 }
 0x589   : > { %v3652_v50 = vpack.c.bf16 %v3539_v47, %v3535_v44 }
 0x58a   : > { %v3683_v54 = vmax.bf16 %v6191_v2, %v3651_v49 }
 0x58b   : > { %v3542_v53 = vpop.f32.mrb[152].mxu1  ;;  %v3684_v55 = vmax.bf16 %v6191_v2, %v3652_v50 }
 0x58c   : > { %v3544_v51 = vpop.f32.mrb[153].mxu1  ;;  %v3543_v7 = vadd.f32 %v3542_v53, %v7670_v63 }
 0x58d   : > { %v3546_v56 = vpop.f32.mrb[154].mxu1  ;;  %3991 = vmatprep.mubr.bf16.mxu1 %v3684_v55  ;;  %v3545_v58 = vadd.f32 %v3544_v51, %v7673_v3 }
 0x58e   : > { %v3547_v57 = vadd.f32 %v3546_v56, %v7670_v63  ;;  %v3548_v25 = vpop.f32.mrb[155].mxu1  ;;  %3992 = vmatmul.mubr.bf16.gmra.mrb[212].mxu1 %v3683_v54 }
 0x58f   : > { %v3549_v60 = vadd.f32 %v3548_v25, %v7673_v3 }
 0x590   : > { %v3653_v61 = vpack.c.bf16 %v3547_v57, %v3543_v7 }
 0x591   : > { %v3654_v59 = vpack.c.bf16 %v3549_v60, %v3545_v58 }
 0x592   : > { %v3685_v6 = vmax.bf16 %v6191_v2, %v3653_v61 }
 0x593   : > { %v3552_v62 = vpop.f32.mrb[156].mxu1  ;;  %v3686_v1 = vmax.bf16 %v6191_v2, %v3654_v59 }
 0x594   : > { %v3554_v5 = vpop.f32.mrb[157].mxu1  ;;  %v3553_v9 = vadd.f32 %v3552_v62, %v7670_v63 }
 0x595   : > { %v3556_v8 = vpop.f32.mrb[158].mxu1  ;;  %4001 = vmatprep.mubr.bf16.mxu1 %v3686_v1  ;;  %v3555_v11 = vadd.f32 %v3554_v5, %v7673_v3 }
 0x596   : > { %v3557_v19 = vadd.f32 %v3556_v8, %v7670_v63  ;;  %v3558_v20 = vpop.f32.mrb[159].mxu1  ;;  %4002 = vmatmul.mubr.bf16.gmra.mrb[216].mxu1 %v3685_v6 }
 0x597   : > { %v3559_v28 = vadd.f32 %v3558_v20, %v7673_v3 }
 0x598   : > { %v3655_v12 = vpack.c.bf16 %v3557_v19, %v3553_v9 }
 0x599   : > { %v3656_v14 = vpack.c.bf16 %v3559_v28, %v3555_v11  ;;  %v6166_v28 = vld [vmem:[%s8179_s16 + $0xf4] ss:$8 sps:$4 sm:$0xff]  }
 0x59a   : > { %v3687_v18 = vmax.bf16 %v6191_v2, %v3655_v12  ;;  %4400 = vmatprep.subr.bf16.mxu0 %v6166_v28 }
 0x59b   : > { %v3562_v15 = vpop.f32.mrb[160].mxu1  ;;  %v3688_v10 = vmax.bf16 %v6191_v2, %v3656_v14 }
 0x59c   : > { %v3564_v16 = vpop.f32.mrb[161].mxu1  ;;  %v3563_v37 = vadd.f32 %v3562_v15, %v7670_v63  ;;  %v6164_v15 = vld [vmem:[%s8179_s16 + $0xf0] ss:$8 sps:$4 sm:$0xff]  }
 0x59d   : > { %v3566_v0 = vpop.f32.mrb[162].mxu1  ;;  %4011 = vmatprep.mubr.bf16.mxu1 %v3688_v10  ;;  %v3565_v21 = vadd.f32 %v3564_v16, %v7673_v3  ;;  %4401 = vmatpush1.bf16.msra.mxu0 %v6164_v15  ;;  %v6172_v15 = vld [vmem:[%s8181_s18 + $0x10] sm:$0xff]  }
 0x59e   : > { %v3567_v39 = vadd.f32 %v3566_v0, %v7670_v63  ;;  %v3568_v32 = vpop.f32.mrb[163].mxu1  ;;  %4012 = vmatmul.mubr.bf16.gmra.mrb[220].mxu1 %v3687_v18 }
 0x59f   : > { %v3569_v22 = vadd.f32 %v3568_v32, %v7673_v3 }
 0x5a0   : > { %v3657_v24 = vpack.c.bf16 %v3567_v39, %v3563_v37 }
 0x5a1   : > { %v3658_v26 = vpack.c.bf16 %v3569_v22, %v3565_v21 }
 0x5a2   : > { %v3689_v27 = vmax.bf16 %v6191_v2, %v3657_v24 }
 0x5a3   : > { %v3572_v23 = vpop.f32.mrb[164].mxu1  ;;  %v3690_v30 = vmax.bf16 %v6191_v2, %v3658_v26 }
 0x5a4   : > { %v3574_v38 = vpop.f32.mrb[165].mxu1  ;;  %v3573_v36 = vadd.f32 %v3572_v23, %v7670_v63 }
 0x5a5   : > { %v3576_v33 = vpop.f32.mrb[166].mxu1  ;;  %4021 = vmatprep.mubr.bf16.mxu1 %v3690_v30  ;;  %v3575_v45 = vadd.f32 %v3574_v38, %v7673_v3 }
 0x5a6   : > { %v3577_v29 = vadd.f32 %v3576_v33, %v7670_v63  ;;  %v3578_v13 = vpop.f32.mrb[167].mxu1  ;;  %4022 = vmatmul.mubr.bf16.gmra.mrb[224].mxu1 %v3689_v27 }
 0x5a7   : > { %v3579_v31 = vadd.f32 %v3578_v13, %v7673_v3 }
 0x5a8   : > { %v3659_v34 = vpack.c.bf16 %v3577_v29, %v3573_v36 }
 0x5a9   : > { %v3660_v35 = vpack.c.bf16 %v3579_v31, %v3575_v45 }
 0x5aa   : > { %v3691_v42 = vmax.bf16 %v6191_v2, %v3659_v34 }
 0x5ab   : > { %v3582_v4 = vpop.f32.mrb[168].mxu1  ;;  %v3692_v40 = vmax.bf16 %v6191_v2, %v3660_v35 }
 0x5ac   : > { %v3584_v41 = vpop.f32.mrb[169].mxu1  ;;  %v3583_v52 = vadd.f32 %v3582_v4, %v7670_v63 }
 0x5ad   : > { %v3586_v43 = vpop.f32.mrb[170].mxu1  ;;  %4031 = vmatprep.mubr.bf16.mxu1 %v3692_v40  ;;  %v3585_v47 = vadd.f32 %v3584_v41, %v7673_v3 }
 0x5ae   : > { %v3587_v17 = vadd.f32 %v3586_v43, %v7670_v63  ;;  %v3588_v44 = vpop.f32.mrb[171].mxu1  ;;  %4032 = vmatmul.mubr.bf16.gmra.mrb[228].mxu1 %v3691_v42 }
 0x5af   : > { %v3589_v49 = vadd.f32 %v3588_v44, %v7673_v3 }
 0x5b0   : > { %v3661_v50 = vpack.c.bf16 %v3587_v17, %v3583_v52 }
 0x5b1   : > { %v3662_v53 = vpack.c.bf16 %v3589_v49, %v3585_v47 }
 0x5b2   : > { %v3693_v56 = vmax.bf16 %v6191_v2, %v3661_v50 }
 0x5b3   : > { %v3592_v55 = vpop.f32.mrb[172].mxu1  ;;  %v3694_v51 = vmax.bf16 %v6191_v2, %v3662_v53 }
 0x5b4   : > { %v3594_v54 = vpop.f32.mrb[173].mxu1  ;;  %v3593_v57 = vadd.f32 %v3592_v55, %v7670_v63 }
 0x5b5   : > { %v3596_v7 = vpop.f32.mrb[174].mxu1  ;;  %4041 = vmatprep.mubr.bf16.mxu1 %v3694_v51  ;;  %v3595_v60 = vadd.f32 %v3594_v54, %v7673_v3 }
 0x5b6   : > { %v3597_v25 = vadd.f32 %v3596_v7, %v7670_v63  ;;  %v3598_v58 = vpop.f32.mrb[175].mxu1  ;;  %4042 = vmatmul.mubr.bf16.gmra.mrb[232].mxu1 %v3693_v56 }
 0x5b7   : > { %v3599_v61 = vadd.f32 %v3598_v58, %v7673_v3 }
 0x5b8   : > { %v3663_v59 = vpack.c.bf16 %v3597_v25, %v3593_v57  ;;  %v6167_v57 = vld [vmem:[%s8181_s18 + $0x40] sm:$0xff]  }
 0x5b9   : > { %v3664_v62 = vpack.c.bf16 %v3599_v61, %v3595_v60  ;;  %5694 = vmatprep.subr.bf16.mxu1 %v6167_v57  ;;  %5582 = vmatprep.subr.bf16.mxu0 %v6167_v57 }
 0x5ba   : > { %v3695_v8 = vmax.bf16 %v6191_v2, %v3663_v59 }
 0x5bb   : > { %v3602_v1 = vpop.f32.mrb[176].mxu1  ;;  %v3696_v5 = vmax.bf16 %v6191_v2, %v3664_v62 }
 0x5bc   : > { %v3604_v6 = vpop.f32.mrb[177].mxu1  ;;  %v3603_v19 = vadd.f32 %v3602_v1, %v7670_v63 }
 0x5bd   : > { %v3606_v9 = vpop.f32.mrb[178].mxu1  ;;  %4051 = vmatprep.mubr.bf16.mxu1 %v3696_v5  ;;  %v3605_v12 = vadd.f32 %v3604_v6, %v7673_v3  ;;  %v6169_v6 = vld [vmem:[%s8181_s18 + $0x48] sm:$0xff]  }
 0x5be   : > { %v3607_v20 = vadd.f32 %v3606_v9, %v7670_v63  ;;  %v3608_v11 = vpop.f32.mrb[179].mxu1  ;;  %4052 = vmatmul.mubr.bf16.gmra.mrb[236].mxu1 %v3695_v8 }
 0x5bf   : > { %v3609_v14 = vadd.f32 %v3608_v11, %v7673_v3  ;;  %v6171_v11 = vld [vmem:[%s8181_s18 + $0x50] sm:$0xff]  }
 0x5c0   : > { %v3665_v10 = vpack.c.bf16 %v3607_v20, %v3603_v19  ;;  %v6170_v19 = vld [vmem:[%s8181_s18 + $0x8] sm:$0xff]  }
 0x5c1   : > { %v3666_v16 = vpack.c.bf16 %v3609_v14, %v3605_v12 }
 0x5c2   : > { %v3697_v39 = vmax.bf16 %v6191_v2, %v3665_v10 }
 0x5c3   : > { %v3612_v18 = vpop.f32.mrb[180].mxu1  ;;  %v3698_v0 = vmax.bf16 %v6191_v2, %v3666_v16 }
 0x5c4   : > { %v3614_v37 = vpop.f32.mrb[181].mxu1  ;;  %v3613_v21 = vadd.f32 %v3612_v18, %v7670_v63  ;;  %v6173_v18 = vld [vmem:[%s8181_s18 + $0x58] sm:$0xff]  }
 0x5c5   : > { %v3616_v32 = vpop.f32.mrb[182].mxu1  ;;  %4061 = vmatprep.mubr.bf16.mxu1 %v3698_v0  ;;  %v3615_v26 = vadd.f32 %v3614_v37, %v7673_v3 }
 0x5c6   : > { %v3617_v22 = vadd.f32 %v3616_v32, %v7670_v63  ;;  %v3618_v24 = vpop.f32.mrb[183].mxu1  ;;  %4062 = vmatmul.mubr.bf16.gmra.mrb[240].mxu1 %v3697_v39 }
 0x5c7   : > { %v3619_v23 = vadd.f32 %v3618_v24, %v7673_v3  ;;  %v6174_v24 = vld [vmem:[%s8181_s18 + $0x18] sm:$0xff]  }
 0x5c8   : > { %v3667_v30 = vpack.c.bf16 %v3617_v22, %v3613_v21 }
 0x5c9   : > { %v3668_v38 = vpack.c.bf16 %v3619_v23, %v3615_v26  ;;  %v6175_v23 = vld [vmem:[%s8181_s18 + $0x60] sm:$0xff]  }
 0x5ca   : > { %v3699_v29 = vmax.bf16 %v6191_v2, %v3667_v30 }
 0x5cb   : > { %v3622_v27 = vpop.f32.mrb[184].mxu1  ;;  %v3700_v33 = vmax.bf16 %v6191_v2, %v3668_v38 }
 0x5cc   : > { %v3624_v36 = vpop.f32.mrb[185].mxu1  ;;  %v3623_v45 = vadd.f32 %v3622_v27, %v7670_v63 }
 0x5cd   : > { %v3626_v13 = vpop.f32.mrb[186].mxu1  ;;  %4071 = vmatprep.mubr.bf16.mxu1 %v3700_v33  ;;  %v3625_v35 = vadd.f32 %v3624_v36, %v7673_v3  ;;  %v6176_v33 = vld [vmem:[%s8181_s18 + $0x20] sm:$0xff]  }
 0x5ce   : > { %v3627_v31 = vadd.f32 %v3626_v13, %v7670_v63  ;;  %v3628_v34 = vpop.f32.mrb[187].mxu1  ;;  %4072 = vmatmul.mubr.bf16.gmra.mrb[244].mxu1 %v3699_v29  ;;  %v6177_v13 = vld [vmem:[%s8181_s18 + $0x68] sm:$0xff]  }
 0x5cf   : > { %v3629_v4 = vadd.f32 %v3628_v34, %v7673_v3 }
 0x5d0   : > { %v3669_v40 = vpack.c.bf16 %v3627_v31, %v3623_v45 }
 0x5d1   : > { %v3670_v41 = vpack.c.bf16 %v3629_v4, %v3625_v35 }
 0x5d2   : > { %v3701_v17 = vmax.bf16 %v6191_v2, %v3669_v40 }
 0x5d3   : > { %v3632_v42 = vpop.f32.mrb[188].mxu1  ;;  %v3702_v43 = vmax.bf16 %v6191_v2, %v3670_v41  ;;  %v6178_v41 = vld [vmem:[%s8181_s18 + $0x28] sm:$0xff]  }
 0x5d4   : > { %v3634_v52 = vpop.f32.mrb[189].mxu1  ;;  %v3633_v47 = vadd.f32 %v3632_v42, %v7670_v63 }
 0x5d5   : > { %v3636_v44 = vpop.f32.mrb[190].mxu1  ;;  %4081 = vmatprep.mubr.bf16.mxu1 %v3702_v43  ;;  %v3635_v53 = vadd.f32 %v3634_v52, %v7673_v3  ;;  %v6179_v43 = vld [vmem:[%s8181_s18 + $0x70] sm:$0xff]  }
 0x5d6   : > { %v3637_v49 = vadd.f32 %v3636_v44, %v7670_v63  ;;  %v3638_v50 = vpop.f32.mrb[191].mxu1  ;;  %4082 = vmatmul.mubr.bf16.gmra.mrb[248].mxu1 %v3701_v17  ;;  %v6168_v63 = vld [vmem:[%s8181_s18] sm:$0xff]  }
 0x5d7   : > { %v3639_v55 = vadd.f32 %v3638_v50, %v7673_v3  ;;  %v3737_v3 = vld [vmem:[%s8178_s15] sm:$0x3]  ;;  %5702 = vmatpush3.bf16.msra.mxu1 %v6168_v63 }
 0x5d8   : > { %v3671_v51 = vpack.c.bf16 %v3637_v49, %v3633_v47  ;;  %v7853_v25 = vrot.slane %v3737_v3, %v6571_v46  ;;  %v7856_v60 = vrot.slane %v3737_v3, %v6576_v48  ;;  %5695 = vmatprep.subr.bf16.mxu1 %v6169_v6  ;;  %v6180_v47 = vld [vmem:[%s8181_s18 + $0x30] sm:$0xff]  }
 0x5d9   : > { %v3672_v54 = vpack.c.bf16 %v3639_v55, %v3635_v53 }
 0x5da   : > { %v3703_v7 = vmax.bf16 %v6191_v2, %v3671_v51 }
 0x5db   : > { %v3704_v56 = vmax.bf16 %v6191_v2, %v3672_v54  ;;  %5703 = vmatpush3.bf16.msra.mxu1 %v6170_v19 }
 0x5dc   : > { %5696 = vmatprep.subr.bf16.mxu1 %v6171_v11 }
 0x5dd   : > { %4091 = vmatprep.mubr.bf16.mxu1 %v3704_v56 }
 0x5de   : > { %4092 = vmatmul.mubr.bf16.gmra.mrb[252].mxu1 %v3703_v7 }
 0x5df   : > { %5704 = vmatpush3.bf16.msra.mxu1 %v6172_v15 }
 0x5e0   : > { %5697 = vmatprep.subr.bf16.mxu1 %v6173_v18 }
 0x5e3   : > { %5705 = vmatpush3.bf16.msra.mxu1 %v6174_v24 }
 0x5e4   : > { %5698 = vmatprep.subr.bf16.mxu1 %v6175_v23 }
 0x5e7   : > { %5706 = vmatpush3.bf16.msra.mxu1 %v6176_v33 }
 0x5e8   : > { %5699 = vmatprep.subr.bf16.mxu1 %v6177_v13 }
 0x5eb   : > { %5707 = vmatpush3.bf16.msra.mxu1 %v6178_v41 }
 0x5ec   : > { %5700 = vmatprep.subr.bf16.mxu1 %v6179_v43 }
 0x5ef   : > { %5708 = vmatpush3.bf16.msra.mxu1 %v6180_v47 }
 0x639   : > { %v3943_v58 = vpop.f32.mrb[192].mxu1 }
 0x63a   : > { %v3945_v61 = vpop.f32.mrb[193].mxu1  ;;  %v3944_v62 = vadd.f32 %v3943_v58, %v7853_v25 }
 0x63b   : > { %v3947_v59 = vpop.f32.mrb[194].mxu1  ;;  %v3946_v8 = vadd.f32 %v3945_v61, %v7856_v60 }
 0x63c   : > { %v3948_v1 = vadd.f32 %v3947_v59, %v7853_v25  ;;  %v3949_v5 = vpop.f32.mrb[195].mxu1 }
 0x63d   : > { %v3950_v9 = vadd.f32 %v3949_v5, %v7856_v60 }
 0x63e   : > { %v4102_v20 = vpack.c.bf16 %v3948_v1, %v3944_v62 }
 0x63f   : > { %v4103_v28 = vpack.c.bf16 %v3950_v9, %v3946_v8 }
 0x640   : > { %v4134_v10 = vmax.bf16 %v6191_v2, %v4102_v20 }
 0x641   : > { %v3953_v12 = vpop.f32.mrb[196].mxu1  ;;  %v4135_v14 = vmax.bf16 %v6191_v2, %v4103_v28 }
 0x642   : > { %v3955_v16 = vpop.f32.mrb[197].mxu1  ;;  %v3954_v37 = vadd.f32 %v3953_v12, %v7853_v25 }
 0x643   : > { %v3957_v0 = vpop.f32.mrb[198].mxu1  ;;  %4402 = vmatprep.mubr.bf16.mxu0 %v4135_v14  ;;  %v3956_v21 = vadd.f32 %v3955_v16, %v7856_v60 }
 0x644   : > { %v3958_v39 = vadd.f32 %v3957_v0, %v7853_v25  ;;  %v3959_v32 = vpop.f32.mrb[199].mxu1  ;;  %4403 = vmatmul.mubr.bf16.vlgmr.msra.gmra.mrb[192].mxu0 %v4134_v10 }
 0x645   : > { %v3960_v22 = vadd.f32 %v3959_v32, %v7856_v60  ;;  %5583 = vmatpush3.bf16.msra.mxu0 %v6168_v63 }
 0x646   : > { %v4104_v26 = vpack.c.bf16 %v3958_v39, %v3954_v37  ;;  %5584 = vmatprep.subr.bf16.mxu0 %v6169_v6 }
 0x647   : > { %v4105_v30 = vpack.c.bf16 %v3960_v22, %v3956_v21 }
 0x648   : > { %v4136_v29 = vmax.bf16 %v6191_v2, %v4104_v26 }
 0x649   : > { %v3963_v38 = vpop.f32.mrb[200].mxu1  ;;  %v4137_v27 = vmax.bf16 %v6191_v2, %v4105_v30  ;;  %5585 = vmatpush3.bf16.msra.mxu0 %v6170_v19 }
 0x64a   : > { %v3965_v36 = vpop.f32.mrb[201].mxu1  ;;  %5586 = vmatprep.subr.bf16.mxu0 %v6171_v11  ;;  %v3964_v31 = vadd.f32 %v3963_v38, %v7853_v25 }
 0x64b   : > { %v3967_v45 = vpop.f32.mrb[202].mxu1  ;;  %4412 = vmatprep.mubr.bf16.mxu0 %v4137_v27  ;;  %v3966_v4 = vadd.f32 %v3965_v36, %v7856_v60 }
 0x64c   : > { %v3968_v34 = vadd.f32 %v3967_v45, %v7853_v25  ;;  %v3969_v35 = vpop.f32.mrb[203].mxu1  ;;  %4413 = vmatmul.mubr.bf16.gmra.mrb[196].mxu0 %v4136_v29 }
 0x64d   : > { %v3970_v40 = vadd.f32 %v3969_v35, %v7856_v60  ;;  %5587 = vmatpush3.bf16.msra.mxu0 %v6172_v15 }
 0x64e   : > { %v4106_v42 = vpack.c.bf16 %v3968_v34, %v3964_v31  ;;  %5588 = vmatprep.subr.bf16.mxu0 %v6173_v18 }
 0x64f   : > { %v4107_v52 = vpack.c.bf16 %v3970_v40, %v3966_v4 }
 0x650   : > { %v4138_v50 = vmax.bf16 %v6191_v2, %v4106_v42 }
 0x651   : > { %v3973_v17 = vpop.f32.mrb[204].mxu1  ;;  %v4139_v44 = vmax.bf16 %v6191_v2, %v4107_v52  ;;  %5589 = vmatpush3.bf16.msra.mxu0 %v6174_v24 }
 0x652   : > { %v3975_v49 = vpop.f32.mrb[205].mxu1  ;;  %5590 = vmatprep.subr.bf16.mxu0 %v6175_v23  ;;  %v3974_v55 = vadd.f32 %v3973_v17, %v7853_v25 }
 0x653   : > { %v3977_v53 = vpop.f32.mrb[206].mxu1  ;;  %4422 = vmatprep.mubr.bf16.mxu0 %v4139_v44  ;;  %v3976_v56 = vadd.f32 %v3975_v49, %v7856_v60 }
 0x654   : > { %v3978_v51 = vadd.f32 %v3977_v53, %v7853_v25  ;;  %v3979_v54 = vpop.f32.mrb[207].mxu1  ;;  %4423 = vmatmul.mubr.bf16.gmra.mrb[200].mxu0 %v4138_v50 }
 0x655   : > { %v3980_v7 = vadd.f32 %v3979_v54, %v7856_v60  ;;  %5591 = vmatpush3.bf16.msra.mxu0 %v6176_v33 }
 0x656   : > { %v4108_v57 = vpack.c.bf16 %v3978_v51, %v3974_v55  ;;  %5592 = vmatprep.subr.bf16.mxu0 %v6177_v13 }
 0x657   : > { %v4109_v63 = vpack.c.bf16 %v3980_v7, %v3976_v56 }
 0x658   : > { %v4140_v59 = vmax.bf16 %v6191_v2, %v4108_v57 }
 0x659   : > { %v3983_v3 = vpop.f32.mrb[208].mxu1  ;;  %v4141_v58 = vmax.bf16 %v6191_v2, %v4109_v63  ;;  %5593 = vmatpush3.bf16.msra.mxu0 %v6178_v41 }
 0x65a   : > { %v3985_v61 = vpop.f32.mrb[209].mxu1  ;;  %5594 = vmatprep.subr.bf16.mxu0 %v6179_v43  ;;  %v3984_v1 = vadd.f32 %v3983_v3, %v7853_v25 }
 0x65b   : > { %v3987_v62 = vpop.f32.mrb[210].mxu1  ;;  %4432 = vmatprep.mubr.bf16.mxu0 %v4141_v58  ;;  %v3986_v8 = vadd.f32 %v3985_v61, %v7856_v60 }
 0x65c   : > { %v3988_v5 = vadd.f32 %v3987_v62, %v7853_v25  ;;  %v3989_v6 = vpop.f32.mrb[211].mxu1  ;;  %4433 = vmatmul.mubr.bf16.gmra.mrb[204].mxu0 %v4140_v59 }
 0x65d   : > { %v3990_v9 = vadd.f32 %v3989_v6, %v7856_v60  ;;  %5595 = vmatpush3.bf16.msra.mxu0 %v6180_v47 }
 0x65e   : > { %v4110_v19 = vpack.c.bf16 %v3988_v5, %v3984_v1 }
 0x65f   : > { %v4111_v20 = vpack.c.bf16 %v3990_v9, %v3986_v8 }
 0x660   : > { %v4142_v14 = vmax.bf16 %v6191_v2, %v4110_v19 }
 0x661   : > { %v3993_v11 = vpop.f32.mrb[212].mxu1  ;;  %v4143_v28 = vmax.bf16 %v6191_v2, %v4111_v20 }
 0x662   : > { %v3995_v12 = vpop.f32.mrb[213].mxu1  ;;  %v3994_v10 = vadd.f32 %v3993_v11, %v7853_v25 }
 0x663   : > { %v3997_v15 = vpop.f32.mrb[214].mxu1  ;;  %4442 = vmatprep.mubr.bf16.mxu0 %v4143_v28  ;;  %v3996_v0 = vadd.f32 %v3995_v12, %v7856_v60 }
 0x664   : > { %v3998_v16 = vadd.f32 %v3997_v15, %v7853_v25  ;;  %v3999_v18 = vpop.f32.mrb[215].mxu1  ;;  %4443 = vmatmul.mubr.bf16.gmra.mrb[208].mxu0 %v4142_v14 }
 0x665   : > { %v4000_v37 = vadd.f32 %v3999_v18, %v7856_v60 }
 0x666   : > { %v4112_v39 = vpack.c.bf16 %v3998_v16, %v3994_v10 }
 0x667   : > { %v4113_v32 = vpack.c.bf16 %v4000_v37, %v3996_v0 }
 0x668   : > { %v4144_v26 = vmax.bf16 %v6191_v2, %v4112_v39 }
 0x669   : > { %v4003_v21 = vpop.f32.mrb[216].mxu1  ;;  %v4145_v22 = vmax.bf16 %v6191_v2, %v4113_v32 }
 0x66a   : > { %v4005_v24 = vpop.f32.mrb[217].mxu1  ;;  %v4004_v30 = vadd.f32 %v4003_v21, %v7853_v25 }
 0x66b   : > { %v4007_v23 = vpop.f32.mrb[218].mxu1  ;;  %4452 = vmatprep.mubr.bf16.mxu0 %v4145_v22  ;;  %v4006_v33 = vadd.f32 %v4005_v24, %v7856_v60 }
 0x66c   : > { %v4008_v38 = vadd.f32 %v4007_v23, %v7853_v25  ;;  %v4009_v27 = vpop.f32.mrb[219].mxu1  ;;  %4453 = vmatmul.mubr.bf16.gmra.mrb[212].mxu0 %v4144_v26 }
 0x66d   : > { %v4010_v36 = vadd.f32 %v4009_v27, %v7856_v60 }
 0x66e   : > { %v4114_v29 = vpack.c.bf16 %v4008_v38, %v4004_v30 }
 0x66f   : > { %v4115_v13 = vpack.c.bf16 %v4010_v36, %v4006_v33 }
 0x670   : > { %v4146_v35 = vmax.bf16 %v6191_v2, %v4114_v29 }
 0x671   : > { %v4013_v45 = vpop.f32.mrb[220].mxu1  ;;  %v4147_v31 = vmax.bf16 %v6191_v2, %v4115_v13 }
 0x672   : > { %v4015_v34 = vpop.f32.mrb[221].mxu1  ;;  %v4014_v40 = vadd.f32 %v4013_v45, %v7853_v25 }
 0x673   : > { %v4017_v4 = vpop.f32.mrb[222].mxu1  ;;  %4462 = vmatprep.mubr.bf16.mxu0 %v4147_v31  ;;  %v4016_v43 = vadd.f32 %v4015_v34, %v7856_v60 }
 0x674   : > { %v4018_v41 = vadd.f32 %v4017_v4, %v7853_v25  ;;  %v4019_v42 = vpop.f32.mrb[223].mxu1  ;;  %4463 = vmatmul.mubr.bf16.gmra.mrb[216].mxu0 %v4146_v35 }
 0x675   : > { %v4020_v52 = vadd.f32 %v4019_v42, %v7856_v60 }
 0x676   : > { %v4116_v17 = vpack.c.bf16 %v4018_v41, %v4014_v40 }
 0x677   : > { %v4117_v44 = vpack.c.bf16 %v4020_v52, %v4016_v43  ;;  %v6181_v52 = vld [vmem:[%s8181_s18 + $0x78] sm:$0xff]  }
 0x678   : > { %v4148_v53 = vmax.bf16 %v6191_v2, %v4116_v17  ;;  %5596 = vmatprep.subr.bf16.mxu0 %v6181_v52  ;;  %5701 = vmatprep.subr.bf16.mxu1 %v6181_v52 }
 0x679   : > { %v4023_v47 = vpop.f32.mrb[224].mxu1  ;;  %v4149_v49 = vmax.bf16 %v6191_v2, %v4117_v44 }
 0x67a   : > { %v4025_v50 = vpop.f32.mrb[225].mxu1  ;;  %v4024_v51 = vadd.f32 %v4023_v47, %v7853_v25  ;;  %v6182_v47 = vld [vmem:[%s8181_s18 + $0x38] sm:$0xff]  }
 0x67b   : > { %v4027_v55 = vpop.f32.mrb[226].mxu1  ;;  %4472 = vmatprep.mubr.bf16.mxu0 %v4149_v49  ;;  %v4026_v7 = vadd.f32 %v4025_v50, %v7856_v60  ;;  %5597 = vmatpush3.bf16.msra.mxu0 %v6182_v47 }
 0x67c   : > { %v4028_v54 = vadd.f32 %v4027_v55, %v7853_v25  ;;  %v4029_v56 = vpop.f32.mrb[227].mxu1  ;;  %4473 = vmatmul.mubr.bf16.gmra.mrb[220].mxu0 %v4148_v53  ;;  %5709 = vmatpush3.bf16.msra.mxu1 %v6182_v47 }
 0x67d   : > { %v4030_v57 = vadd.f32 %v4029_v56, %v7856_v60 }
 0x67e   : > { %v4118_v63 = vpack.c.bf16 %v4028_v54, %v4024_v51 }
 0x67f   : > { %v4119_v3 = vpack.c.bf16 %v4030_v57, %v4026_v7 }
 0x680   : > { %v4150_v62 = vmax.bf16 %v6191_v2, %v4118_v63 }
 0x681   : > { %v4033_v58 = vpop.f32.mrb[228].mxu1  ;;  %v4151_v61 = vmax.bf16 %v6191_v2, %v4119_v3 }
 0x682   : > { %v4035_v59 = vpop.f32.mrb[229].mxu1  ;;  %v4034_v5 = vadd.f32 %v4033_v58, %v7853_v25 }
 0x683   : > { %v4037_v1 = vpop.f32.mrb[230].mxu1  ;;  %4482 = vmatprep.mubr.bf16.mxu0 %v4151_v61  ;;  %v4036_v9 = vadd.f32 %v4035_v59, %v7856_v60 }
 0x684   : > { %v4038_v6 = vadd.f32 %v4037_v1, %v7853_v25  ;;  %v4039_v8 = vpop.f32.mrb[231].mxu1  ;;  %4483 = vmatmul.mubr.bf16.gmra.mrb[224].mxu0 %v4150_v62 }
 0x685   : > { %v4040_v19 = vadd.f32 %v4039_v8, %v7856_v60 }
 0x686   : > { %v4120_v20 = vpack.c.bf16 %v4038_v6, %v4034_v5 }
 0x687   : > { %v4121_v11 = vpack.c.bf16 %v4040_v19, %v4036_v9 }
 0x688   : > { %v4152_v15 = vmax.bf16 %v6191_v2, %v4120_v20 }
 0x689   : > { %v4043_v28 = vpop.f32.mrb[232].mxu1  ;;  %v4153_v12 = vmax.bf16 %v6191_v2, %v4121_v11 }
 0x68a   : > { %v4045_v14 = vpop.f32.mrb[233].mxu1  ;;  %v4044_v16 = vadd.f32 %v4043_v28, %v7853_v25 }
 0x68b   : > { %v4047_v10 = vpop.f32.mrb[234].mxu1  ;;  %4492 = vmatprep.mubr.bf16.mxu0 %v4153_v12  ;;  %v4046_v37 = vadd.f32 %v4045_v14, %v7856_v60 }
 0x68c   : > { %v4048_v18 = vadd.f32 %v4047_v10, %v7853_v25  ;;  %v4049_v0 = vpop.f32.mrb[235].mxu1  ;;  %4493 = vmatmul.mubr.bf16.gmra.mrb[228].mxu0 %v4152_v15 }
 0x68d   : > { %v4050_v39 = vadd.f32 %v4049_v0, %v7856_v60 }
 0x68e   : > { %v4122_v32 = vpack.c.bf16 %v4048_v18, %v4044_v16 }
 0x68f   : > { %v4123_v21 = vpack.c.bf16 %v4050_v39, %v4046_v37 }
 0x690   : > { %v4154_v23 = vmax.bf16 %v6191_v2, %v4122_v32 }
 0x691   : > { %v4053_v22 = vpop.f32.mrb[236].mxu1  ;;  %v4155_v24 = vmax.bf16 %v6191_v2, %v4123_v21 }
 0x692   : > { %v4055_v26 = vpop.f32.mrb[237].mxu1  ;;  %v4054_v38 = vadd.f32 %v4053_v22, %v7853_v25 }
 0x693   : > { %v4057_v30 = vpop.f32.mrb[238].mxu1  ;;  %4502 = vmatprep.mubr.bf16.mxu0 %v4155_v24  ;;  %v4056_v36 = vadd.f32 %v4055_v26, %v7856_v60 }
 0x694   : > { %v4058_v27 = vadd.f32 %v4057_v30, %v7853_v25  ;;  %v4059_v33 = vpop.f32.mrb[239].mxu1  ;;  %4503 = vmatmul.mubr.bf16.gmra.mrb[232].mxu0 %v4154_v23 }
 0x695   : > { %v4060_v29 = vadd.f32 %v4059_v33, %v7856_v60 }
 0x696   : > { %v4124_v13 = vpack.c.bf16 %v4058_v27, %v4054_v38  ;;  %v4198_v38 = vld [vmem:[%s8180_s17] sm:$0x3] }
 0x697   : > { %v4125_v45 = vpack.c.bf16 %v4060_v29, %v4056_v36  ;;  %v8003_v33 = vrot.slane %v4198_v38, %v6576_v48 }
 0x698   : > { %v4156_v4 = vmax.bf16 %v6191_v2, %v4124_v13 }
 0x699   : > { %v4063_v31 = vpop.f32.mrb[240].mxu1  ;;  %v4157_v34 = vmax.bf16 %v6191_v2, %v4125_v45 }
 0x69a   : > { %v4065_v35 = vpop.f32.mrb[241].mxu1  ;;  %v4064_v41 = vadd.f32 %v4063_v31, %v7853_v25 }
 0x69b   : > { %v4067_v40 = vpop.f32.mrb[242].mxu1  ;;  %4512 = vmatprep.mubr.bf16.mxu0 %v4157_v34  ;;  %v4066_v17 = vadd.f32 %v4065_v35, %v7856_v60 }
 0x69c   : > { %v4068_v42 = vadd.f32 %v4067_v40, %v7853_v25  ;;  %v4069_v43 = vpop.f32.mrb[243].mxu1  ;;  %4513 = vmatmul.mubr.bf16.gmra.mrb[236].mxu0 %v4156_v4 }
 0x69d   : > { %v4070_v44 = vadd.f32 %v4069_v43, %v7856_v60 }
 0x69e   : > { %v4126_v49 = vpack.c.bf16 %v4068_v42, %v4064_v41 }
 0x69f   : > { %v4127_v50 = vpack.c.bf16 %v4070_v44, %v4066_v17 }
 0x6a0   : > { %v4158_v54 = vmax.bf16 %v6191_v2, %v4126_v49 }
 0x6a1   : > { %v4073_v53 = vpop.f32.mrb[244].mxu1  ;;  %v4159_v55 = vmax.bf16 %v6191_v2, %v4127_v50 }
 0x6a2   : > { %v4075_v51 = vpop.f32.mrb[245].mxu1  ;;  %v4074_v7 = vadd.f32 %v4073_v53, %v7853_v25 }
 0x6a3   : > { %v4077_v56 = vpop.f32.mrb[246].mxu1  ;;  %4522 = vmatprep.mubr.bf16.mxu0 %v4159_v55  ;;  %v4076_v3 = vadd.f32 %v4075_v51, %v7856_v60 }
 0x6a4   : > { %v4078_v57 = vadd.f32 %v4077_v56, %v7853_v25  ;;  %v4079_v63 = vpop.f32.mrb[247].mxu1  ;;  %4523 = vmatmul.mubr.bf16.gmra.mrb[240].mxu0 %v4158_v54 }
 0x6a5   : > { %v4080_v58 = vadd.f32 %v4079_v63, %v7856_v60 }
 0x6a6   : > { %v4128_v61 = vpack.c.bf16 %v4078_v57, %v4074_v7 }
 0x6a7   : > { %v4129_v59 = vpack.c.bf16 %v4080_v58, %v4076_v3 }
 0x6a8   : > { %v4160_v6 = vmax.bf16 %v6191_v2, %v4128_v61 }
 0x6a9   : > { %v4083_v62 = vpop.f32.mrb[248].mxu1  ;;  %v4161_v1 = vmax.bf16 %v6191_v2, %v4129_v59 }
 0x6aa   : > { %v4085_v5 = vpop.f32.mrb[249].mxu1  ;;  %v4084_v9 = vadd.f32 %v4083_v62, %v7853_v25 }
 0x6ab   : > { %v4087_v8 = vpop.f32.mrb[250].mxu1  ;;  %4532 = vmatprep.mubr.bf16.mxu0 %v4161_v1  ;;  %v4086_v11 = vadd.f32 %v4085_v5, %v7856_v60 }
 0x6ac   : > { %v4088_v19 = vadd.f32 %v4087_v8, %v7853_v25  ;;  %v4089_v20 = vpop.f32.mrb[251].mxu1  ;;  %4533 = vmatmul.mubr.bf16.gmra.mrb[244].mxu0 %v4160_v6 }
 0x6ad   : > { %v4090_v28 = vadd.f32 %v4089_v20, %v7856_v60 }
 0x6ae   : > { %v4130_v12 = vpack.c.bf16 %v4088_v19, %v4084_v9 }
 0x6af   : > { %v4131_v14 = vpack.c.bf16 %v4090_v28, %v4086_v11 }
 0x6b0   : > { %v4162_v18 = vmax.bf16 %v6191_v2, %v4130_v12 }
 0x6b1   : > { %v4093_v15 = vpop.f32.mrb[252].mxu1  ;;  %v4163_v10 = vmax.bf16 %v6191_v2, %v4131_v14 }
 0x6b2   : > { %v4095_v16 = vpop.f32.mrb[253].mxu1  ;;  %v4094_v37 = vadd.f32 %v4093_v15, %v7853_v25 }
 0x6b3   : > { %v4097_v0 = vpop.f32.mrb[254].mxu1  ;;  %4542 = vmatprep.mubr.bf16.mxu0 %v4163_v10  ;;  %v4096_v21 = vadd.f32 %v4095_v16, %v7856_v60 }
 0x6b4   : > { %v4098_v39 = vadd.f32 %v4097_v0, %v7853_v25  ;;  %v4099_v32 = vpop.f32.mrb[255].mxu1  ;;  %4543 = vmatmul.mubr.bf16.gmra.mrb[248].mxu0 %v4162_v18  ;;  %v8000_v25 = vrot.slane %v4198_v38, %v6571_v46 }
 0x6b5   : > { %v4100_v22 = vadd.f32 %v4099_v32, %v7856_v60 }
 0x6b6   : > { %v4132_v24 = vpack.c.bf16 %v4098_v39, %v4094_v37 }
 0x6b7   : > { %v4133_v26 = vpack.c.bf16 %v4100_v22, %v4096_v21 }
 0x6b8   : > { %v4164_v30 = vmax.bf16 %v6191_v2, %v4132_v24 }
 0x6b9   : > { %v4165_v23 = vmax.bf16 %v6191_v2, %v4133_v26 }
 0x6bb   : > { %4552 = vmatprep.mubr.bf16.mxu0 %v4165_v23 }
 0x6bc   : > { %4553 = vmatmul.mubr.bf16.gmra.mrb[252].mxu0 %v4164_v30 }
 0x717   : > { %v4404_v27 = vpop.f32.mrb[192].mxu0 }
 0x718   : > { %v4406_v60 = vpop.f32.mrb[193].mxu0  ;;  %v4405_v29 = vadd.f32 %v4404_v27, %v8000_v25 }
 0x719   : > { %v4408_v36 = vpop.f32.mrb[194].mxu0  ;;  %v4407_v31 = vadd.f32 %v4406_v60, %v8003_v33 }
 0x71a   : > { %v4409_v13 = vadd.f32 %v4408_v36, %v8000_v25  ;;  %v4410_v45 = vpop.f32.mrb[195].mxu0 }
 0x71b   : > { %v4411_v34 = vadd.f32 %v4410_v45, %v8003_v33 }
 0x71c   : > { %v4563_v35 = vpack.c.bf16 %v4409_v13, %v4405_v29 }
 0x71d   : > { %v4564_v4 = vpack.c.bf16 %v4411_v34, %v4407_v31 }
 0x71e   : > { %v4595_v41 = vmax.bf16 %v6191_v2, %v4563_v35 }
 0x71f   : > { %v4414_v40 = vpop.f32.mrb[196].mxu0  ;;  %v4596_v46 = vmax.bf16 %v6191_v2, %v4564_v4 }
 0x720   : > { %v4416_v48 = vpop.f32.mrb[197].mxu0  ;;  %v4415_v43 = vadd.f32 %v4414_v40, %v8000_v25 }
 0x721   : > { %v4418_v42 = vpop.f32.mrb[198].mxu0  ;;  %4794 = vmatprep.mubr.bf16.mxu0 %v4596_v46  ;;  %v4417_v44 = vadd.f32 %v4416_v48, %v8003_v33 }
 0x722   : > { %v4419_v52 = vadd.f32 %v4418_v42, %v8000_v25  ;;  %v4420_v17 = vpop.f32.mrb[199].mxu0  ;;  %4795 = vmatmul.mubr.bf16.vlgmr.msra.gmra.mrb[0].mxu0 %v4595_v41 }
 0x723   : > { %v4421_v47 = vadd.f32 %v4420_v17, %v8003_v33 }
 0x724   : > { %v4565_v49 = vpack.c.bf16 %v4419_v52, %v4415_v43 }
 0x725   : > { %v4566_v50 = vpack.c.bf16 %v4421_v47, %v4417_v44 }
 0x726   : > { %v4597_v51 = vmax.bf16 %v6191_v2, %v4565_v49 }
 0x727   : > { %v4424_v53 = vpop.f32.mrb[200].mxu0  ;;  %v4598_v55 = vmax.bf16 %v6191_v2, %v4566_v50 }
 0x728   : > { %v4426_v54 = vpop.f32.mrb[201].mxu0  ;;  %v4425_v7 = vadd.f32 %v4424_v53, %v8000_v25 }
 0x729   : > { %v4428_v56 = vpop.f32.mrb[202].mxu0  ;;  %4802 = vmatprep.mubr.bf16.mxu0 %v4598_v55  ;;  %v4427_v3 = vadd.f32 %v4426_v54, %v8003_v33 }
 0x72a   : > { %v4429_v57 = vadd.f32 %v4428_v56, %v8000_v25  ;;  %v4430_v63 = vpop.f32.mrb[203].mxu0  ;;  %4803 = vmatmul.mubr.bf16.gmra.mrb[4].mxu0 %v4597_v51 }
 0x72b   : > { %v4431_v58 = vadd.f32 %v4430_v63, %v8003_v33 }
 0x72c   : > { %v4567_v61 = vpack.c.bf16 %v4429_v57, %v4425_v7 }
 0x72d   : > { %v4568_v59 = vpack.c.bf16 %v4431_v58, %v4427_v3 }
 0x72e   : > { %v4599_v5 = vmax.bf16 %v6191_v2, %v4567_v61 }
 0x72f   : > { %v4434_v62 = vpop.f32.mrb[204].mxu0  ;;  %v4600_v1 = vmax.bf16 %v6191_v2, %v4568_v59 }
 0x730   : > { %v4436_v6 = vpop.f32.mrb[205].mxu0  ;;  %v4435_v9 = vadd.f32 %v4434_v62, %v8000_v25 }
 0x731   : > { %v4438_v8 = vpop.f32.mrb[206].mxu0  ;;  %4810 = vmatprep.mubr.bf16.mxu1 %v4600_v1  ;;  %v4437_v11 = vadd.f32 %v4436_v6, %v8003_v33 }
 0x732   : > { %v4439_v19 = vadd.f32 %v4438_v8, %v8000_v25  ;;  %v4440_v20 = vpop.f32.mrb[207].mxu0  ;;  %4811 = vmatmul.mubr.bf16.vlgmr.msra.gmra.mrb[0].mxu1 %v4599_v5 }
 0x733   : > { %v4441_v28 = vadd.f32 %v4440_v20, %v8003_v33 }
 0x734   : > { %v4569_v12 = vpack.c.bf16 %v4439_v19, %v4435_v9 }
 0x735   : > { %v4570_v14 = vpack.c.bf16 %v4441_v28, %v4437_v11 }
 0x736   : > { %v4601_v16 = vmax.bf16 %v6191_v2, %v4569_v12 }
 0x737   : > { %v4444_v15 = vpop.f32.mrb[208].mxu0  ;;  %v4602_v10 = vmax.bf16 %v6191_v2, %v4570_v14 }
 0x738   : > { %v4446_v18 = vpop.f32.mrb[209].mxu0  ;;  %v4445_v37 = vadd.f32 %v4444_v15, %v8000_v25 }
 0x739   : > { %v4448_v0 = vpop.f32.mrb[210].mxu0  ;;  %4818 = vmatprep.mubr.bf16.mxu1 %v4602_v10  ;;  %v4447_v21 = vadd.f32 %v4446_v18, %v8003_v33 }
 0x73a   : > { %v4449_v39 = vadd.f32 %v4448_v0, %v8000_v25  ;;  %v4450_v32 = vpop.f32.mrb[211].mxu0  ;;  %4819 = vmatmul.mubr.bf16.gmra.mrb[4].mxu1 %v4601_v16 }
 0x73b   : > { %v4451_v22 = vadd.f32 %v4450_v32, %v8003_v33 }
 0x73c   : > { %v4571_v24 = vpack.c.bf16 %v4449_v39, %v4445_v37 }
 0x73d   : > { %v4572_v26 = vpack.c.bf16 %v4451_v22, %v4447_v21 }
 0x73e   : > { %v4603_v38 = vmax.bf16 %v6191_v2, %v4571_v24 }
 0x73f   : > { %v4454_v23 = vpop.f32.mrb[212].mxu0  ;;  %v4604_v30 = vmax.bf16 %v6191_v2, %v4572_v26 }
 0x740   : > { %v4456_v27 = vpop.f32.mrb[213].mxu0  ;;  %v4455_v36 = vadd.f32 %v4454_v23, %v8000_v25 }
 0x741   : > { %v4458_v60 = vpop.f32.mrb[214].mxu0  ;;  %4826 = vmatprep.mubr.bf16.mxu1 %v4604_v30  ;;  %v4457_v45 = vadd.f32 %v4456_v27, %v8003_v33 }
 0x742   : > { %v4459_v29 = vadd.f32 %v4458_v60, %v8000_v25  ;;  %v4460_v13 = vpop.f32.mrb[215].mxu0  ;;  %4827 = vmatmul.mubr.bf16.gmra.mrb[8].mxu1 %v4603_v38 }
 0x743   : > { %v4461_v31 = vadd.f32 %v4460_v13, %v8003_v33 }
 0x744   : > { %v4573_v34 = vpack.c.bf16 %v4459_v29, %v4455_v36 }
 0x745   : > { %v4574_v35 = vpack.c.bf16 %v4461_v31, %v4457_v45 }
 0x746   : > { %v4605_v46 = vmax.bf16 %v6191_v2, %v4573_v34 }
 0x747   : > { %v4464_v4 = vpop.f32.mrb[216].mxu0  ;;  %v4606_v40 = vmax.bf16 %v6191_v2, %v4574_v35 }
 0x748   : > { %v4466_v41 = vpop.f32.mrb[217].mxu0  ;;  %v4465_v42 = vadd.f32 %v4464_v4, %v8000_v25 }
 0x749   : > { %v4468_v48 = vpop.f32.mrb[218].mxu0  ;;  %4834 = vmatprep.mubr.bf16.mxu1 %v4606_v40  ;;  %v4467_v17 = vadd.f32 %v4466_v41, %v8003_v33 }
 0x74a   : > { %v4469_v43 = vadd.f32 %v4468_v48, %v8000_v25  ;;  %v4470_v52 = vpop.f32.mrb[219].mxu0  ;;  %4835 = vmatmul.mubr.bf16.gmra.mrb[12].mxu1 %v4605_v46 }
 0x74b   : > { %v4471_v44 = vadd.f32 %v4470_v52, %v8003_v33 }
 0x74c   : > { %v4575_v47 = vpack.c.bf16 %v4469_v43, %v4465_v42 }
 0x74d   : > { %v4576_v49 = vpack.c.bf16 %v4471_v44, %v4467_v17 }
 0x74e   : > { %v4607_v55 = vmax.bf16 %v6191_v2, %v4575_v47 }
 0x74f   : > { %v4474_v50 = vpop.f32.mrb[220].mxu0  ;;  %v4608_v53 = vmax.bf16 %v6191_v2, %v4576_v49 }
 0x750   : > { %v4476_v51 = vpop.f32.mrb[221].mxu0  ;;  %v4475_v56 = vadd.f32 %v4474_v50, %v8000_v25 }
 0x751   : > { %v4478_v54 = vpop.f32.mrb[222].mxu0  ;;  %4842 = vmatprep.mubr.bf16.mxu1 %v4608_v53  ;;  %v4477_v63 = vadd.f32 %v4476_v51, %v8003_v33 }
 0x752   : > { %v4479_v7 = vadd.f32 %v4478_v54, %v8000_v25  ;;  %v4480_v57 = vpop.f32.mrb[223].mxu0  ;;  %4843 = vmatmul.mubr.bf16.gmra.mrb[16].mxu1 %v4607_v55 }
 0x753   : > { %v4481_v3 = vadd.f32 %v4480_v57, %v8003_v33 }
 0x754   : > { %v4577_v58 = vpack.c.bf16 %v4479_v7, %v4475_v56 }
 0x755   : > { %v4578_v61 = vpack.c.bf16 %v4481_v3, %v4477_v63 }
 0x756   : > { %v4609_v1 = vmax.bf16 %v6191_v2, %v4577_v58 }
 0x757   : > { %v4484_v59 = vpop.f32.mrb[224].mxu0  ;;  %v4610_v62 = vmax.bf16 %v6191_v2, %v4578_v61 }
 0x758   : > { %v4486_v5 = vpop.f32.mrb[225].mxu0  ;;  %v4485_v8 = vadd.f32 %v4484_v59, %v8000_v25 }
 0x759   : > { %v4488_v6 = vpop.f32.mrb[226].mxu0  ;;  %4850 = vmatprep.mubr.bf16.mxu1 %v4610_v62  ;;  %v4487_v20 = vadd.f32 %v4486_v5, %v8003_v33 }
 0x75a   : > { %v4489_v9 = vadd.f32 %v4488_v6, %v8000_v25  ;;  %v4490_v19 = vpop.f32.mrb[227].mxu0  ;;  %4851 = vmatmul.mubr.bf16.gmra.mrb[20].mxu1 %v4609_v1 }
 0x75b   : > { %v4491_v11 = vadd.f32 %v4490_v19, %v8003_v33 }
 0x75c   : > { %v4579_v28 = vpack.c.bf16 %v4489_v9, %v4485_v8 }
 0x75d   : > { %v4580_v12 = vpack.c.bf16 %v4491_v11, %v4487_v20 }
 0x75e   : > { %v4611_v10 = vmax.bf16 %v6191_v2, %v4579_v28 }
 0x75f   : > { %v4494_v14 = vpop.f32.mrb[228].mxu0  ;;  %v4612_v15 = vmax.bf16 %v6191_v2, %v4580_v12 }
 0x760   : > { %v4496_v16 = vpop.f32.mrb[229].mxu0  ;;  %v4495_v0 = vadd.f32 %v4494_v14, %v8000_v25 }
 0x761   : > { %v4498_v18 = vpop.f32.mrb[230].mxu0  ;;  %4858 = vmatprep.mubr.bf16.mxu1 %v4612_v15  ;;  %v4497_v32 = vadd.f32 %v4496_v16, %v8003_v33 }
 0x762   : > { %v4499_v37 = vadd.f32 %v4498_v18, %v8000_v25  ;;  %v4500_v39 = vpop.f32.mrb[231].mxu0  ;;  %4859 = vmatmul.mubr.bf16.gmra.mrb[24].mxu1 %v4611_v10 }
 0x763   : > { %v4501_v21 = vadd.f32 %v4500_v39, %v8003_v33 }
 0x764   : > { %v4581_v22 = vpack.c.bf16 %v4499_v37, %v4495_v0 }
 0x765   : > { %v4582_v24 = vpack.c.bf16 %v4501_v21, %v4497_v32 }
 0x766   : > { %v4613_v30 = vmax.bf16 %v6191_v2, %v4581_v22 }
 0x767   : > { %v4504_v26 = vpop.f32.mrb[232].mxu0  ;;  %v4614_v23 = vmax.bf16 %v6191_v2, %v4582_v24 }
 0x768   : > { %v4506_v38 = vpop.f32.mrb[233].mxu0  ;;  %v4505_v60 = vadd.f32 %v4504_v26, %v8000_v25 }
 0x769   : > { %v4508_v27 = vpop.f32.mrb[234].mxu0  ;;  %4866 = vmatprep.mubr.bf16.mxu1 %v4614_v23  ;;  %v4507_v13 = vadd.f32 %v4506_v38, %v8003_v33 }
 0x76a   : > { %v4509_v36 = vadd.f32 %v4508_v27, %v8000_v25  ;;  %v4510_v29 = vpop.f32.mrb[235].mxu0  ;;  %4867 = vmatmul.mubr.bf16.gmra.mrb[28].mxu1 %v4613_v30 }
 0x76b   : > { %v4511_v45 = vadd.f32 %v4510_v29, %v8003_v33 }
 0x76c   : > { %v4583_v31 = vpack.c.bf16 %v4509_v36, %v4505_v60 }
 0x76d   : > { %v4584_v34 = vpack.c.bf16 %v4511_v45, %v4507_v13 }
 0x76e   : > { %v4615_v40 = vmax.bf16 %v6191_v2, %v4583_v31 }
 0x76f   : > { %v4514_v35 = vpop.f32.mrb[236].mxu0  ;;  %v4616_v4 = vmax.bf16 %v6191_v2, %v4584_v34 }
 0x770   : > { %v4516_v46 = vpop.f32.mrb[237].mxu0  ;;  %v4515_v48 = vadd.f32 %v4514_v35, %v8000_v25 }
 0x771   : > { %v4518_v41 = vpop.f32.mrb[238].mxu0  ;;  %4874 = vmatprep.mubr.bf16.mxu1 %v4616_v4  ;;  %v4517_v52 = vadd.f32 %v4516_v46, %v8003_v33 }
 0x772   : > { %v4519_v42 = vadd.f32 %v4518_v41, %v8000_v25  ;;  %v4520_v43 = vpop.f32.mrb[239].mxu0  ;;  %4875 = vmatmul.mubr.bf16.gmra.mrb[32].mxu1 %v4615_v40 }
 0x773   : > { %v4521_v17 = vadd.f32 %v4520_v43, %v8003_v33 }
 0x774   : > { %v4585_v44 = vpack.c.bf16 %v4519_v42, %v4515_v48 }
 0x775   : > { %v4586_v47 = vpack.c.bf16 %v4521_v17, %v4517_v52 }
 0x776   : > { %v4617_v53 = vmax.bf16 %v6191_v2, %v4585_v44 }
 0x777   : > { %v4524_v49 = vpop.f32.mrb[240].mxu0  ;;  %v4618_v50 = vmax.bf16 %v6191_v2, %v4586_v47 }
 0x778   : > { %v4526_v55 = vpop.f32.mrb[241].mxu0  ;;  %v4525_v54 = vadd.f32 %v4524_v49, %v8000_v25 }
 0x779   : > { %v4528_v51 = vpop.f32.mrb[242].mxu0  ;;  %4882 = vmatprep.mubr.bf16.mxu1 %v4618_v50  ;;  %v4527_v57 = vadd.f32 %v4526_v55, %v8003_v33 }
 0x77a   : > { %v4529_v56 = vadd.f32 %v4528_v51, %v8000_v25  ;;  %v4530_v7 = vpop.f32.mrb[243].mxu0  ;;  %4883 = vmatmul.mubr.bf16.gmra.mrb[36].mxu1 %v4617_v53 }
 0x77b   : > { %v4531_v63 = vadd.f32 %v4530_v7, %v8003_v33 }
 0x77c   : > { %v4587_v3 = vpack.c.bf16 %v4529_v56, %v4525_v54 }
 0x77d   : > { %v4588_v58 = vpack.c.bf16 %v4531_v63, %v4527_v57 }
 0x77e   : > { %v4619_v62 = vmax.bf16 %v6191_v2, %v4587_v3 }
 0x77f   : > { %v4534_v61 = vpop.f32.mrb[244].mxu0  ;;  %v4620_v59 = vmax.bf16 %v6191_v2, %v4588_v58 }
 0x780   : > { %v4536_v1 = vpop.f32.mrb[245].mxu0  ;;  %v4535_v6 = vadd.f32 %v4534_v61, %v8000_v25 }
 0x781   : > { %v4538_v5 = vpop.f32.mrb[246].mxu0  ;;  %4890 = vmatprep.mubr.bf16.mxu1 %v4620_v59  ;;  %v4537_v19 = vadd.f32 %v4536_v1, %v8003_v33 }
 0x782   : > { %v4539_v8 = vadd.f32 %v4538_v5, %v8000_v25  ;;  %v4540_v9 = vpop.f32.mrb[247].mxu0  ;;  %4891 = vmatmul.mubr.bf16.gmra.mrb[40].mxu1 %v4619_v62 }
 0x783   : > { %v4541_v20 = vadd.f32 %v4540_v9, %v8003_v33 }
 0x784   : > { %v4589_v11 = vpack.c.bf16 %v4539_v8, %v4535_v6 }
 0x785   : > { %v4590_v28 = vpack.c.bf16 %v4541_v20, %v4537_v19 }
 0x786   : > { %v4621_v15 = vmax.bf16 %v6191_v2, %v4589_v11 }
 0x787   : > { %v4544_v12 = vpop.f32.mrb[248].mxu0  ;;  %v4622_v14 = vmax.bf16 %v6191_v2, %v4590_v28 }
 0x788   : > { %v4546_v10 = vpop.f32.mrb[249].mxu0  ;;  %v4545_v18 = vadd.f32 %v4544_v12, %v8000_v25 }
 0x789   : > { %v4548_v16 = vpop.f32.mrb[250].mxu0  ;;  %4898 = vmatprep.mubr.bf16.mxu1 %v4622_v14  ;;  %v4547_v39 = vadd.f32 %v4546_v10, %v8003_v33 }
 0x78a   : > { %v4549_v0 = vadd.f32 %v4548_v16, %v8000_v25  ;;  %v4550_v37 = vpop.f32.mrb[251].mxu0  ;;  %4899 = vmatmul.mubr.bf16.gmra.mrb[44].mxu1 %v4621_v15 }
 0x78b   : > { %v4551_v32 = vadd.f32 %v4550_v37, %v8003_v33 }
 0x78c   : > { %v4591_v21 = vpack.c.bf16 %v4549_v0, %v4545_v18 }
 0x78d   : > { %v4592_v22 = vpack.c.bf16 %v4551_v32, %v4547_v39 }
 0x78e   : > { %v4623_v23 = vmax.bf16 %v6191_v2, %v4591_v21 }
 0x78f   : > { %v4554_v24 = vpop.f32.mrb[252].mxu0  ;;  %v4624_v26 = vmax.bf16 %v6191_v2, %v4592_v22 }
 0x790   : > { %v4556_v30 = vpop.f32.mrb[253].mxu0  ;;  %v4555_v27 = vadd.f32 %v4554_v24, %v8000_v25 }
 0x791   : > { %v4558_v38 = vpop.f32.mrb[254].mxu0  ;;  %4906 = vmatprep.mubr.bf16.mxu1 %v4624_v26  ;;  %v4557_v29 = vadd.f32 %v4556_v30, %v8003_v33 }
 0x792   : > { %v4559_v60 = vadd.f32 %v4558_v38, %v8000_v25  ;;  %v4560_v36 = vpop.f32.mrb[255].mxu0  ;;  %4907 = vmatmul.mubr.bf16.gmra.mrb[48].mxu1 %v4623_v23  ;;  %v8104_v25 = vld [vmem:[%s8182_s19] ss:$0 sm:$0xff] }
 0x793   : > { %v4561_v13 = vadd.f32 %v4560_v36, %v8003_v33 }
 0x794   : > { %v4593_v45 = vpack.c.bf16 %v4559_v60, %v4555_v27 }
 0x795   : > { %v4594_v31 = vpack.c.bf16 %v4561_v13, %v4557_v29 }
 0x796   : > { %v4625_v35 = vmax.bf16 %v6191_v2, %v4593_v45 }
 0x797   : > { %v4626_v34 = vmax.bf16 %v6191_v2, %v4594_v31 }
 0x799   : > { %4914 = vmatprep.mubr.bf16.mxu1 %v4626_v34 }
 0x79a   : > { %4915 = vmatmul.mubr.bf16.gmra.mrb[52].mxu1 %v4625_v35 }
 0x7f5   : > { %v5598_v4 = vpop.f32.mrb[0].mxu0 }
 0x7f6   : > { %v5599_v40 = vpop.f32.mrb[1].mxu0 }
 0x7f7   : > { %v5600_v46 = vadd.f32 %v5599_v40, %v5598_v4  ;;  %v5601_v41 = vpop.f32.mrb[2].mxu0 }
 0x7f8   : > { %v5602_v48 = vpop.f32.mrb[3].mxu0 }
 0x7f9   : > { %v5603_v33 = vadd.f32 %v5602_v48, %v5601_v41  ;;  %v4797_v42 = vadd.f32 %v5600_v46, %v8104_v25 }
 0x7fb   : > { %v4800_v43 = vadd.f32 %v5603_v33, %v8104_v25 }
 0x7fd   : > { %v5490_v2 = vpack.c.bf16 %v4800_v43, %v4797_v42  ;;  %v5604_v52 = vpop.f32.mrb[4].mxu0 }
 0x7fe   : > { %v5605_v17 = vpop.f32.mrb[5].mxu0 }
 0x7ff   : > { %5491 = vst [vmem:[%s8112_s29] sm:$0xff] %v5490_v2   ;;  %v5606_v44 = vadd.f32 %v5605_v17, %v5604_v52  ;;  %v5607_v47 = vpop.f32.mrb[6].mxu0 }
 0x800   : > { %v5608_v49 = vpop.f32.mrb[7].mxu0 }
 0x801   : > { %v5609_v50 = vadd.f32 %v5608_v49, %v5607_v47  ;;  %v4805_v53 = vadd.f32 %v5606_v44, %v8104_v25 }
 0x803   : > { %v4808_v55 = vadd.f32 %v5609_v50, %v8104_v25 }
 0x805   : > { %v5495_v51 = vpack.c.bf16 %v4808_v55, %v4805_v53  ;;  %v5610_v54 = vpop.f32.mrb[0].mxu1 }
 0x806   : > { %v5611_v56 = vpop.f32.mrb[1].mxu1 }
 0x807   : > { %5567 = vst [vmem:[%s8112_s29 + $0x8] sm:$0xff] %v5495_v51   ;;  %v5612_v7 = vadd.f32 %v5611_v56, %v5610_v54  ;;  %v5613_v57 = vpop.f32.mrb[2].mxu1 }
 0x808   : > { %v5614_v63 = vpop.f32.mrb[3].mxu1 }
 0x809   : > { %v5615_v3 = vadd.f32 %v5614_v63, %v5613_v57  ;;  %v4813_v58 = vadd.f32 %v5612_v7, %v8104_v25 }
 0x80b   : > { %v4816_v61 = vadd.f32 %v5615_v3, %v8104_v25 }
 0x80d   : > { %v5500_v59 = vpack.c.bf16 %v4816_v61, %v4813_v58  ;;  %v5616_v62 = vpop.f32.mrb[4].mxu1 }
 0x80e   : > { %v5617_v1 = vpop.f32.mrb[5].mxu1 }
 0x80f   : > { %5568 = vst [vmem:[%s8112_s29 + $0x10] sm:$0xff] %v5500_v59   ;;  %v5618_v5 = vadd.f32 %v5617_v1, %v5616_v62  ;;  %v5619_v6 = vpop.f32.mrb[6].mxu1 }
 0x810   : > { %v5620_v8 = vpop.f32.mrb[7].mxu1 }
 0x811   : > { %v5621_v9 = vadd.f32 %v5620_v8, %v5619_v6  ;;  %v4821_v19 = vadd.f32 %v5618_v5, %v8104_v25 }
 0x813   : > { %v4824_v20 = vadd.f32 %v5621_v9, %v8104_v25 }
 0x815   : > { %v5505_v11 = vpack.c.bf16 %v4824_v20, %v4821_v19  ;;  %v5622_v28 = vpop.f32.mrb[8].mxu1 }
 0x816   : > { %v5623_v12 = vpop.f32.mrb[9].mxu1 }
 0x817   : > { %5569 = vst [vmem:[%s8112_s29 + $0x18] sm:$0xff] %v5505_v11   ;;  %v5624_v14 = vadd.f32 %v5623_v12, %v5622_v28  ;;  %v5625_v15 = vpop.f32.mrb[10].mxu1 }
 0x818   : > { %v5626_v10 = vpop.f32.mrb[11].mxu1 }
 0x819   : > { %v5627_v16 = vadd.f32 %v5626_v10, %v5625_v15  ;;  %v4829_v18 = vadd.f32 %v5624_v14, %v8104_v25 }
 0x81b   : > { %v4832_v0 = vadd.f32 %v5627_v16, %v8104_v25 }
 0x81d   : > { %v5510_v37 = vpack.c.bf16 %v4832_v0, %v4829_v18  ;;  %v5628_v39 = vpop.f32.mrb[12].mxu1 }
 0x81e   : > { %v5629_v32 = vpop.f32.mrb[13].mxu1 }
 0x81f   : > { %5570 = vst [vmem:[%s8112_s29 + $0x20] sm:$0xff] %v5510_v37   ;;  %v5630_v21 = vadd.f32 %v5629_v32, %v5628_v39  ;;  %v5631_v22 = vpop.f32.mrb[14].mxu1 }
 0x820   : > { %v5632_v24 = vpop.f32.mrb[15].mxu1 }
 0x821   : > { %v5633_v26 = vadd.f32 %v5632_v24, %v5631_v22  ;;  %v4837_v23 = vadd.f32 %v5630_v21, %v8104_v25 }
 0x823   : > { %v4840_v30 = vadd.f32 %v5633_v26, %v8104_v25 }
 0x825   : > { %v5515_v38 = vpack.c.bf16 %v4840_v30, %v4837_v23  ;;  %v5634_v27 = vpop.f32.mrb[16].mxu1 }
 0x826   : > { %v5635_v60 = vpop.f32.mrb[17].mxu1 }
 0x827   : > { %5571 = vst [vmem:[%s8112_s29 + $0x28] sm:$0xff] %v5515_v38   ;;  %v5636_v36 = vadd.f32 %v5635_v60, %v5634_v27  ;;  %v5637_v29 = vpop.f32.mrb[18].mxu1 }
 0x828   : > { %v5638_v13 = vpop.f32.mrb[19].mxu1 }
 0x829   : > { %v5639_v45 = vadd.f32 %v5638_v13, %v5637_v29  ;;  %v4845_v31 = vadd.f32 %v5636_v36, %v8104_v25 }
 0x82b   : > { %v4848_v34 = vadd.f32 %v5639_v45, %v8104_v25 }
 0x82d   : > { %v5520_v35 = vpack.c.bf16 %v4848_v34, %v4845_v31  ;;  %v5640_v4 = vpop.f32.mrb[20].mxu1 }
 0x82e   : > { %v5641_v40 = vpop.f32.mrb[21].mxu1 }
 0x82f   : > { %5572 = vst [vmem:[%s8112_s29 + $0x30] sm:$0xff] %v5520_v35   ;;  %v5642_v46 = vadd.f32 %v5641_v40, %v5640_v4  ;;  %v5643_v41 = vpop.f32.mrb[22].mxu1 }
 0x830   : > { %v5644_v48 = vpop.f32.mrb[23].mxu1 }
 0x831   : > { %v5645_v33 = vadd.f32 %v5644_v48, %v5643_v41  ;;  %v4853_v42 = vadd.f32 %v5642_v46, %v8104_v25 }
 0x833   : > { %v4856_v43 = vadd.f32 %v5645_v33, %v8104_v25 }
 0x835   : > { %v5525_v2 = vpack.c.bf16 %v4856_v43, %v4853_v42  ;;  %v5646_v52 = vpop.f32.mrb[24].mxu1 }
 0x836   : > { %v5647_v17 = vpop.f32.mrb[25].mxu1 }
 0x837   : > { %5573 = vst [vmem:[%s8112_s29 + $0x38] sm:$0xff] %v5525_v2   ;;  %v5648_v44 = vadd.f32 %v5647_v17, %v5646_v52  ;;  %v5649_v47 = vpop.f32.mrb[26].mxu1 }
 0x838   : > { %v5650_v49 = vpop.f32.mrb[27].mxu1 }
 0x839   : > { %v5651_v50 = vadd.f32 %v5650_v49, %v5649_v47  ;;  %v4861_v53 = vadd.f32 %v5648_v44, %v8104_v25 }
 0x83b   : > { %v4864_v55 = vadd.f32 %v5651_v50, %v8104_v25 }
 0x83d   : > { %v5530_v51 = vpack.c.bf16 %v4864_v55, %v4861_v53  ;;  %v5652_v54 = vpop.f32.mrb[28].mxu1 }
 0x83e   : > { %v5653_v56 = vpop.f32.mrb[29].mxu1 }
 0x83f   : > { %5574 = vst [vmem:[%s8112_s29 + $0x40] sm:$0xff] %v5530_v51   ;;  %v5654_v7 = vadd.f32 %v5653_v56, %v5652_v54  ;;  %v5655_v57 = vpop.f32.mrb[30].mxu1 }
 0x840   : > { %v5656_v63 = vpop.f32.mrb[31].mxu1 }
 0x841   : > { %v5657_v3 = vadd.f32 %v5656_v63, %v5655_v57  ;;  %v4869_v58 = vadd.f32 %v5654_v7, %v8104_v25 }
 0x843   : > { %v4872_v61 = vadd.f32 %v5657_v3, %v8104_v25 }
 0x845   : > { %v5535_v59 = vpack.c.bf16 %v4872_v61, %v4869_v58  ;;  %v5658_v62 = vpop.f32.mrb[32].mxu1 }
 0x846   : > { %v5659_v1 = vpop.f32.mrb[33].mxu1 }
 0x847   : > { %5575 = vst [vmem:[%s8112_s29 + $0x48] sm:$0xff] %v5535_v59   ;;  %v5660_v5 = vadd.f32 %v5659_v1, %v5658_v62  ;;  %v5661_v6 = vpop.f32.mrb[34].mxu1 }
 0x848   : > { %v5662_v8 = vpop.f32.mrb[35].mxu1 }
 0x849   : > { %v5663_v9 = vadd.f32 %v5662_v8, %v5661_v6  ;;  %v4877_v19 = vadd.f32 %v5660_v5, %v8104_v25 }
 0x84b   : > { %v4880_v20 = vadd.f32 %v5663_v9, %v8104_v25 }
 0x84d   : > { %v5540_v11 = vpack.c.bf16 %v4880_v20, %v4877_v19  ;;  %v5664_v28 = vpop.f32.mrb[36].mxu1 }
 0x84e   : > { %v5665_v12 = vpop.f32.mrb[37].mxu1 }
 0x84f   : > { %5576 = vst [vmem:[%s8112_s29 + $0x50] sm:$0xff] %v5540_v11   ;;  %v5666_v14 = vadd.f32 %v5665_v12, %v5664_v28  ;;  %v5667_v15 = vpop.f32.mrb[38].mxu1 }
 0x850   : > { %v5668_v10 = vpop.f32.mrb[39].mxu1 }
 0x851   : > { %v5669_v16 = vadd.f32 %v5668_v10, %v5667_v15  ;;  %v4885_v18 = vadd.f32 %v5666_v14, %v8104_v25 }
 0x853   : > { %v4888_v0 = vadd.f32 %v5669_v16, %v8104_v25 }
 0x855   : > { %v5545_v37 = vpack.c.bf16 %v4888_v0, %v4885_v18  ;;  %v5670_v39 = vpop.f32.mrb[40].mxu1 }
 0x856   : > { %v5671_v32 = vpop.f32.mrb[41].mxu1 }
 0x857   : > { %5577 = vst [vmem:[%s8112_s29 + $0x58] sm:$0xff] %v5545_v37   ;;  %v5672_v21 = vadd.f32 %v5671_v32, %v5670_v39  ;;  %v5673_v22 = vpop.f32.mrb[42].mxu1 }
 0x858   : > { %v5674_v24 = vpop.f32.mrb[43].mxu1 }
 0x859   : > { %v5675_v26 = vadd.f32 %v5674_v24, %v5673_v22  ;;  %v4893_v23 = vadd.f32 %v5672_v21, %v8104_v25 }
 0x85b   : > { %v4896_v30 = vadd.f32 %v5675_v26, %v8104_v25 }
 0x85d   : > { %v5550_v38 = vpack.c.bf16 %v4896_v30, %v4893_v23  ;;  %v5676_v27 = vpop.f32.mrb[44].mxu1 }
 0x85e   : > { %v5677_v60 = vpop.f32.mrb[45].mxu1 }
 0x85f   : > { %5578 = vst [vmem:[%s8112_s29 + $0x60] sm:$0xff] %v5550_v38   ;;  %v5678_v36 = vadd.f32 %v5677_v60, %v5676_v27  ;;  %v5679_v29 = vpop.f32.mrb[46].mxu1 }
 0x860   : > { %v5680_v13 = vpop.f32.mrb[47].mxu1 }
 0x861   : > { %v5681_v45 = vadd.f32 %v5680_v13, %v5679_v29  ;;  %v4901_v31 = vadd.f32 %v5678_v36, %v8104_v25 }
 0x863   : > { %v4904_v34 = vadd.f32 %v5681_v45, %v8104_v25 }
 0x865   : > { %v5555_v35 = vpack.c.bf16 %v4904_v34, %v4901_v31  ;;  %v5682_v4 = vpop.f32.mrb[48].mxu1 }
 0x866   : > { %v5683_v40 = vpop.f32.mrb[49].mxu1 }
 0x867   : > { %5579 = vst [vmem:[%s8112_s29 + $0x68] sm:$0xff] %v5555_v35   ;;  %v5684_v46 = vadd.f32 %v5683_v40, %v5682_v4  ;;  %v5685_v41 = vpop.f32.mrb[50].mxu1 }
 0x868   : > { %v5686_v48 = vpop.f32.mrb[51].mxu1 }
 0x869   : > { %v5687_v33 = vadd.f32 %v5686_v48, %v5685_v41  ;;  %v4909_v42 = vadd.f32 %v5684_v46, %v8104_v25 }
 0x86b   : > { %v4912_v43 = vadd.f32 %v5687_v33, %v8104_v25 }
 0x86d   : > { %v5560_v2 = vpack.c.bf16 %v4912_v43, %v4909_v42  ;;  %v5688_v52 = vpop.f32.mrb[52].mxu1 }
 0x86e   : > { %v5689_v17 = vpop.f32.mrb[53].mxu1 }
 0x86f   : > { %5580 = vst [vmem:[%s8112_s29 + $0x70] sm:$0xff] %v5560_v2   ;;  %v5690_v44 = vadd.f32 %v5689_v17, %v5688_v52  ;;  %v5691_v47 = vpop.f32.mrb[54].mxu1 }
 0x870   : > { %v5692_v49 = vpop.f32.mrb[55].mxu1 }
 0x871   : > { %v5693_v50 = vadd.f32 %v5692_v49, %v5691_v47  ;;  %v4917_v53 = vadd.f32 %v5690_v44, %v8104_v25 }
 0x873   : > { %v4920_v55 = vadd.f32 %v5693_v50, %v8104_v25 }
 0x875   : > { %v5565_v51 = vpack.c.bf16 %v4920_v55, %v4917_v53 }
 0x877   : > { %5581 = vst [vmem:[%s8112_s29 + $0x78] sm:$0xff] %v5565_v51  }
 0x878 PF: > { %s8200_s25 = sld [smem:[#allocation2_spill]] }
 0x87e   : > { %s30_s1 = sadd.s32 1, %s8200_s25  }
 0x87f   : > { %p27_p4 = scmp.ge.s32.totalorder %s30_s1, 6  }
 0x881   :  { %29 = sbr.rel (!%p27_p4) target bundleno = 7 (0x7), region = 130 }

</bundles_post_ra>
